<compile_context>
chip_gen: v7x
topology: tpu7x:2x2x1
jax: 0.10.0
libtpu: 0.0.40
codegen_flags: <defaults>
</compile_context>

<pallas_src>
import functools

import jax
import jax.numpy as jnp
from jax.experimental import pallas as pl
from jax.experimental.pallas import tpu as pltpu

_BN_EPS = 1e-5


# ---------------------------------------------------------------------------
# Fused kernel
# ---------------------------------------------------------------------------
def _upsample_kernel(x_ref, skip_ref, m_ref, w1_ref, b1_ref, w2_ref, b2_ref,
                     wph_ref, bph_ref, e_ref, out_ref,
                     abuf, bbuf, pat, zflat, zimg,
                     *, in_ch, mid, cpad, out_ch, H, W, padf):
    HW = H * W

    # Flat zero-padded activation buffers: pad regions / unused channels read as 0.
    abuf[...] = jnp.zeros_like(abuf)
    bbuf[...] = jnp.zeros_like(bbuf)
    abuf[0:in_ch, padf:padf + HW] = x_ref[...]

    m_lo = m_ref[0:1, :]   # 0 where w' == 0      (left  taps, kw == 0)
    m_hi = m_ref[1:2, :]   # 0 where w' == W - 1  (right taps, kw == 2)

    def conv3x3_bn_relu(src, wmat_ref, bias_ref):
        # im2col: 9 shifted flat windows of the padded buffer -> pat(9*cpad, HW).
        for kh in range(3):
            for kw in range(3):
                off = (kh - 1) * W + (kw - 1)
                p = src[:, padf + off:padf + off + HW]
                if kw == 0:
                    p = p * m_lo
                elif kw == 2:
                    p = p * m_hi
                t = kh * 3 + kw
                pat[t * cpad:(t + 1) * cpad, :] = p
        # Single MXU matmul, K = 9*cpad, N = H*W on the lane axis (lane-dense).
        # BatchNorm scale is folded into wmat on the host; bias is the folded bias.
        y = jnp.dot(wmat_ref[...], pat[...], preferred_element_type=jnp.float32)
        return jnp.maximum(y + bias_ref[...], 0.0)

    # ---- Conv_BN_ReLU_2 -----------------------------------------------------
    y1 = conv3x3_bn_relu(abuf, w1_ref, b1_ref)            # (mid, HW)
    bbuf[0:mid, padf:padf + HW] = y1
    y2 = conv3x3_bn_relu(bbuf, w2_ref, b2_ref)            # (mid, HW)
    abuf[0:mid, padf:padf + HW] = y2                      # reuse abuf for stage 3

    # ---- Sub-pixel ConvTranspose2d(3, stride=2, pad=1, output_padding=1) ----
    # 4 shifted copies of y2; one matmul emits all 4 output phases at once.
    pat[0 * cpad:1 * cpad, :] = abuf[:, padf:padf + HW]                          # y2[h', w']
    pat[1 * cpad:2 * cpad, :] = abuf[:, padf + 1:padf + 1 + HW] * m_hi           # y2[h', w'+1]
    pat[2 * cpad:3 * cpad, :] = abuf[:, padf + W:padf + W + HW]                  # y2[h'+1, w']
    pat[3 * cpad:4 * cpad, :] = abuf[:, padf + W + 1:padf + W + 1 + HW] * m_hi   # y2[h'+1, w'+1]
    z = jnp.dot(wph_ref[...], pat[0:4 * cpad, :],
                preferred_element_type=jnp.float32)       # (4*out_ch, HW), phases on rows
    z = jnp.maximum(z + bph_ref[...], 0.0)
    zflat[...] = z

    # (4*out_ch, H*W) -> (4*out_ch, H, W): move h from lanes to sublanes.
    for h in range(H):
        zimg[:, h, :] = zflat[:, h * W:(h + 1) * W]

    # Stride-2 column interleave (depth-to-space) via constant 0/1 matrices:
    # e0 scatters to even output columns, e1 to odd output columns.
    e0 = e_ref[0:W, :]
    e1 = e_ref[W:2 * W, :]

    def phase(t):   # (out_ch, H, W) -> (out_ch*H, W); rows = (channel, h)
        return zimg[t * out_ch:(t + 1) * out_ch, :, :].reshape(out_ch * H, W)

    ze = (jnp.dot(phase(0), e0, preferred_element_type=jnp.float32) +
          jnp.dot(phase(1), e1, preferred_element_type=jnp.float32))   # even output rows
    zo = (jnp.dot(phase(2), e0, preferred_element_type=jnp.float32) +
          jnp.dot(phase(3), e1, preferred_element_type=jnp.float32))   # odd output rows

    # Fused concat: channels [0, out_ch) <- upsample result, [out_ch, 2*out_ch) <- skip.
    # Output row (c*H + h) holds image rows 2h (cols 0:2W) and 2h+1 (cols 2W:4W),
    # so the (N, 2*out_ch*H, 4W) buffer is a free row-major view of NCHW.
    out_ref[0:out_ch * H, 0:2 * W] = ze
    out_ref[0:out_ch * H, 2 * W:4 * W] = zo
    out_ref[out_ch * H:2 * out_ch * H, :] = skip_ref[...]


# ---------------------------------------------------------------------------
# Host-side parameter packing (eval-mode BN folded, conv -> matmul matrices)
# ---------------------------------------------------------------------------
def _fold_bn(conv_bias, gamma, beta, mean, var):
    scale = gamma / jnp.sqrt(var + _BN_EPS)
    bias = beta + (conv_bias - mean) * scale
    return scale, bias


def _pack_conv(w_oihw, scale, bias, cpad):
    """Conv2d weight (Cout, Cin, 3, 3) -> (Cout, 9*cpad) matmul matrix (BN scale folded)."""
    cout, cin = w_oihw.shape[:2]
    w = jnp.transpose(w_oihw, (2, 3, 0, 1)).reshape(9, cout, cin)     # [t, co, ci], t = kh*3+kw
    w = jnp.pad(w, ((0, 0), (0, 0), (0, cpad - cin)))
    wmat = jnp.transpose(w, (1, 0, 2)).reshape(cout, 9 * cpad)        # [co, t*cpad + ci]
    return wmat * scale[:, None], bias[:, None]


def _pack_convtranspose(wt, scale, bias, cpad):
    """ConvTranspose2d weight (Cin, Cout, 3, 3) -> (4*Cout, 4*cpad) sub-pixel matrix.

    Row r = t*Cout + co is output phase t = 2*ph + pw (oh = 2h'+ph, ow = 2w'+pw);
    column block s selects the shifted input s0=y[h',w'], s1=y[h',w'+1],
    s2=y[h'+1,w'], s3=y[h'+1,w'+1].
    """
    cin, cout = wt.shape[:2]
    wk = jnp.transpose(wt, (2, 3, 1, 0))        # [kh, kw, co, ci]
    zb = jnp.zeros((cout, cin), wt.dtype)
    blocks = [
        [wk[1, 1], zb,       zb,       zb      ],   # (2h',   2w')
        [wk[1, 2], wk[1, 0], zb,       zb      ],   # (2h',   2w'+1)
        [wk[2, 1], zb,       wk[0, 1], zb      ],   # (2h'+1, 2w')
        [wk[2, 2], wk[2, 0], wk[0, 2], wk[0, 0]],   # (2h'+1, 2w'+1)
    ]
    rows = []
    for blk in blocks:
        row = jnp.concatenate(
            [jnp.pad(b, ((0, 0), (0, cpad - cin))) for b in blk], axis=1)
        rows.append(row * scale[:, None])
    wph = jnp.concatenate(rows, axis=0)          # (4*cout, 4*cpad)
    bph = jnp.tile(bias, 4)[:, None]             # (4*cout, 1)
    return wph, bph


def make_raw_params(seed, in_ch, out_ch):
    """Deterministic synthetic parameters mirroring UpSampleLayer.__init__ shapes."""
    mid = out_ch * 2
    keys = iter(jax.random.split(jax.random.PRNGKey(seed), 18))

    def nrm(shape, scl=0.1):
        return scl * jax.random.normal(next(keys), shape, jnp.float32)

    def bn(c):
        return (1.0 + nrm((c,)), nrm((c,)), nrm((c,)), 0.5 + jnp.abs(nrm((c,))))

    return {
        "w1": nrm((mid, in_ch, 3, 3)), "b1": nrm((mid,)), "bn1": bn(mid),
        "w2": nrm((mid, mid, 3, 3)),   "b2": nrm((mid,)), "bn2": bn(mid),
        "wt": nrm((mid, out_ch, 3, 3)), "bt": nrm((out_ch,)), "bnt": bn(out_ch),
    }


def pack_params(raw):
    in_ch = raw["w1"].shape[1]
    mid = raw["w1"].shape[0]
    cpad = ((max(in_ch, mid) + 7) // 8) * 8
    s1, fb1 = _fold_bn(raw["b1"], *raw["bn1"])
    s2, fb2 = _fold_bn(raw["b2"], *raw["bn2"])
    st, fbt = _fold_bn(raw["bt"], *raw["bnt"])
    w1, b1 = _pack_conv(raw["w1"], s1, fb1, cpad)
    w2, b2 = _pack_conv(raw["w2"], s2, fb2, cpad)
    wph, bph = _pack_convtranspose(raw["wt"], st, fbt, cpad)
    return {"w1": w1, "b1": b1, "w2": w2, "b2": b2, "wph": wph, "bph": bph}


# ---------------------------------------------------------------------------
# Forward wrapper
# ---------------------------------------------------------------------------
def upsample_layer_forward(params, x_nchw, skip_nchw):
    n, in_ch, H, W = x_nchw.shape
    mid = params["w1"].shape[0]
    cpad = params["w1"].shape[1] // 9
    out_ch = params["wph"].shape[0] // 4
    HW = H * W
    padf = ((W + 1 + 127) // 128) * 128   # flat pad >= W+1, vreg-aligned interior

    # free row-major views (no data movement)
    x_flat = x_nchw.reshape(n, in_ch, HW).astype(jnp.float32)
    skip_flat = skip_nchw.reshape(n, out_ch * H, 4 * W).astype(jnp.float32)

    # column masks for the left/right conv taps + 0/1 column-interleave matrix
    col = jnp.arange(HW, dtype=jnp.int32) % W
    masks = jnp.stack([(col != 0), (col != W - 1)]).astype(jnp.float32)   # (2, HW)
    idx = jnp.arange(W)
    inter = jnp.zeros((2 * W, 2 * W), jnp.float32)
    inter = inter.at[idx, 2 * idx].set(1.0).at[W + idx, 2 * idx + 1].set(1.0)

    kernel = functools.partial(
        _upsample_kernel, in_ch=in_ch, mid=mid, cpad=cpad, out_ch=out_ch,
        H=H, W=W, padf=padf)

    out = pl.pallas_call(
        kernel,
        out_shape=jax.ShapeDtypeStruct((n, 2 * out_ch * H, 4 * W), jnp.float32),
        grid=(n,),
        in_specs=[
            pl.BlockSpec((None, in_ch, HW), lambda i: (i, 0, 0)),          # x
            pl.BlockSpec((None, out_ch * H, 4 * W), lambda i: (i, 0, 0)),  # skip
            pl.BlockSpec((2, HW), lambda i: (0, 0)),                       # column masks
            pl.BlockSpec((mid, 9 * cpad), lambda i: (0, 0)),               # conv1 matrix
            pl.BlockSpec((mid, 1), lambda i: (0, 0)),                      # conv1 bias
            pl.BlockSpec((mid, 9 * cpad), lambda i: (0, 0)),               # conv2 matrix
            pl.BlockSpec((mid, 1), lambda i: (0, 0)),                      # conv2 bias
            pl.BlockSpec((4 * out_ch, 4 * cpad), lambda i: (0, 0)),        # sub-pixel matrix
            pl.BlockSpec((4 * out_ch, 1), lambda i: (0, 0)),               # sub-pixel bias
            pl.BlockSpec((2 * W, 2 * W), lambda i: (0, 0)),                # interleave matrix
        ],
        out_specs=pl.BlockSpec((None, 2 * out_ch * H, 4 * W), lambda i: (i, 0, 0)),
        scratch_shapes=[
            pltpu.VMEM((cpad, HW + 2 * padf), jnp.float32),   # flat-padded buffer A
            pltpu.VMEM((cpad, HW + 2 * padf), jnp.float32),   # flat-padded buffer B
            pltpu.VMEM((9 * cpad, HW), jnp.float32),          # im2col patches
            pltpu.VMEM((4 * out_ch, HW), jnp.float32),        # phase outputs (flat)
            pltpu.VMEM((4 * out_ch, H, W), jnp.float32),      # phase outputs (image)
        ],
        compiler_params=pltpu.CompilerParams(
            dimension_semantics=("parallel",)),
    )(x_flat, skip_flat, masks, params["w1"], params["b1"],
      params["w2"], params["b2"], params["wph"], params["bph"], inter)

    # free view back to NCHW
    return out.reshape(n, 2 * out_ch, 2 * H, 2 * W)


# ---------------------------------------------------------------------------
# Pure-JAX reference of the same forward pass (eval-mode BN), for verification
# ---------------------------------------------------------------------------
def reference_forward(raw, x, skip):
    def bnorm(z, stats):
        g, b, m, v = stats
        inv = g / jnp.sqrt(v + _BN_EPS)
        return (z - m[None, :, None, None]) * inv[None, :, None, None] \
            + b[None, :, None, None]

    def conv(z, w, b):
        out = jax.lax.conv_general_dilated(
            z, w, (1, 1), ((1, 1), (1, 1)),
            dimension_numbers=("NCHW", "OIHW", "NCHW"),
            precision=jax.lax.Precision.HIGHEST)
        return out + b[None, :, None, None]

    z = jax.nn.relu(bnorm(conv(x, raw["w1"], raw["b1"]), raw["bn1"]))
    z = jax.nn.relu(bnorm(conv(z, raw["w2"], raw["b2"]), raw["bn2"]))
    # ConvTranspose2d(3, s=2, p=1, op=1) == dilated conv with flipped kernel
    wflip = jnp.transpose(jnp.flip(raw["wt"], (2, 3)), (1, 0, 2, 3))    # OIHW
    z = jax.lax.conv_general_dilated(
        z, wflip, (1, 1), ((1, 2), (1, 2)), lhs_dilation=(2, 2),
        dimension_numbers=("NCHW", "OIHW", "NCHW"),
        precision=jax.lax.Precision.HIGHEST)
    z = jax.nn.relu(bnorm(z + raw["bt"][None, :, None, None], raw["bnt"]))
    return jnp.concatenate([z, skip], axis=1)


if __name__ == "__main__":
    in_ch, out_ch = 4, 4
    N, H, W = 2, 16, 16

    raw = make_raw_params(0, in_ch, out_ch)
    params = pack_params(raw)

    kx, ks = jax.random.split(jax.random.PRNGKey(0))
    x = jax.random.normal(kx, (N, in_ch, H, W), jnp.float32)
    skip = jax.random.normal(ks, (N, out_ch, 2 * H, 2 * W), jnp.float32)

    y = jax.jit(upsample_layer_forward)(params, x, skip)
    jax.block_until_ready(y)
    assert y.shape == (N, 2 * out_ch, 2 * H, 2 * W), y.shape
    assert y.dtype == jnp.float32

    # numerical check against the pure-JAX reference (loose tolerance: the MXU
    # may run f32 matmuls at reduced internal precision)
    y_ref = jax.jit(reference_forward)(raw, x, skip)
    err = jnp.abs(y - y_ref)
    max_err = float(jnp.max(err))
    mean_err = float(jnp.mean(err))
    assert max_err < 3e-1 and mean_err < 5e-2, (max_err, mean_err)

    print("KERNEL_OK")
</pallas_src>

<mosaic_0001>
module attributes {stable_mosaic.version = 11 : i64} {
  func.func @_upsample_kernel(%arg0: i32, %arg1: memref<1x4x256xf32, #tpu.memory_space<vmem>>, %arg2: memref<1x64x64xf32, #tpu.memory_space<vmem>>, %arg3: memref<2x256xf32, #tpu.memory_space<vmem>>, %arg4: memref<8x72xf32, #tpu.memory_space<vmem>>, %arg5: memref<8x1xf32, #tpu.memory_space<vmem>>, %arg6: memref<8x72xf32, #tpu.memory_space<vmem>>, %arg7: memref<8x1xf32, #tpu.memory_space<vmem>>, %arg8: memref<16x32xf32, #tpu.memory_space<vmem>>, %arg9: memref<16x1xf32, #tpu.memory_space<vmem>>, %arg10: memref<32x32xf32, #tpu.memory_space<vmem>>, %arg11: memref<1x128x64xf32, #tpu.memory_space<vmem>>, %arg12: memref<8x512xf32, #tpu.memory_space<vmem>>, %arg13: memref<8x512xf32, #tpu.memory_space<vmem>>, %arg14: memref<72x256xf32, #tpu.memory_space<vmem>>, %arg15: memref<16x256xf32, #tpu.memory_space<vmem>>, %arg16: memref<16x16x16xf32, #tpu.memory_space<vmem>>) attributes {dimension_semantics = [#tpu.dimension_semantics<parallel>], iteration_bounds = array<i64: 2>, scalar_prefetch = 0 : i64, scratch_operands = 5 : i64, tpu.core_type = #tpu.core_type<tc>, window_params = [{transform_indices = @transform_0, window_bounds = array<i64: 1, 4, 256>}, {transform_indices = @transform_1, window_bounds = array<i64: 1, 64, 64>}, {pipeline_mode = #tpu.pipeline_mode<synchronous>, transform_indices = @transform_2, window_bounds = array<i64: 2, 256>}, {pipeline_mode = #tpu.pipeline_mode<synchronous>, transform_indices = @transform_3, window_bounds = array<i64: 8, 72>}, {pipeline_mode = #tpu.pipeline_mode<synchronous>, transform_indices = @transform_4, window_bounds = array<i64: 8, 1>}, {pipeline_mode = #tpu.pipeline_mode<synchronous>, transform_indices = @transform_5, window_bounds = array<i64: 8, 72>}, {pipeline_mode = #tpu.pipeline_mode<synchronous>, transform_indices = @transform_6, window_bounds = array<i64: 8, 1>}, {pipeline_mode = #tpu.pipeline_mode<synchronous>, transform_indices = @transform_7, window_bounds = array<i64: 16, 32>}, {pipeline_mode = #tpu.pipeline_mode<synchronous>, transform_indices = @transform_8, window_bounds = array<i64: 16, 1>}, {pipeline_mode = #tpu.pipeline_mode<synchronous>, transform_indices = @transform_9, window_bounds = array<i64: 32, 32>}, {transform_indices = @transform_10, window_bounds = array<i64: 1, 128, 64>}]} {
    %cst = arith.constant 0.000000e+00 : f32
    %0 = vector.broadcast %cst : f32 to vector<8x512xf32>
    %c0 = arith.constant 0 : index
    %c0_0 = arith.constant 0 : index
    %1 = vector.load %arg12[%c0, %c0_0] : memref<8x512xf32, #tpu.memory_space<vmem>>, vector<8x512xf32>
    tpu.vector_store %arg12[%c0, %c0_0], %0 {strides = array<i32>} : memref<8x512xf32, #tpu.memory_space<vmem>>, vector<8x512xf32>,
    %cst_1 = arith.constant 0.000000e+00 : f32
    %2 = vector.broadcast %cst_1 : f32 to vector<8x512xf32>
    %c0_2 = arith.constant 0 : index
    %c0_3 = arith.constant 0 : index
    %3 = vector.load %arg13[%c0_2, %c0_3] : memref<8x512xf32, #tpu.memory_space<vmem>>, vector<8x512xf32>
    tpu.vector_store %arg13[%c0_2, %c0_3], %2 {strides = array<i32>} : memref<8x512xf32, #tpu.memory_space<vmem>>, vector<8x512xf32>,
    %c0_4 = arith.constant 0 : index
    %c0_5 = arith.constant 0 : index
    %c0_6 = arith.constant 0 : index
    %4 = vector.load %arg1[%c0_4, %c0_5, %c0_6] : memref<1x4x256xf32, #tpu.memory_space<vmem>>, vector<1x4x256xf32>
    %5 = vector.shape_cast %4 : vector<1x4x256xf32> to vector<4x256xf32>
    %c0_7 = arith.constant 0 : index
    %c128 = arith.constant 128 : index
    %6 = vector.load %arg12[%c0_7, %c128] : memref<8x512xf32, #tpu.memory_space<vmem>>, vector<4x256xf32>
    tpu.vector_store %arg12[%c0_7, %c128], %5 {strides = array<i32>} : memref<8x512xf32, #tpu.memory_space<vmem>>, vector<4x256xf32>,
    %c0_8 = arith.constant 0 : index
    %c0_9 = arith.constant 0 : index
    %7 = vector.load %arg3[%c0_8, %c0_9] : memref<2x256xf32, #tpu.memory_space<vmem>>, vector<1x256xf32>
    %c1 = arith.constant 1 : index
    %c0_10 = arith.constant 0 : index
    %8 = vector.load %arg3[%c1, %c0_10] : memref<2x256xf32, #tpu.memory_space<vmem>>, vector<1x256xf32>
    %c0_11 = arith.constant 0 : index
    %c111 = arith.constant 111 : index
    %9 = vector.load %arg12[%c0_11, %c111] : memref<8x512xf32, #tpu.memory_space<vmem>>, vector<8x256xf32>
    %10 = vector.broadcast %7 : vector<1x256xf32> to vector<8x256xf32>
    %11 = arith.mulf %9, %10 : vector<8x256xf32>
    %c0_12 = arith.constant 0 : index
    %c0_13 = arith.constant 0 : index
    %12 = vector.load %arg14[%c0_12, %c0_13] : memref<72x256xf32, #tpu.memory_space<vmem>>, vector<8x256xf32>
    tpu.vector_store %arg14[%c0_12, %c0_13], %11 {strides = array<i32>} : memref<72x256xf32, #tpu.memory_space<vmem>>, vector<8x256xf32>,
    %c0_14 = arith.constant 0 : index
    %c112 = arith.constant 112 : index
    %13 = vector.load %arg12[%c0_14, %c112] : memref<8x512xf32, #tpu.memory_space<vmem>>, vector<8x256xf32>
    %c8 = arith.constant 8 : index
    %c0_15 = arith.constant 0 : index
    %14 = vector.load %arg14[%c8, %c0_15] : memref<72x256xf32, #tpu.memory_space<vmem>>, vector<8x256xf32>
    tpu.vector_store %arg14[%c8, %c0_15], %13 {strides = array<i32>} : memref<72x256xf32, #tpu.memory_space<vmem>>, vector<8x256xf32>,
    %c0_16 = arith.constant 0 : index
    %c113 = arith.constant 113 : index
    %15 = vector.load %arg12[%c0_16, %c113] : memref<8x512xf32, #tpu.memory_space<vmem>>, vector<8x256xf32>
    %16 = vector.broadcast %8 : vector<1x256xf32> to vector<8x256xf32>
    %17 = arith.mulf %15, %16 : vector<8x256xf32>
    %c16 = arith.constant 16 : index
    %c0_17 = arith.constant 0 : index
    %18 = vector.load %arg14[%c16, %c0_17] : memref<72x256xf32, #tpu.memory_space<vmem>>, vector<8x256xf32>
    tpu.vector_store %arg14[%c16, %c0_17], %17 {strides = array<i32>} : memref<72x256xf32, #tpu.memory_space<vmem>>, vector<8x256xf32>,
    %c0_18 = arith.constant 0 : index
    %c127 = arith.constant 127 : index
    %19 = vector.load %arg12[%c0_18, %c127] : memref<8x512xf32, #tpu.memory_space<vmem>>, vector<8x256xf32>
    %20 = vector.broadcast %7 : vector<1x256xf32> to vector<8x256xf32>
    %21 = arith.mulf %19, %20 : vector<8x256xf32>
    %c24 = arith.constant 24 : index
    %c0_19 = arith.constant 0 : index
    %22 = vector.load %arg14[%c24, %c0_19] : memref<72x256xf32, #tpu.memory_space<vmem>>, vector<8x256xf32>
    tpu.vector_store %arg14[%c24, %c0_19], %21 {strides = array<i32>} : memref<72x256xf32, #tpu.memory_space<vmem>>, vector<8x256xf32>,
    %c0_20 = arith.constant 0 : index
    %c128_21 = arith.constant 128 : index
    %23 = vector.load %arg12[%c0_20, %c128_21] : memref<8x512xf32, #tpu.memory_space<vmem>>, vector<8x256xf32>
    %c32 = arith.constant 32 : index
    %c0_22 = arith.constant 0 : index
    %24 = vector.load %arg14[%c32, %c0_22] : memref<72x256xf32, #tpu.memory_space<vmem>>, vector<8x256xf32>
    tpu.vector_store %arg14[%c32, %c0_22], %23 {strides = array<i32>} : memref<72x256xf32, #tpu.memory_space<vmem>>, vector<8x256xf32>,
    %c0_23 = arith.constant 0 : index
    %c129 = arith.constant 129 : index
    %25 = vector.load %arg12[%c0_23, %c129] : memref<8x512xf32, #tpu.memory_space<vmem>>, vector<8x256xf32>
    %26 = vector.broadcast %8 : vector<1x256xf32> to vector<8x256xf32>
    %27 = arith.mulf %25, %26 : vector<8x256xf32>
    %c40 = arith.constant 40 : index
    %c0_24 = arith.constant 0 : index
    %28 = vector.load %arg14[%c40, %c0_24] : memref<72x256xf32, #tpu.memory_space<vmem>>, vector<8x256xf32>
    tpu.vector_store %arg14[%c40, %c0_24], %27 {strides = array<i32>} : memref<72x256xf32, #tpu.memory_space<vmem>>, vector<8x256xf32>,
    %c0_25 = arith.constant 0 : index
    %c143 = arith.constant 143 : index
    %29 = vector.load %arg12[%c0_25, %c143] : memref<8x512xf32, #tpu.memory_space<vmem>>, vector<8x256xf32>
    %30 = vector.broadcast %7 : vector<1x256xf32> to vector<8x256xf32>
    %31 = arith.mulf %29, %30 : vector<8x256xf32>
    %c48 = arith.constant 48 : index
    %c0_26 = arith.constant 0 : index
    %32 = vector.load %arg14[%c48, %c0_26] : memref<72x256xf32, #tpu.memory_space<vmem>>, vector<8x256xf32>
    tpu.vector_store %arg14[%c48, %c0_26], %31 {strides = array<i32>} : memref<72x256xf32, #tpu.memory_space<vmem>>, vector<8x256xf32>,
    %c0_27 = arith.constant 0 : index
    %c144 = arith.constant 144 : index
    %33 = vector.load %arg12[%c0_27, %c144] : memref<8x512xf32, #tpu.memory_space<vmem>>, vector<8x256xf32>
    %c56 = arith.constant 56 : index
    %c0_28 = arith.constant 0 : index
    %34 = vector.load %arg14[%c56, %c0_28] : memref<72x256xf32, #tpu.memory_space<vmem>>, vector<8x256xf32>
    tpu.vector_store %arg14[%c56, %c0_28], %33 {strides = array<i32>} : memref<72x256xf32, #tpu.memory_space<vmem>>, vector<8x256xf32>,
    %c0_29 = arith.constant 0 : index
    %c145 = arith.constant 145 : index
    %35 = vector.load %arg12[%c0_29, %c145] : memref<8x512xf32, #tpu.memory_space<vmem>>, vector<8x256xf32>
    %36 = vector.broadcast %8 : vector<1x256xf32> to vector<8x256xf32>
    %37 = arith.mulf %35, %36 : vector<8x256xf32>
    %c64 = arith.constant 64 : index
    %c0_30 = arith.constant 0 : index
    %38 = vector.load %arg14[%c64, %c0_30] : memref<72x256xf32, #tpu.memory_space<vmem>>, vector<8x256xf32>
    tpu.vector_store %arg14[%c64, %c0_30], %37 {strides = array<i32>} : memref<72x256xf32, #tpu.memory_space<vmem>>, vector<8x256xf32>,
    %c0_31 = arith.constant 0 : index
    %c0_32 = arith.constant 0 : index
    %39 = vector.load %arg4[%c0_31, %c0_32] : memref<8x72xf32, #tpu.memory_space<vmem>>, vector<8x72xf32>
    %c0_33 = arith.constant 0 : index
    %c0_34 = arith.constant 0 : index
    %40 = vector.load %arg14[%c0_33, %c0_34] : memref<72x256xf32, #tpu.memory_space<vmem>>, vector<72x256xf32>
    %cst_35 = arith.constant dense<0.000000e+00> : vector<8x256xf32>
    %41 = tpu.matmul %39, %40, %cst_35 {dimension_numbers = #tpu.dot_dimension_numbers<[1], [0], [0], [1], [0, 0, 1, 1], [], []>} : vector<8x72xf32>, vector<72x256xf32>, vector<8x256xf32> -> vector<8x256xf32>
    %c0_36 = arith.constant 0 : index
    %c0_37 = arith.constant 0 : index
    %42 = vector.load %arg5[%c0_36, %c0_37] : memref<8x1xf32, #tpu.memory_space<vmem>>, vector<8x1xf32>
    %43 = vector.broadcast %42 : vector<8x1xf32> to vector<8x256xf32>
    %44 = arith.addf %41, %43 : vector<8x256xf32>
    %cst_38 = arith.constant 0.000000e+00 : f32
    %45 = vector.broadcast %cst_38 : f32 to vector<8x256xf32>
    %46 = arith.maximumf %44, %45 : vector<8x256xf32>
    %c0_39 = arith.constant 0 : index
    %c128_40 = arith.constant 128 : index
    %47 = vector.load %arg13[%c0_39, %c128_40] : memref<8x512xf32, #tpu.memory_space<vmem>>, vector<8x256xf32>
    tpu.vector_store %arg13[%c0_39, %c128_40], %46 {strides = array<i32>} : memref<8x512xf32, #tpu.memory_space<vmem>>, vector<8x256xf32>,
    %c0_41 = arith.constant 0 : index
    %c111_42 = arith.constant 111 : index
    %48 = vector.load %arg13[%c0_41, %c111_42] : memref<8x512xf32, #tpu.memory_space<vmem>>, vector<8x256xf32>
    %49 = vector.broadcast %7 : vector<1x256xf32> to vector<8x256xf32>
    %50 = arith.mulf %48, %49 : vector<8x256xf32>
    %c0_43 = arith.constant 0 : index
    %c0_44 = arith.constant 0 : index
    %51 = vector.load %arg14[%c0_43, %c0_44] : memref<72x256xf32, #tpu.memory_space<vmem>>, vector<8x256xf32>
    tpu.vector_store %arg14[%c0_43, %c0_44], %50 {strides = array<i32>} : memref<72x256xf32, #tpu.memory_space<vmem>>, vector<8x256xf32>,
    %c0_45 = arith.constant 0 : index
    %c112_46 = arith.constant 112 : index
    %52 = vector.load %arg13[%c0_45, %c112_46] : memref<8x512xf32, #tpu.memory_space<vmem>>, vector<8x256xf32>
    %c8_47 = arith.constant 8 : index
    %c0_48 = arith.constant 0 : index
    %53 = vector.load %arg14[%c8_47, %c0_48] : memref<72x256xf32, #tpu.memory_space<vmem>>, vector<8x256xf32>
    tpu.vector_store %arg14[%c8_47, %c0_48], %52 {strides = array<i32>} : memref<72x256xf32, #tpu.memory_space<vmem>>, vector<8x256xf32>,
    %c0_49 = arith.constant 0 : index
    %c113_50 = arith.constant 113 : index
    %54 = vector.load %arg13[%c0_49, %c113_50] : memref<8x512xf32, #tpu.memory_space<vmem>>, vector<8x256xf32>
    %55 = vector.broadcast %8 : vector<1x256xf32> to vector<8x256xf32>
    %56 = arith.mulf %54, %55 : vector<8x256xf32>
    %c16_51 = arith.constant 16 : index
    %c0_52 = arith.constant 0 : index
    %57 = vector.load %arg14[%c16_51, %c0_52] : memref<72x256xf32, #tpu.memory_space<vmem>>, vector<8x256xf32>
    tpu.vector_store %arg14[%c16_51, %c0_52], %56 {strides = array<i32>} : memref<72x256xf32, #tpu.memory_space<vmem>>, vector<8x256xf32>,
    %c0_53 = arith.constant 0 : index
    %c127_54 = arith.constant 127 : index
    %58 = vector.load %arg13[%c0_53, %c127_54] : memref<8x512xf32, #tpu.memory_space<vmem>>, vector<8x256xf32>
    %59 = vector.broadcast %7 : vector<1x256xf32> to vector<8x256xf32>
    %60 = arith.mulf %58, %59 : vector<8x256xf32>
    %c24_55 = arith.constant 24 : index
    %c0_56 = arith.constant 0 : index
    %61 = vector.load %arg14[%c24_55, %c0_56] : memref<72x256xf32, #tpu.memory_space<vmem>>, vector<8x256xf32>
    tpu.vector_store %arg14[%c24_55, %c0_56], %60 {strides = array<i32>} : memref<72x256xf32, #tpu.memory_space<vmem>>, vector<8x256xf32>,
    %c0_57 = arith.constant 0 : index
    %c128_58 = arith.constant 128 : index
    %62 = vector.load %arg13[%c0_57, %c128_58] : memref<8x512xf32, #tpu.memory_space<vmem>>, vector<8x256xf32>
    %c32_59 = arith.constant 32 : index
    %c0_60 = arith.constant 0 : index
    %63 = vector.load %arg14[%c32_59, %c0_60] : memref<72x256xf32, #tpu.memory_space<vmem>>, vector<8x256xf32>
    tpu.vector_store %arg14[%c32_59, %c0_60], %62 {strides = array<i32>} : memref<72x256xf32, #tpu.memory_space<vmem>>, vector<8x256xf32>,
    %c0_61 = arith.constant 0 : index
    %c129_62 = arith.constant 129 : index
    %64 = vector.load %arg13[%c0_61, %c129_62] : memref<8x512xf32, #tpu.memory_space<vmem>>, vector<8x256xf32>
    %65 = vector.broadcast %8 : vector<1x256xf32> to vector<8x256xf32>
    %66 = arith.mulf %64, %65 : vector<8x256xf32>
    %c40_63 = arith.constant 40 : index
    %c0_64 = arith.constant 0 : index
    %67 = vector.load %arg14[%c40_63, %c0_64] : memref<72x256xf32, #tpu.memory_space<vmem>>, vector<8x256xf32>
    tpu.vector_store %arg14[%c40_63, %c0_64], %66 {strides = array<i32>} : memref<72x256xf32, #tpu.memory_space<vmem>>, vector<8x256xf32>,
    %c0_65 = arith.constant 0 : index
    %c143_66 = arith.constant 143 : index
    %68 = vector.load %arg13[%c0_65, %c143_66] : memref<8x512xf32, #tpu.memory_space<vmem>>, vector<8x256xf32>
    %69 = vector.broadcast %7 : vector<1x256xf32> to vector<8x256xf32>
    %70 = arith.mulf %68, %69 : vector<8x256xf32>
    %c48_67 = arith.constant 48 : index
    %c0_68 = arith.constant 0 : index
    %71 = vector.load %arg14[%c48_67, %c0_68] : memref<72x256xf32, #tpu.memory_space<vmem>>, vector<8x256xf32>
    tpu.vector_store %arg14[%c48_67, %c0_68], %70 {strides = array<i32>} : memref<72x256xf32, #tpu.memory_space<vmem>>, vector<8x256xf32>,
    %c0_69 = arith.constant 0 : index
    %c144_70 = arith.constant 144 : index
    %72 = vector.load %arg13[%c0_69, %c144_70] : memref<8x512xf32, #tpu.memory_space<vmem>>, vector<8x256xf32>
    %c56_71 = arith.constant 56 : index
    %c0_72 = arith.constant 0 : index
    %73 = vector.load %arg14[%c56_71, %c0_72] : memref<72x256xf32, #tpu.memory_space<vmem>>, vector<8x256xf32>
    tpu.vector_store %arg14[%c56_71, %c0_72], %72 {strides = array<i32>} : memref<72x256xf32, #tpu.memory_space<vmem>>, vector<8x256xf32>,
    %c0_73 = arith.constant 0 : index
    %c145_74 = arith.constant 145 : index
    %74 = vector.load %arg13[%c0_73, %c145_74] : memref<8x512xf32, #tpu.memory_space<vmem>>, vector<8x256xf32>
    %75 = vector.broadcast %8 : vector<1x256xf32> to vector<8x256xf32>
    %76 = arith.mulf %74, %75 : vector<8x256xf32>
    %c64_75 = arith.constant 64 : index
    %c0_76 = arith.constant 0 : index
    %77 = vector.load %arg14[%c64_75, %c0_76] : memref<72x256xf32, #tpu.memory_space<vmem>>, vector<8x256xf32>
    tpu.vector_store %arg14[%c64_75, %c0_76], %76 {strides = array<i32>} : memref<72x256xf32, #tpu.memory_space<vmem>>, vector<8x256xf32>,
    %c0_77 = arith.constant 0 : index
    %c0_78 = arith.constant 0 : index
    %78 = vector.load %arg6[%c0_77, %c0_78] : memref<8x72xf32, #tpu.memory_space<vmem>>, vector<8x72xf32>
    %c0_79 = arith.constant 0 : index
    %c0_80 = arith.constant 0 : index
    %79 = vector.load %arg14[%c0_79, %c0_80] : memref<72x256xf32, #tpu.memory_space<vmem>>, vector<72x256xf32>
    %cst_81 = arith.constant dense<0.000000e+00> : vector<8x256xf32>
    %80 = tpu.matmul %78, %79, %cst_81 {dimension_numbers = #tpu.dot_dimension_numbers<[1], [0], [0], [1], [0, 0, 1, 1], [], []>} : vector<8x72xf32>, vector<72x256xf32>, vector<8x256xf32> -> vector<8x256xf32>
    %c0_82 = arith.constant 0 : index
    %c0_83 = arith.constant 0 : index
    %81 = vector.load %arg7[%c0_82, %c0_83] : memref<8x1xf32, #tpu.memory_space<vmem>>, vector<8x1xf32>
    %82 = vector.broadcast %81 : vector<8x1xf32> to vector<8x256xf32>
    %83 = arith.addf %80, %82 : vector<8x256xf32>
    %cst_84 = arith.constant 0.000000e+00 : f32
    %84 = vector.broadcast %cst_84 : f32 to vector<8x256xf32>
    %85 = arith.maximumf %83, %84 : vector<8x256xf32>
    %c0_85 = arith.constant 0 : index
    %c128_86 = arith.constant 128 : index
    %86 = vector.load %arg12[%c0_85, %c128_86] : memref<8x512xf32, #tpu.memory_space<vmem>>, vector<8x256xf32>
    tpu.vector_store %arg12[%c0_85, %c128_86], %85 {strides = array<i32>} : memref<8x512xf32, #tpu.memory_space<vmem>>, vector<8x256xf32>,
    %c0_87 = arith.constant 0 : index
    %c128_88 = arith.constant 128 : index
    %87 = vector.load %arg12[%c0_87, %c128_88] : memref<8x512xf32, #tpu.memory_space<vmem>>, vector<8x256xf32>
    %c0_89 = arith.constant 0 : index
    %c0_90 = arith.constant 0 : index
    %88 = vector.load %arg14[%c0_89, %c0_90] : memref<72x256xf32, #tpu.memory_space<vmem>>, vector<8x256xf32>
    tpu.vector_store %arg14[%c0_89, %c0_90], %87 {strides = array<i32>} : memref<72x256xf32, #tpu.memory_space<vmem>>, vector<8x256xf32>,
    %c0_91 = arith.constant 0 : index
    %c129_92 = arith.constant 129 : index
    %89 = vector.load %arg12[%c0_91, %c129_92] : memref<8x512xf32, #tpu.memory_space<vmem>>, vector<8x256xf32>
    %90 = vector.broadcast %8 : vector<1x256xf32> to vector<8x256xf32>
    %91 = arith.mulf %89, %90 : vector<8x256xf32>
    %c8_93 = arith.constant 8 : index
    %c0_94 = arith.constant 0 : index
    %92 = vector.load %arg14[%c8_93, %c0_94] : memref<72x256xf32, #tpu.memory_space<vmem>>, vector<8x256xf32>
    tpu.vector_store %arg14[%c8_93, %c0_94], %91 {strides = array<i32>} : memref<72x256xf32, #tpu.memory_space<vmem>>, vector<8x256xf32>,
    %c0_95 = arith.constant 0 : index
    %c144_96 = arith.constant 144 : index
    %93 = vector.load %arg12[%c0_95, %c144_96] : memref<8x512xf32, #tpu.memory_space<vmem>>, vector<8x256xf32>
    %c16_97 = arith.constant 16 : index
    %c0_98 = arith.constant 0 : index
    %94 = vector.load %arg14[%c16_97, %c0_98] : memref<72x256xf32, #tpu.memory_space<vmem>>, vector<8x256xf32>
    tpu.vector_store %arg14[%c16_97, %c0_98], %93 {strides = array<i32>} : memref<72x256xf32, #tpu.memory_space<vmem>>, vector<8x256xf32>,
    %c0_99 = arith.constant 0 : index
    %c145_100 = arith.constant 145 : index
    %95 = vector.load %arg12[%c0_99, %c145_100] : memref<8x512xf32, #tpu.memory_space<vmem>>, vector<8x256xf32>
    %96 = vector.broadcast %8 : vector<1x256xf32> to vector<8x256xf32>
    %97 = arith.mulf %95, %96 : vector<8x256xf32>
    %c24_101 = arith.constant 24 : index
    %c0_102 = arith.constant 0 : index
    %98 = vector.load %arg14[%c24_101, %c0_102] : memref<72x256xf32, #tpu.memory_space<vmem>>, vector<8x256xf32>
    tpu.vector_store %arg14[%c24_101, %c0_102], %97 {strides = array<i32>} : memref<72x256xf32, #tpu.memory_space<vmem>>, vector<8x256xf32>,
    %c0_103 = arith.constant 0 : index
    %c0_104 = arith.constant 0 : index
    %99 = vector.load %arg8[%c0_103, %c0_104] : memref<16x32xf32, #tpu.memory_space<vmem>>, vector<16x32xf32>
    %c0_105 = arith.constant 0 : index
    %c0_106 = arith.constant 0 : index
    %100 = vector.load %arg14[%c0_105, %c0_106] : memref<72x256xf32, #tpu.memory_space<vmem>>, vector<32x256xf32>
    %cst_107 = arith.constant dense<0.000000e+00> : vector<16x256xf32>
    %101 = tpu.matmul %99, %100, %cst_107 {dimension_numbers = #tpu.dot_dimension_numbers<[1], [0], [0], [1], [0, 0, 1, 1], [], []>} : vector<16x32xf32>, vector<32x256xf32>, vector<16x256xf32> -> vector<16x256xf32>
    %c0_108 = arith.constant 0 : index
    %c0_109 = arith.constant 0 : index
    %102 = vector.load %arg9[%c0_108, %c0_109] : memref<16x1xf32, #tpu.memory_space<vmem>>, vector<16x1xf32>
    %103 = vector.broadcast %102 : vector<16x1xf32> to vector<16x256xf32>
    %104 = arith.addf %101, %103 : vector<16x256xf32>
    %cst_110 = arith.constant 0.000000e+00 : f32
    %105 = vector.broadcast %cst_110 : f32 to vector<16x256xf32>
    %106 = arith.maximumf %104, %105 : vector<16x256xf32>
    %c0_111 = arith.constant 0 : index
    %c0_112 = arith.constant 0 : index
    %107 = vector.load %arg15[%c0_111, %c0_112] : memref<16x256xf32, #tpu.memory_space<vmem>>, vector<16x256xf32>
    tpu.vector_store %arg15[%c0_111, %c0_112], %106 {strides = array<i32>} : memref<16x256xf32, #tpu.memory_space<vmem>>, vector<16x256xf32>,
    %c0_113 = arith.constant 0 : index
    %c0_114 = arith.constant 0 : index
    %108 = vector.load %arg15[%c0_113, %c0_114] : memref<16x256xf32, #tpu.memory_space<vmem>>, vector<16x16xf32>
    %c0_115 = arith.constant 0 : index
    %c0_116 = arith.constant 0 : index
    %c0_117 = arith.constant 0 : index
    %109 = vector.load %arg16[%c0_115, %c0_116, %c0_117] : memref<16x16x16xf32, #tpu.memory_space<vmem>>, vector<16x1x16xf32>
    %110 = vector.shape_cast %109 : vector<16x1x16xf32> to vector<16x16xf32>
    %111 = vector.shape_cast %108 : vector<16x16xf32> to vector<16x1x16xf32>
    tpu.vector_store %arg16[%c0_115, %c0_116, %c0_117], %111 {strides = array<i32>} : memref<16x16x16xf32, #tpu.memory_space<vmem>>, vector<16x1x16xf32>,
    %c0_118 = arith.constant 0 : index
    %c16_119 = arith.constant 16 : index
    %112 = vector.load %arg15[%c0_118, %c16_119] : memref<16x256xf32, #tpu.memory_space<vmem>>, vector<16x16xf32>
    %c0_120 = arith.constant 0 : index
    %c1_121 = arith.constant 1 : index
    %c0_122 = arith.constant 0 : index
    %113 = vector.load %arg16[%c0_120, %c1_121, %c0_122] : memref<16x16x16xf32, #tpu.memory_space<vmem>>, vector<16x1x16xf32>
    %114 = vector.shape_cast %113 : vector<16x1x16xf32> to vector<16x16xf32>
    %115 = vector.shape_cast %112 : vector<16x16xf32> to vector<16x1x16xf32>
    tpu.vector_store %arg16[%c0_120, %c1_121, %c0_122], %115 {strides = array<i32>} : memref<16x16x16xf32, #tpu.memory_space<vmem>>, vector<16x1x16xf32>,
    %c0_123 = arith.constant 0 : index
    %c32_124 = arith.constant 32 : index
    %116 = vector.load %arg15[%c0_123, %c32_124] : memref<16x256xf32, #tpu.memory_space<vmem>>, vector<16x16xf32>
    %c0_125 = arith.constant 0 : index
    %c2 = arith.constant 2 : index
    %c0_126 = arith.constant 0 : index
    %117 = vector.load %arg16[%c0_125, %c2, %c0_126] : memref<16x16x16xf32, #tpu.memory_space<vmem>>, vector<16x1x16xf32>
    %118 = vector.shape_cast %117 : vector<16x1x16xf32> to vector<16x16xf32>
    %119 = vector.shape_cast %116 : vector<16x16xf32> to vector<16x1x16xf32>
    tpu.vector_store %arg16[%c0_125, %c2, %c0_126], %119 {strides = array<i32>} : memref<16x16x16xf32, #tpu.memory_space<vmem>>, vector<16x1x16xf32>,
    %c0_127 = arith.constant 0 : index
    %c48_128 = arith.constant 48 : index
    %120 = vector.load %arg15[%c0_127, %c48_128] : memref<16x256xf32, #tpu.memory_space<vmem>>, vector<16x16xf32>
    %c0_129 = arith.constant 0 : index
    %c3 = arith.constant 3 : index
    %c0_130 = arith.constant 0 : index
    %121 = vector.load %arg16[%c0_129, %c3, %c0_130] : memref<16x16x16xf32, #tpu.memory_space<vmem>>, vector<16x1x16xf32>
    %122 = vector.shape_cast %121 : vector<16x1x16xf32> to vector<16x16xf32>
    %123 = vector.shape_cast %120 : vector<16x16xf32> to vector<16x1x16xf32>
    tpu.vector_store %arg16[%c0_129, %c3, %c0_130], %123 {strides = array<i32>} : memref<16x16x16xf32, #tpu.memory_space<vmem>>, vector<16x1x16xf32>,
    %c0_131 = arith.constant 0 : index
    %c64_132 = arith.constant 64 : index
    %124 = vector.load %arg15[%c0_131, %c64_132] : memref<16x256xf32, #tpu.memory_space<vmem>>, vector<16x16xf32>
    %c0_133 = arith.constant 0 : index
    %c4 = arith.constant 4 : index
    %c0_134 = arith.constant 0 : index
    %125 = vector.load %arg16[%c0_133, %c4, %c0_134] : memref<16x16x16xf32, #tpu.memory_space<vmem>>, vector<16x1x16xf32>
    %126 = vector.shape_cast %125 : vector<16x1x16xf32> to vector<16x16xf32>
    %127 = vector.shape_cast %124 : vector<16x16xf32> to vector<16x1x16xf32>
    tpu.vector_store %arg16[%c0_133, %c4, %c0_134], %127 {strides = array<i32>} : memref<16x16x16xf32, #tpu.memory_space<vmem>>, vector<16x1x16xf32>,
    %c0_135 = arith.constant 0 : index
    %c80 = arith.constant 80 : index
    %128 = vector.load %arg15[%c0_135, %c80] : memref<16x256xf32, #tpu.memory_space<vmem>>, vector<16x16xf32>
    %c0_136 = arith.constant 0 : index
    %c5 = arith.constant 5 : index
    %c0_137 = arith.constant 0 : index
    %129 = vector.load %arg16[%c0_136, %c5, %c0_137] : memref<16x16x16xf32, #tpu.memory_space<vmem>>, vector<16x1x16xf32>
    %130 = vector.shape_cast %129 : vector<16x1x16xf32> to vector<16x16xf32>
    %131 = vector.shape_cast %128 : vector<16x16xf32> to vector<16x1x16xf32>
    tpu.vector_store %arg16[%c0_136, %c5, %c0_137], %131 {strides = array<i32>} : memref<16x16x16xf32, #tpu.memory_space<vmem>>, vector<16x1x16xf32>,
    %c0_138 = arith.constant 0 : index
    %c96 = arith.constant 96 : index
    %132 = vector.load %arg15[%c0_138, %c96] : memref<16x256xf32, #tpu.memory_space<vmem>>, vector<16x16xf32>
    %c0_139 = arith.constant 0 : index
    %c6 = arith.constant 6 : index
    %c0_140 = arith.constant 0 : index
    %133 = vector.load %arg16[%c0_139, %c6, %c0_140] : memref<16x16x16xf32, #tpu.memory_space<vmem>>, vector<16x1x16xf32>
    %134 = vector.shape_cast %133 : vector<16x1x16xf32> to vector<16x16xf32>
    %135 = vector.shape_cast %132 : vector<16x16xf32> to vector<16x1x16xf32>
    tpu.vector_store %arg16[%c0_139, %c6, %c0_140], %135 {strides = array<i32>} : memref<16x16x16xf32, #tpu.memory_space<vmem>>, vector<16x1x16xf32>,
    %c0_141 = arith.constant 0 : index
    %c112_142 = arith.constant 112 : index
    %136 = vector.load %arg15[%c0_141, %c112_142] : memref<16x256xf32, #tpu.memory_space<vmem>>, vector<16x16xf32>
    %c0_143 = arith.constant 0 : index
    %c7 = arith.constant 7 : index
    %c0_144 = arith.constant 0 : index
    %137 = vector.load %arg16[%c0_143, %c7, %c0_144] : memref<16x16x16xf32, #tpu.memory_space<vmem>>, vector<16x1x16xf32>
    %138 = vector.shape_cast %137 : vector<16x1x16xf32> to vector<16x16xf32>
    %139 = vector.shape_cast %136 : vector<16x16xf32> to vector<16x1x16xf32>
    tpu.vector_store %arg16[%c0_143, %c7, %c0_144], %139 {strides = array<i32>} : memref<16x16x16xf32, #tpu.memory_space<vmem>>, vector<16x1x16xf32>,
    %c0_145 = arith.constant 0 : index
    %c128_146 = arith.constant 128 : index
    %140 = vector.load %arg15[%c0_145, %c128_146] : memref<16x256xf32, #tpu.memory_space<vmem>>, vector<16x16xf32>
    %c0_147 = arith.constant 0 : index
    %c8_148 = arith.constant 8 : index
    %c0_149 = arith.constant 0 : index
    %141 = vector.load %arg16[%c0_147, %c8_148, %c0_149] : memref<16x16x16xf32, #tpu.memory_space<vmem>>, vector<16x1x16xf32>
    %142 = vector.shape_cast %141 : vector<16x1x16xf32> to vector<16x16xf32>
    %143 = vector.shape_cast %140 : vector<16x16xf32> to vector<16x1x16xf32>
    tpu.vector_store %arg16[%c0_147, %c8_148, %c0_149], %143 {strides = array<i32>} : memref<16x16x16xf32, #tpu.memory_space<vmem>>, vector<16x1x16xf32>,
    %c0_150 = arith.constant 0 : index
    %c144_151 = arith.constant 144 : index
    %144 = vector.load %arg15[%c0_150, %c144_151] : memref<16x256xf32, #tpu.memory_space<vmem>>, vector<16x16xf32>
    %c0_152 = arith.constant 0 : index
    %c9 = arith.constant 9 : index
    %c0_153 = arith.constant 0 : index
    %145 = vector.load %arg16[%c0_152, %c9, %c0_153] : memref<16x16x16xf32, #tpu.memory_space<vmem>>, vector<16x1x16xf32>
    %146 = vector.shape_cast %145 : vector<16x1x16xf32> to vector<16x16xf32>
    %147 = vector.shape_cast %144 : vector<16x16xf32> to vector<16x1x16xf32>
    tpu.vector_store %arg16[%c0_152, %c9, %c0_153], %147 {strides = array<i32>} : memref<16x16x16xf32, #tpu.memory_space<vmem>>, vector<16x1x16xf32>,
    %c0_154 = arith.constant 0 : index
    %c160 = arith.constant 160 : index
    %148 = vector.load %arg15[%c0_154, %c160] : memref<16x256xf32, #tpu.memory_space<vmem>>, vector<16x16xf32>
    %c0_155 = arith.constant 0 : index
    %c10 = arith.constant 10 : index
    %c0_156 = arith.constant 0 : index
    %149 = vector.load %arg16[%c0_155, %c10, %c0_156] : memref<16x16x16xf32, #tpu.memory_space<vmem>>, vector<16x1x16xf32>
    %150 = vector.shape_cast %149 : vector<16x1x16xf32> to vector<16x16xf32>
    %151 = vector.shape_cast %148 : vector<16x16xf32> to vector<16x1x16xf32>
    tpu.vector_store %arg16[%c0_155, %c10, %c0_156], %151 {strides = array<i32>} : memref<16x16x16xf32, #tpu.memory_space<vmem>>, vector<16x1x16xf32>,
    %c0_157 = arith.constant 0 : index
    %c176 = arith.constant 176 : index
    %152 = vector.load %arg15[%c0_157, %c176] : memref<16x256xf32, #tpu.memory_space<vmem>>, vector<16x16xf32>
    %c0_158 = arith.constant 0 : index
    %c11 = arith.constant 11 : index
    %c0_159 = arith.constant 0 : index
    %153 = vector.load %arg16[%c0_158, %c11, %c0_159] : memref<16x16x16xf32, #tpu.memory_space<vmem>>, vector<16x1x16xf32>
    %154 = vector.shape_cast %153 : vector<16x1x16xf32> to vector<16x16xf32>
    %155 = vector.shape_cast %152 : vector<16x16xf32> to vector<16x1x16xf32>
    tpu.vector_store %arg16[%c0_158, %c11, %c0_159], %155 {strides = array<i32>} : memref<16x16x16xf32, #tpu.memory_space<vmem>>, vector<16x1x16xf32>,
    %c0_160 = arith.constant 0 : index
    %c192 = arith.constant 192 : index
    %156 = vector.load %arg15[%c0_160, %c192] : memref<16x256xf32, #tpu.memory_space<vmem>>, vector<16x16xf32>
    %c0_161 = arith.constant 0 : index
    %c12 = arith.constant 12 : index
    %c0_162 = arith.constant 0 : index
    %157 = vector.load %arg16[%c0_161, %c12, %c0_162] : memref<16x16x16xf32, #tpu.memory_space<vmem>>, vector<16x1x16xf32>
    %158 = vector.shape_cast %157 : vector<16x1x16xf32> to vector<16x16xf32>
    %159 = vector.shape_cast %156 : vector<16x16xf32> to vector<16x1x16xf32>
    tpu.vector_store %arg16[%c0_161, %c12, %c0_162], %159 {strides = array<i32>} : memref<16x16x16xf32, #tpu.memory_space<vmem>>, vector<16x1x16xf32>,
    %c0_163 = arith.constant 0 : index
    %c208 = arith.constant 208 : index
    %160 = vector.load %arg15[%c0_163, %c208] : memref<16x256xf32, #tpu.memory_space<vmem>>, vector<16x16xf32>
    %c0_164 = arith.constant 0 : index
    %c13 = arith.constant 13 : index
    %c0_165 = arith.constant 0 : index
    %161 = vector.load %arg16[%c0_164, %c13, %c0_165] : memref<16x16x16xf32, #tpu.memory_space<vmem>>, vector<16x1x16xf32>
    %162 = vector.shape_cast %161 : vector<16x1x16xf32> to vector<16x16xf32>
    %163 = vector.shape_cast %160 : vector<16x16xf32> to vector<16x1x16xf32>
    tpu.vector_store %arg16[%c0_164, %c13, %c0_165], %163 {strides = array<i32>} : memref<16x16x16xf32, #tpu.memory_space<vmem>>, vector<16x1x16xf32>,
    %c0_166 = arith.constant 0 : index
    %c224 = arith.constant 224 : index
    %164 = vector.load %arg15[%c0_166, %c224] : memref<16x256xf32, #tpu.memory_space<vmem>>, vector<16x16xf32>
    %c0_167 = arith.constant 0 : index
    %c14 = arith.constant 14 : index
    %c0_168 = arith.constant 0 : index
    %165 = vector.load %arg16[%c0_167, %c14, %c0_168] : memref<16x16x16xf32, #tpu.memory_space<vmem>>, vector<16x1x16xf32>
    %166 = vector.shape_cast %165 : vector<16x1x16xf32> to vector<16x16xf32>
    %167 = vector.shape_cast %164 : vector<16x16xf32> to vector<16x1x16xf32>
    tpu.vector_store %arg16[%c0_167, %c14, %c0_168], %167 {strides = array<i32>} : memref<16x16x16xf32, #tpu.memory_space<vmem>>, vector<16x1x16xf32>,
    %c0_169 = arith.constant 0 : index
    %c240 = arith.constant 240 : index
    %168 = vector.load %arg15[%c0_169, %c240] : memref<16x256xf32, #tpu.memory_space<vmem>>, vector<16x16xf32>
    %c0_170 = arith.constant 0 : index
    %c15 = arith.constant 15 : index
    %c0_171 = arith.constant 0 : index
    %169 = vector.load %arg16[%c0_170, %c15, %c0_171] : memref<16x16x16xf32, #tpu.memory_space<vmem>>, vector<16x1x16xf32>
    %170 = vector.shape_cast %169 : vector<16x1x16xf32> to vector<16x16xf32>
    %171 = vector.shape_cast %168 : vector<16x16xf32> to vector<16x1x16xf32>
    tpu.vector_store %arg16[%c0_170, %c15, %c0_171], %171 {strides = array<i32>} : memref<16x16x16xf32, #tpu.memory_space<vmem>>, vector<16x1x16xf32>,
    %c0_172 = arith.constant 0 : index
    %c0_173 = arith.constant 0 : index
    %172 = vector.load %arg10[%c0_172, %c0_173] : memref<32x32xf32, #tpu.memory_space<vmem>>, vector<16x32xf32>
    %c16_174 = arith.constant 16 : index
    %c0_175 = arith.constant 0 : index
    %173 = vector.load %arg10[%c16_174, %c0_175] : memref<32x32xf32, #tpu.memory_space<vmem>>, vector<16x32xf32>
    %c0_176 = arith.constant 0 : index
    %c0_177 = arith.constant 0 : index
    %c0_178 = arith.constant 0 : index
    %174 = vector.load %arg16[%c0_176, %c0_177, %c0_178] : memref<16x16x16xf32, #tpu.memory_space<vmem>>, vector<4x16x16xf32>
    %175 = vector.shape_cast %174 : vector<4x16x16xf32> to vector<64x16xf32>
    %cst_179 = arith.constant dense<0.000000e+00> : vector<64x32xf32>
    %176 = tpu.matmul %175, %172, %cst_179 {dimension_numbers = #tpu.dot_dimension_numbers<[1], [0], [0], [1], [0, 0, 1, 1], [], []>} : vector<64x16xf32>, vector<16x32xf32>, vector<64x32xf32> -> vector<64x32xf32>
    %c4_180 = arith.constant 4 : index
    %c0_181 = arith.constant 0 : index
    %c0_182 = arith.constant 0 : index
    %177 = vector.load %arg16[%c4_180, %c0_181, %c0_182] : memref<16x16x16xf32, #tpu.memory_space<vmem>>, vector<4x16x16xf32>
    %178 = vector.shape_cast %177 : vector<4x16x16xf32> to vector<64x16xf32>
    %cst_183 = arith.constant dense<0.000000e+00> : vector<64x32xf32>
    %179 = tpu.matmul %178, %173, %cst_183 {dimension_numbers = #tpu.dot_dimension_numbers<[1], [0], [0], [1], [0, 0, 1, 1], [], []>} : vector<64x16xf32>, vector<16x32xf32>, vector<64x32xf32> -> vector<64x32xf32>
    %180 = arith.addf %176, %179 : vector<64x32xf32>
    %c8_184 = arith.constant 8 : index
    %c0_185 = arith.constant 0 : index
    %c0_186 = arith.constant 0 : index
    %181 = vector.load %arg16[%c8_184, %c0_185, %c0_186] : memref<16x16x16xf32, #tpu.memory_space<vmem>>, vector<4x16x16xf32>
    %182 = vector.shape_cast %181 : vector<4x16x16xf32> to vector<64x16xf32>
    %cst_187 = arith.constant dense<0.000000e+00> : vector<64x32xf32>
    %183 = tpu.matmul %182, %172, %cst_187 {dimension_numbers = #tpu.dot_dimension_numbers<[1], [0], [0], [1], [0, 0, 1, 1], [], []>} : vector<64x16xf32>, vector<16x32xf32>, vector<64x32xf32> -> vector<64x32xf32>
    %c12_188 = arith.constant 12 : index
    %c0_189 = arith.constant 0 : index
    %c0_190 = arith.constant 0 : index
    %184 = vector.load %arg16[%c12_188, %c0_189, %c0_190] : memref<16x16x16xf32, #tpu.memory_space<vmem>>, vector<4x16x16xf32>
    %185 = vector.shape_cast %184 : vector<4x16x16xf32> to vector<64x16xf32>
    %cst_191 = arith.constant dense<0.000000e+00> : vector<64x32xf32>
    %186 = tpu.matmul %185, %173, %cst_191 {dimension_numbers = #tpu.dot_dimension_numbers<[1], [0], [0], [1], [0, 0, 1, 1], [], []>} : vector<64x16xf32>, vector<16x32xf32>, vector<64x32xf32> -> vector<64x32xf32>
    %187 = arith.addf %183, %186 : vector<64x32xf32>
    %c0_192 = arith.constant 0 : index
    %c0_193 = arith.constant 0 : index
    %c0_194 = arith.constant 0 : index
    %188 = vector.load %arg11[%c0_192, %c0_193, %c0_194] : memref<1x128x64xf32, #tpu.memory_space<vmem>>, vector<1x64x32xf32>
    %189 = vector.shape_cast %188 : vector<1x64x32xf32> to vector<64x32xf32>
    %190 = vector.shape_cast %180 : vector<64x32xf32> to vector<1x64x32xf32>
    tpu.vector_store %arg11[%c0_192, %c0_193, %c0_194], %190 {strides = array<i32>} : memref<1x128x64xf32, #tpu.memory_space<vmem>>, vector<1x64x32xf32>,
    %c0_195 = arith.constant 0 : index
    %c0_196 = arith.constant 0 : index
    %c32_197 = arith.constant 32 : index
    %191 = vector.load %arg11[%c0_195, %c0_196, %c32_197] : memref<1x128x64xf32, #tpu.memory_space<vmem>>, vector<1x64x32xf32>
    %192 = vector.shape_cast %191 : vector<1x64x32xf32> to vector<64x32xf32>
    %193 = vector.shape_cast %187 : vector<64x32xf32> to vector<1x64x32xf32>
    tpu.vector_store %arg11[%c0_195, %c0_196, %c32_197], %193 {strides = array<i32>} : memref<1x128x64xf32, #tpu.memory_space<vmem>>, vector<1x64x32xf32>,
    %c0_198 = arith.constant 0 : index
    %c0_199 = arith.constant 0 : index
    %c0_200 = arith.constant 0 : index
    %194 = vector.load %arg2[%c0_198, %c0_199, %c0_200] : memref<1x64x64xf32, #tpu.memory_space<vmem>>, vector<1x64x64xf32>
    %195 = vector.shape_cast %194 : vector<1x64x64xf32> to vector<64x64xf32>
    %c0_201 = arith.constant 0 : index
    %c64_202 = arith.constant 64 : index
    %c0_203 = arith.constant 0 : index
    %196 = vector.load %arg11[%c0_201, %c64_202, %c0_203] : memref<1x128x64xf32, #tpu.memory_space<vmem>>, vector<1x64x64xf32>
    %197 = vector.shape_cast %196 : vector<1x64x64xf32> to vector<64x64xf32>
    %198 = vector.shape_cast %195 : vector<64x64xf32> to vector<1x64x64xf32>
    tpu.vector_store %arg11[%c0_201, %c64_202, %c0_203], %198 {strides = array<i32>} : memref<1x128x64xf32, #tpu.memory_space<vmem>>, vector<1x64x64xf32>,
    return
  }
  func.func @transform_0(%arg0: i32) -> (i32, i32, i32) {
    %c0_i32 = arith.constant 0 : i32
    %c0_i32_0 = arith.constant 0 : i32
    %c0_i32_1 = arith.constant 0 : i32
    return %arg0, %c0_i32, %c0_i32_0 : i32, i32, i32
  }
  func.func @transform_1(%arg0: i32) -> (i32, i32, i32) {
    %c0_i32 = arith.constant 0 : i32
    %c0_i32_0 = arith.constant 0 : i32
    %c0_i32_1 = arith.constant 0 : i32
    return %arg0, %c0_i32, %c0_i32_0 : i32, i32, i32
  }
  func.func @transform_2(%arg0: i32) -> (i32, i32) {
    %c0_i32 = arith.constant 0 : i32
    %c0_i32_0 = arith.constant 0 : i32
    %c0_i32_1 = arith.constant 0 : i32
    return %c0_i32, %c0_i32_0 : i32, i32
  }
  func.func @transform_3(%arg0: i32) -> (i32, i32) {
    %c0_i32 = arith.constant 0 : i32
    %c0_i32_0 = arith.constant 0 : i32
    %c0_i32_1 = arith.constant 0 : i32
    return %c0_i32, %c0_i32_0 : i32, i32
  }
  func.func @transform_4(%arg0: i32) -> (i32, i32) {
    %c0_i32 = arith.constant 0 : i32
    %c0_i32_0 = arith.constant 0 : i32
    %c0_i32_1 = arith.constant 0 : i32
    return %c0_i32, %c0_i32_0 : i32, i32
  }
  func.func @transform_5(%arg0: i32) -> (i32, i32) {
    %c0_i32 = arith.constant 0 : i32
    %c0_i32_0 = arith.constant 0 : i32
    %c0_i32_1 = arith.constant 0 : i32
    return %c0_i32, %c0_i32_0 : i32, i32
  }
  func.func @transform_6(%arg0: i32) -> (i32, i32) {
    %c0_i32 = arith.constant 0 : i32
    %c0_i32_0 = arith.constant 0 : i32
    %c0_i32_1 = arith.constant 0 : i32
    return %c0_i32, %c0_i32_0 : i32, i32
  }
  func.func @transform_7(%arg0: i32) -> (i32, i32) {
    %c0_i32 = arith.constant 0 : i32
    %c0_i32_0 = arith.constant 0 : i32
    %c0_i32_1 = arith.constant 0 : i32
    return %c0_i32, %c0_i32_0 : i32, i32
  }
  func.func @transform_8(%arg0: i32) -> (i32, i32) {
    %c0_i32 = arith.constant 0 : i32
    %c0_i32_0 = arith.constant 0 : i32
    %c0_i32_1 = arith.constant 0 : i32
    return %c0_i32, %c0_i32_0 : i32, i32
  }
  func.func @transform_9(%arg0: i32) -> (i32, i32) {
    %c0_i32 = arith.constant 0 : i32
    %c0_i32_0 = arith.constant 0 : i32
    %c0_i32_1 = arith.constant 0 : i32
    return %c0_i32, %c0_i32_0 : i32, i32
  }
  func.func @transform_10(%arg0: i32) -> (i32, i32, i32) {
    %c0_i32 = arith.constant 0 : i32
    %c0_i32_0 = arith.constant 0 : i32
    %c0_i32_1 = arith.constant 0 : i32
    return %arg0, %c0_i32, %c0_i32_0 : i32, i32, i32
  }
}

</mosaic_0001>

<bundles_post_ra>
// kernel: upsample_layer_forward.1
= control target key start
LH: loop header
LB: loop body
LE: loop exit
PB: predicated region body
PF: predicated region fallthrough
CT: control target
= control target key end

     0   :  { %s5789_s13 = smov 0   ;;  %s6981_s0 = inlined_call_operand.vmem [shape: f32[2,4,256], index: 0, kind: input, shape index: {}]   ;;  %s6982_s1 = inlined_call_operand.vmem [shape: f32[2,64,64], index: 1, kind: input, shape index: {}]   ;;  %s6983_s2 = inlined_call_operand.vmem [shape: f32[2,256], index: 2, kind: input, shape index: {}]   ;;  %s6984_s3 = inlined_call_operand.vmem [shape: f32[8,72], index: 3, kind: input, shape index: {}]   ;;  %s6985_s4 = inlined_call_operand.vmem [shape: f32[8,1], index: 4, kind: input, shape index: {}]   ;;  %s6986_s5 = inlined_call_operand.vmem [shape: f32[8,72], index: 5, kind: input, shape index: {}]   ;;  %s6987_s6 = inlined_call_operand.vmem [shape: f32[8,1], index: 6, kind: input, shape index: {}]   ;;  %s6988_s7 = inlined_call_operand.vmem [shape: f32[16,32], index: 7, kind: input, shape index: {}]   ;;  %s6989_s8 = inlined_call_operand.vmem [shape: f32[16,1], index: 8, kind: input, shape index: {}]   ;;  %s6990_s9 = inlined_call_operand.vmem [shape: f32[32,32], index: 9, kind: input, shape index: {}]   ;;  %s6991_s10 = inlined_call_operand.vmem [shape: f32[2,128,64], index: 10, kind: output, shape index: {}]  }
   0x1 LB: > { %s5365_s14 = sadd.s32 4294967295, %s5716_s13   ;;  %p5369_p0 = scmp.ge.s32.totalorder %s5716_s13, 1  ;;  %s5716_s13 = sphi %s5789_s13, %s20_s13  }
   0x2   : > { %p322_p1 = scmp.lt.s32.totalorder %s5716_s13, 3 }
   0x4   : > { %p323_p2 = pnand %p5369_p0, %p322_p1 }
   0x5   : > { %v401_v0 = vlaneseq (!%p323_p2)  ;;  %v5718_v1 = vmov (!%p323_p2), 0.0   ;;  %v5376_v2 = vld [vmem:[%s6983_s2 + $0x1] ss:$2 sm:$0x3] (!%p323_p2)  ;;  %p365_p3 = scmp.lt.s32.totalorder (!%p323_p2), %s5365_s14, 1  ;;  %s5719_s21 = smov (!%p323_p2), 113  }
   0x6   : > { %326 = sbr.rel (%p323_p2) target bundleno = 2059 (0x80b), region = 60  ;;  %381 = vst [vmem:[#allocation2 + $0x8] sm:$0xff] (!%p323_p2), %v5718_v1  ;;  %382 = vst [vmem:[#allocation2 + $0x10] sm:$0xff] (!%p323_p2), %v5718_v1  ;;  %730 = vmatprep.mubr.f32.mxu0 (!%p323_p2), %v5718_v1  ;;  %999 = vmatprep.mubr.f32.mxu1 (!%p323_p2), %v5718_v1  ;;  %v394_v4 = vld [vmem:[%s6983_s2] ss:$2 sm:$0x3] (!%p323_p2) }
   0x7   : > { %v5804_v3 = vshrl.u32 (!%p323_p2), %v401_v0, 7  ;;  %s5720_s22 = smov (!%p323_p2), 111   ;;  %vm5289_vm0 = vcmask (!%p323_p2), 523264   ;;  %s5722_s15 = smov (!%p323_p2), 1   ;;  %v5724_v23 = vmov (!%p323_p2), 0   ;;  %vm413_vm1 = vcmask (!%p323_p2), 908288  }
   0x8   : > { %s5723_s16 = smov (!%p323_p2), 15   ;;  %5657 = vset.pattern.permute.xlu1 (!%p323_p2), %v5724_v23  ;;  %5693 = vset.pattern.permute.xlu0 (!%p323_p2), %v5724_v23  ;;  %s5725_s17 = smov (!%p323_p2), 17   ;;  %vm472_vm2 = vcmask (!%p323_p2), 924672   ;;  %vm503_vm3 = vcmask (!%p323_p2), 1039360   ;;  %vm520_vm4 = vcmask (!%p323_p2), 7168   ;;  %vm489_vm5 = vcmask (!%p323_p2), 121856  }
   0x9   : > { %v5810_v5 = vsub.s32 (!%p323_p2), 0, %v5804_v3  ;;  %v407_v6 = vsub.s32 (!%p323_p2), 1, %v5804_v3  ;;  %s5726_s18 = smov (!%p323_p2), 16   ;;  %vm430_vm6 = vcmask (!%p323_p2), 138240   ;;  %vm449_vm7 = vcmask (!%p323_p2), 130048   ;;  %s5730_s23 = smov (!%p323_p2), 32  }
   0xa   : > { %vm601_vm8 = vcmask (!%p323_p2), 916480   ;;  %vm662_vm9 = vcmask (!%p323_p2), 588800   ;;  %vm1096_vm10 = vcmask (!%p323_p2), 261120   ;;  %vm1306_vm11 = vcmask (!%p323_p2), 122880   ;;  %s5731_s24 = smov (!%p323_p2), 96   ;;  %s5733_s26 = smov (!%p323_p2), 80  }
   0xb   : > { %v463_v7 = vrot.slane (!%p323_p2), %v5376_v2, %v5810_v5  ;;  %v404_v8 = vrot.slane (!%p323_p2), %v394_v4, %v5810_v5  ;;  %v467_v9 = vrot.slane (!%p323_p2), %v5376_v2, %v407_v6  ;;  %v408_v10 = vrot.slane (!%p323_p2), %v394_v4, %v407_v6  ;;  %v656_v4 = vld [vmem:[%s6985_s4] sm:$0xff] (!%p323_p2) }
   0xc   : > { %vm5272_vm12 = vcmask (!%p323_p2), 523520  }
   0xd   : > { %s6993_s14 = smov (!%p365_p3, %s5365_s14), 1  ;;  %468 = vrot.lane.b32.xlu1 %v463_v7, %s5719_s21  ;;  %409 = vrot.lane.b32.xlu0 %v404_v8, %s5720_s22 }
   0xe   : > { %s5415_s19 = sshll.u32 %s6993_s14, 3  ;;  %s5416_s20 = sshll.u32 %s6993_s14, 6 }
   0xf   : > { %s369_s25 = scalar_lea.vmem %s6981_s0, %s5415_s19  ;;  %s374_s28 = scalar_lea.vmem %s6982_s1, %s5416_s20 }
  0x10   : > { %s5417_s29 = sshll.u32 %s6993_s14, 7  ;;  %v388_v11 = vld [vmem:[%s369_s25] sm:$0xff]  ;;  %v5282_v13 = vld [vmem:[%s374_s28 + $0x8] sm:$0xff]  ;;  %v5283_v15 = vld [vmem:[%s374_s28 + $0x10] sm:$0xff]  ;;  %s5721_s14 = smov 127  }
  0x11   : > { %v5281_v12 = vld [vmem:[%s374_s28] sm:$0xff]  ;;  %s5826_s12 = scalar_lea.vmem %s6991_s10, %s5417_s29  ;;  %v390_v14 = vcombine.high %v388_v11, %v388_v11  ;;  %392 = vst [vmem:[#allocation2 + $0x8] sm:$0xf] %v388_v11  ;;  %v5284_v16 = vld [vmem:[%s374_s28 + $0x18] sm:$0xff]  ;;  %v5286_v18 = vld [vmem:[%s374_s28 + $0x28] sm:$0xff]  ;;  %470 = vrot.lane.b32.xlu1 %v467_v9, %s5719_s21  ;;  %s5727_s19 = smov 112  }
  0x12   : > { %v5285_v17 = vld [vmem:[%s374_s28 + $0x20] sm:$0xff]  ;;  %v5287_v19 = vld [vmem:[%s374_s28 + $0x30] sm:$0xff]  ;;  %v5288_v20 = vld [vmem:[%s374_s28 + $0x38] sm:$0xff]  ;;  %5290 = vst.msk [vmem:[%s5826_s12 + $0x40] sm:$0xff] %vm5289_vm0, %v5281_v12  ;;  %s5729_s20 = smov 64   ;;  %s5732_s25 = smov 48  }
  0x13   : > { %5291 = vst.msk [vmem:[%s5826_s12 + $0x48] sm:$0xff] %vm5289_vm0, %v5282_v13  ;;  %5292 = vst.msk [vmem:[%s5826_s12 + $0x50] sm:$0xff] %vm5289_vm0, %v5283_v15  ;;  %411 = vrot.lane.b32.xlu0 %v408_v10, %s5720_s22 }
  0x14   : > { %5293 = vst.msk [vmem:[%s5826_s12 + $0x58] sm:$0xff] %vm5289_vm0, %v5284_v16  ;;  %5294 = vst.msk [vmem:[%s5826_s12 + $0x60] sm:$0xff] %vm5289_vm0, %v5285_v17 }
  0x15   : > { %393 = vst [vmem:[#allocation2 + $0x10] sm:$0xf] %v390_v14  ;;  %5295 = vst.msk [vmem:[%s5826_s12 + $0x68] sm:$0xff] %vm5289_vm0, %v5286_v18  ;;  %501 = vrot.lane.b32.xlu1 %v408_v10, %s5721_s14 }
  0x16   : > { %5296 = vst.msk [vmem:[%s5826_s12 + $0x70] sm:$0xff] %vm5289_vm0, %v5287_v19  ;;  %5297 = vst.msk [vmem:[%s5826_s12 + $0x78] sm:$0xff] %vm5289_vm0, %v5288_v20 }
  0x17   : > { %499 = vrot.lane.b32.xlu0 %v404_v8, %s5721_s14 }
  0x18   : > { %v5852_v21 = vld [vmem:[#allocation2 + $0x8] sm:$0xff] }
  0x19   : > { %536 = vrot.lane.b32.xlu1 %v467_v9, %s5722_s15 }
  0x1b   : > { %534 = vrot.lane.b32.xlu0 %v463_v7, %s5722_s15 }
  0x1c   : > { %v5854_v22 = vld [vmem:[#allocation2 + $0x10] sm:$0xff] }
  0x1d   : > { %565 = vrot.lane.b32.xlu1 %v408_v10, %s5723_s16  ;;  %v5622_v24 = vpack.i.bf16 %v5854_v22, %v5852_v21  ;;  %v5642_v56 = vpack.i.bf16 %v5718_v1, %v5854_v22 }
  0x1f   : > { %563 = vrot.lane.b32.xlu0 %v404_v8, %s5723_s16 }
  0x21   : > { %613 = vrot.lane.b32.xlu1 %v467_v9, %s5725_s17 }
  0x23   : > { %611 = vrot.lane.b32.xlu0 %v463_v7, %s5725_s17 }
  0x25   : > { %5623 = vrot.lane.b32.xlu1 %v5622_v24, %s5726_s18 }
  0x29   : > { %443 = vrot.lane.b32.xlu1 %v5718_v1, %s5726_s18 }
  0x7f   : > { %v469_v25 = vpop.permute.xlu1 %468  ;;  %v410_v26 = vpop.permute.xlu0 %409 }
  0x80   : > { %v5863_v27 = vmul.f32 0.0, %v410_v26  ;;  %v477_v28 = vmul.f32 0.0, %v469_v25 }
  0x82   : > { %424 = vrot.lane.b32.xlu0 %v5863_v27, %s5725_s17 }
  0x83   : > { %v5867_v29 = vpop.permute.xlu1 %470 }
  0x84   : > { %v5879_v33 = vsel %vm472_vm2, %v469_v25, %v5867_v29  ;;  %v479_v35 = vmul.f32 %v5867_v29, %v5854_v22 }
  0x85   : > { %v5869_v30 = vpop.permute.xlu0 %411  ;;  %v478_v42 = vmul.f32 %v5879_v33, %v5852_v21 }
  0x86   : > { %v5873_v31 = vsel %vm413_vm1, %v410_v26, %v5869_v30  ;;  %v420_v32 = vmul.f32 %v5854_v22, %v5869_v30  ;;  %483 = vrot.lane.b32.xlu0 %v477_v28, %s5723_s16 }
  0x87   : > { %v419_v34 = vmul.f32 %v5852_v21, %v5873_v31  ;;  %v5886_v36 = vpop.permute.xlu1 %501  ;;  %v5632_v47 = vpack.i.bf16 %v479_v35, %v478_v42 }
  0x88   : > { %v510_v39 = vmul.f32 %v5886_v36, %v5854_v22 }
  0x89   : > { %v500_v37 = vpop.permute.xlu0 %499  ;;  %v5627_v38 = vpack.i.bf16 %v420_v32, %v419_v34 }
  0x8a   : > { %v5892_v40 = vsel %vm503_vm3, %v500_v37, %v5886_v36  ;;  %v508_v41 = vmul.f32 0.0, %v500_v37 }
  0x8b   : > { %v509_v43 = vmul.f32 %v5892_v40, %v5852_v21  ;;  %5628 = vrot.lane.b32.xlu0 %v5627_v38, %s5725_s17  ;;  %v537_v44 = vpop.permute.xlu1 %536 }
  0x8c   : > { %514 = vrot.lane.b32.xlu1 %v508_v41, %s5722_s15  ;;  %v5916_v54 = vmul.f32 0.0, %v537_v44 }
  0x8d   : > { %v5900_v45 = vpop.permute.xlu0 %534  ;;  %v5637_v46 = vpack.i.bf16 %v510_v39, %v509_v43 }
  0x8e   : > { %v5904_v48 = vsel %vm520_vm4, %v5900_v45, %v537_v44  ;;  %v542_v51 = vmul.f32 %v5900_v45, %v5852_v21 }
  0x8f   : > { %5633 = vrot.lane.b32.xlu0 %v5632_v47, %s5723_s16  ;;  %v566_v49 = vpop.permute.xlu1 %565  ;;  %v543_v53 = vmul.f32 %v5904_v48, %v5854_v22 }
  0x90   : > { %5638 = vrot.lane.b32.xlu1 %v5637_v46, %s5722_s15  ;;  %v5926_v57 = vmul.f32 0.0, %v566_v49 }
  0x91   : > { %v5908_v50 = vpop.permute.xlu0 %563  ;;  %v5647_v58 = vpack.i.bf16 %v5916_v54, %v543_v53 }
  0x92   : > { %v571_v52 = vmul.f32 %v5908_v50, %v5852_v21  ;;  %v5920_v55 = vsel %vm489_vm5, %v5908_v50, %v566_v49 }
  0x93   : > { %v614_v59 = vpop.permute.xlu1 %613  ;;  %v572_v61 = vmul.f32 %v5920_v55, %v5854_v22 }
  0x94   : > { %548 = vrot.lane.b32.xlu1 %v542_v51, %s5721_s14  ;;  %577 = vrot.lane.b32.xlu0 %v571_v52, %s5719_s21  ;;  %v5943_v0 = vmul.f32 0.0, %v614_v59 }
  0x95   : > { %v5929_v60 = vpop.permute.xlu0 %611  ;;  %v5652_v63 = vpack.i.bf16 %v5926_v57, %v572_v61 }
  0x96   : > { %v5937_v62 = vsel %vm430_vm6, %v5929_v60, %v614_v59  ;;  %v619_v6 = vmul.f32 %v5929_v60, %v5852_v21 }
  0x97   : > { %v620_v2 = vmul.f32 %v5937_v62, %v5854_v22  ;;  %v5624_v7 = vpop.permute.xlu1 %5623 }
  0x98   : > { %5643 = vrot.lane.b32.xlu1 %v5642_v56, %s5727_s19  ;;  %5648 = vrot.lane.b32.xlu0 %v5647_v58, %s5721_s14  ;;  %v5626_v11 = vunpack.i.h.bf16 %v5624_v7  ;;  %v5625_v12 = vunpack.i.l.bf16 %v5624_v7 }
  0x9a   : > { %v451_v19 = vsel %vm449_vm7, %v5625_v12, %v5626_v11 }
  0x9b   : > { %v444_v9 = vpop.permute.xlu1 %443 }
  0x9c   : > { %595 = vrot.lane.b32.xlu1 %v5852_v21, %s5727_s19  ;;  %5653 = vrot.lane.b32.xlu0 %v5652_v63, %s5719_s21  ;;  %v450_v17 = vsel %vm449_vm7, %v444_v9, %v5625_v12 }
  0xa0   : > { %629 = vrot.lane.b32.xlu1 %v5943_v0, %s5720_s22  ;;  %627 = vrot.lane.b32.xlu0 %v620_v2, %s5720_s22 }
  0xa4   : > { %659 = vperm.xlu1 %5657, %v656_v4   ;;  %625 = vrot.lane.b32.xlu0 %v619_v6, %s5720_s22 }
  0xa8   : > { %768 = vrot.lane.b32.xlu1 %v5718_v1, %s5726_s18  ;;  %750 = vrot.lane.b32.xlu0 %v5863_v27, %s5725_s17 }
  0xac   : > { %810 = vrot.lane.b32.xlu1 %v508_v41, %s5722_s15  ;;  %789 = vrot.lane.b32.xlu0 %v477_v28, %s5723_s16 }
  0xf4   : > { %v425_v8 = vpop.permute.xlu0 %424 }
  0xf8   : > { %v484_v10 = vpop.permute.xlu0 %483 }
  0xfd   : > { %v5629_v14 = vpop.permute.xlu0 %5628 }
  0xfe   : > { %v515_v13 = vpop.permute.xlu1 %514  ;;  %v5631_v15 = vunpack.i.h.bf16 %v5629_v14  ;;  %v5630_v16 = vunpack.i.l.bf16 %v5629_v14 }
 0x100   : > { %v432_v18 = vsel %vm430_vm6, %v5630_v16, %v5631_v15  ;;  %v431_v20 = vsel %vm430_vm6, %v425_v8, %v5630_v16  ;;  %v637_v16 = vld [vmem:[%s6984_s3] sm:$0xff] }
 0x101   : > { %v5634_v24 = vpop.permute.xlu0 %5633  ;;  %v5522_v25 = vpack.c.bf16 %v451_v19, %v432_v18  ;;  %v5524_v26 = vpack.c.bf16 %v450_v17, %v431_v20 }
 0x102   : > { %v5639_v23 = vpop.permute.xlu1 %5638  ;;  %v5636_v32 = vunpack.i.h.bf16 %v5634_v24  ;;  %v5635_v34 = vunpack.i.l.bf16 %v5634_v24 }
 0x103   : > { %v5641_v27 = vunpack.i.h.bf16 %v5639_v23  ;;  %v5640_v28 = vunpack.i.l.bf16 %v5639_v23  ;;  %5523 = vmatprep.subr.bf16.mxu0 %v5522_v25 }
 0x104   : > { %5525 = vmatpush1.bf16.msra.mxu0 %v5524_v26  ;;  %v491_v35 = vsel %vm489_vm5, %v5635_v34, %v5636_v32  ;;  %v490_v38 = vsel %vm489_vm5, %v484_v10, %v5635_v34 }
 0x105   : > { %v522_v37 = vsel %vm520_vm4, %v5640_v28, %v5641_v27  ;;  %v521_v39 = vsel %vm520_vm4, %v515_v13, %v5640_v28 }
 0x106   : > { %v549_v41 = vpop.permute.xlu1 %548  ;;  %v578_v42 = vpop.permute.xlu0 %577  ;;  %v5526_v43 = vpack.c.bf16 %v522_v37, %v491_v35  ;;  %v5528_v44 = vpack.c.bf16 %v521_v39, %v490_v38 }
 0x108   : > { %5527 = vmatprep.subr.bf16.mxu0 %v5526_v43  ;;  %v926_v43 = vld [vmem:[%s6987_s6] sm:$0xff] }
 0x109   : > { %5529 = vmatpush1.bf16.msra.mxu0 %v5528_v44  ;;  %v1084_v44 = vld [vmem:[%s6989_s8] sm:$0xff] }
 0x10a   : > { %v5644_v46 = vpop.permute.xlu1 %5643  ;;  %v5649_v47 = vpop.permute.xlu0 %5648 }
 0x10b   : > { %v5646_v49 = vunpack.i.h.bf16 %v5644_v46  ;;  %v5645_v51 = vunpack.i.l.bf16 %v5644_v46  ;;  %v5651_v52 = vunpack.i.h.bf16 %v5649_v47  ;;  %v5650_v53 = vunpack.i.l.bf16 %v5649_v47 }
 0x10d   : > { %v555_v56 = vsel %vm503_vm3, %v5650_v53, %v5651_v52  ;;  %v554_v58 = vsel %vm503_vm3, %v549_v41, %v5650_v53  ;;  %v603_v8 = vsel %vm601_vm8, %v5645_v51, %v5646_v49 }
 0x10e   : > { %v596_v59 = vpop.permute.xlu1 %595  ;;  %v5654_v61 = vpop.permute.xlu0 %5653  ;;  %v5530_v63 = vpack.c.bf16 %v555_v56, %v5854_v22  ;;  %v5532_v2 = vpack.c.bf16 %v554_v58, %v5852_v21 }
 0x10f   : > { %v602_v4 = vsel %vm601_vm8, %v596_v59, %v5645_v51  ;;  %v5656_v6 = vunpack.i.h.bf16 %v5654_v61  ;;  %v5655_v7 = vunpack.i.l.bf16 %v5654_v61 }
 0x110   : > { %5531 = vmatprep.subr.bf16.mxu0 %v5530_v63 }
 0x111   : > { %5533 = vmatpush1.bf16.msra.mxu0 %v5532_v2  ;;  %v584_v9 = vsel %vm472_vm2, %v5655_v7, %v5656_v6  ;;  %v583_v10 = vsel %vm472_vm2, %v578_v42, %v5655_v7 }
 0x112   : > { %v630_v11 = vpop.permute.xlu1 %629  ;;  %v628_v12 = vpop.permute.xlu0 %627  ;;  %v5534_v13 = vpack.c.bf16 %v603_v8, %v584_v9  ;;  %v5536_v14 = vpack.c.bf16 %v602_v4, %v583_v10 }
 0x113   : > { %v632_v21 = vsel %vm413_vm1, %v628_v12, %v630_v11 }
 0x114   : > { %5535 = vmatprep.subr.bf16.mxu0 %v5534_v13 }
 0x115   : > { %5537 = vmatpush1.bf16.msra.mxu0 %v5536_v14 }
 0x116   : > { %v626_v22 = vpop.permute.xlu0 %625  ;;  %682 = vmatprep.subr.mxu0 %v632_v21 }
 0x117   : > { %v631_v15 = vsel %vm413_vm1, %v626_v22, %v628_v12 }
 0x119   : > { %683 = vmatpush1.msra.mxu0 %v631_v15 }
 0x11a   : > { %5377 = vmatmul.mubr.msk.f32.vlgmr.msra.gmra.mrb[0].mxu0 %vm662_vm9, %v637_v16  ;;  %v751_v47 = vpop.permute.xlu0 %750 }
 0x11b   : > { %1167 = vmatprep.mubr.f32.mxu0 %v5718_v1 }
 0x11e   : > { %v790_v51 = vpop.permute.xlu0 %789 }
 0x123   : > { %v660_v17 = vpop.permute.xlu1 %659 }
 0x127   : > { %v769_v46 = vpop.permute.xlu1 %768 }
 0x12b   : > { %v811_v49 = vpop.permute.xlu1 %810 }
 0x1ed   : > { %v732_v18 = vpop.f32.mrb[0].mxu0 }
 0x1ee   : > { %v733_v19 = vadd.f32 %v732_v18, %v660_v17  ;;  %v734_v20 = vpop.f32.mrb[1].mxu0 }
 0x1ef   : > { %v735_v23 = vadd.f32 %v734_v20, %v660_v17 }
 0x1f0   : > { %v5985_v24 = vmax.f32 %v733_v19, 0.0 }
 0x1f1   : > { %v5987_v25 = vmax.f32 %v735_v23, 0.0 }
 0x1f2   : > { %v745_v26 = vmul.f32 %v5985_v24, %v5873_v31  ;;  %v805_v32 = vmul.f32 %v5985_v24, %v5892_v40  ;;  %v784_v37 = vmul.f32 %v5985_v24, %v5879_v33  ;;  %v850_v40 = vmul.f32 %v5985_v24, %v5908_v50 }
 0x1f3   : > { %v5658_v27 = vpack.i.bf16 %v5987_v25, %v5985_v24  ;;  %v746_v28 = vmul.f32 %v5987_v25, %v5869_v30  ;;  %v806_v34 = vmul.f32 %v5987_v25, %v5886_v36  ;;  %v785_v31 = vmul.f32 %v5987_v25, %v5867_v29 }
 0x1f4   : > { %v829_v36 = vmul.f32 %v5985_v24, %v5900_v45  ;;  %v830_v33 = vmul.f32 %v5987_v25, %v5904_v48  ;;  %v5678_v29 = vpack.i.bf16 %v5718_v1, %v5987_v25  ;;  %v851_v41 = vmul.f32 %v5987_v25, %v5920_v55 }
 0x1f5   : > { %5659 = vrot.lane.b32.xlu1 %v5658_v27, %s5726_s18  ;;  %v5663_v35 = vpack.i.bf16 %v746_v28, %v745_v26  ;;  %v5673_v38 = vpack.i.bf16 %v806_v34, %v805_v32  ;;  %v5668_v30 = vpack.i.bf16 %v785_v31, %v784_v37  ;;  %v890_v42 = vmul.f32 %v5987_v25, %v5937_v62 }
 0x1f6   : > { %v5683_v39 = vpack.i.bf16 %v5916_v54, %v830_v33  ;;  %v5688_v50 = vpack.i.bf16 %v5926_v57, %v851_v41  ;;  %v889_v55 = vmul.f32 %v5985_v24, %v5929_v60  ;;  %v1085_v57 = vld [vmem:[%s6989_s8 + $0x8] sm:$0xff] }
 0x1f7   : > { %5664 = vrot.lane.b32.xlu0 %v5663_v35, %s5725_s17 }
 0x1f9   : > { %5674 = vrot.lane.b32.xlu1 %v5673_v38, %s5722_s15 }
 0x1fb   : > { %5669 = vrot.lane.b32.xlu0 %v5668_v30, %s5723_s16 }
 0x1fd   : > { %835 = vrot.lane.b32.xlu1 %v829_v36, %s5721_s14 }
 0x1ff   : > { %856 = vrot.lane.b32.xlu0 %v850_v40, %s5719_s21 }
 0x201   : > { %5679 = vrot.lane.b32.xlu1 %v5678_v29, %s5727_s19 }
 0x203   : > { %5684 = vrot.lane.b32.xlu0 %v5683_v39, %s5721_s14 }
 0x205   : > { %874 = vrot.lane.b32.xlu1 %v5985_v24, %s5727_s19 }
 0x207   : > { %5689 = vrot.lane.b32.xlu0 %v5688_v50, %s5719_s21 }
 0x209   : > { %899 = vrot.lane.b32.xlu1 %v5943_v0, %s5720_s22 }
 0x20b   : > { %897 = vrot.lane.b32.xlu0 %v890_v42, %s5720_s22 }
 0x20d   : > { %929 = vperm.xlu1 %5657, %v926_v43  }
 0x20f   : > { %895 = vrot.lane.b32.xlu0 %v889_v55, %s5720_s22 }
 0x211   : > { %1093 = vperm.xlu1 %5657, %v1085_v57  }
 0x213   : > { %1088 = vperm.xlu0 %5693, %v1084_v44  }
 0x267   : > { %v5660_v52 = vpop.permute.xlu1 %5659 }
 0x268   : > { %v5662_v53 = vunpack.i.h.bf16 %v5660_v52  ;;  %v5661_v56 = vunpack.i.l.bf16 %v5660_v52 }
 0x269   : > { %v5665_v58 = vpop.permute.xlu0 %5664 }
 0x26a   : > { %v5667_v59 = vunpack.i.h.bf16 %v5665_v58  ;;  %v5666_v61 = vunpack.i.l.bf16 %v5665_v58  ;;  %v775_v2 = vsel %vm449_vm7, %v5661_v56, %v5662_v53  ;;  %v774_v4 = vsel %vm449_vm7, %v769_v46, %v5661_v56  ;;  %v907_v46 = vld [vmem:[%s6986_s5] sm:$0xff] }
 0x26b   : > { %v5675_v63 = vpop.permute.xlu1 %5674 }
 0x26c   : > { %v5677_v6 = vunpack.i.h.bf16 %v5675_v63  ;;  %v5676_v7 = vunpack.i.l.bf16 %v5675_v63  ;;  %v757_v8 = vsel %vm430_vm6, %v5666_v61, %v5667_v59  ;;  %v756_v9 = vsel %vm430_vm6, %v751_v47, %v5666_v61 }
 0x26d   : > { %v5670_v10 = vpop.permute.xlu0 %5669  ;;  %v5538_v11 = vpack.c.bf16 %v775_v2, %v757_v8  ;;  %v5540_v12 = vpack.c.bf16 %v774_v4, %v756_v9 }
 0x26e   : > { %v5672_v13 = vunpack.i.h.bf16 %v5670_v10  ;;  %v5671_v14 = vunpack.i.l.bf16 %v5670_v10  ;;  %v817_v15 = vsel %vm520_vm4, %v5676_v7, %v5677_v6  ;;  %v816_v17 = vsel %vm520_vm4, %v811_v49, %v5676_v7 }
 0x26f   : > { %v836_v21 = vpop.permute.xlu1 %835  ;;  %5539 = vmatprep.subr.bf16.mxu1 %v5538_v11 }
 0x270   : > { %5541 = vmatpush1.bf16.msra.mxu1 %v5540_v12  ;;  %v796_v22 = vsel %vm489_vm5, %v5671_v14, %v5672_v13  ;;  %v795_v16 = vsel %vm489_vm5, %v790_v51, %v5671_v14 }
 0x271   : > { %v857_v18 = vpop.permute.xlu0 %856  ;;  %v5542_v19 = vpack.c.bf16 %v817_v15, %v796_v22  ;;  %v5544_v20 = vpack.c.bf16 %v816_v17, %v795_v16 }
 0x273   : > { %v5680_v23 = vpop.permute.xlu1 %5679  ;;  %5543 = vmatprep.subr.bf16.mxu1 %v5542_v19 }
 0x274   : > { %5545 = vmatpush1.bf16.msra.mxu1 %v5544_v20  ;;  %v5682_v32 = vunpack.i.h.bf16 %v5680_v23  ;;  %v5681_v34 = vunpack.i.l.bf16 %v5680_v23 }
 0x275   : > { %v5685_v26 = vpop.permute.xlu0 %5684 }
 0x276   : > { %v5687_v27 = vunpack.i.h.bf16 %v5685_v26  ;;  %v5686_v28 = vunpack.i.l.bf16 %v5685_v26  ;;  %v881_v41 = vsel %vm601_vm8, %v5681_v34, %v5682_v32  ;;  %v5728_v32 = vmov 1966171168  }
 0x277   : > { %v875_v31 = vpop.permute.xlu1 %874 }
 0x278   : > { %v842_v35 = vsel %vm503_vm3, %v5686_v28, %v5687_v27  ;;  %v841_v37 = vsel %vm503_vm3, %v836_v21, %v5686_v28  ;;  %v880_v29 = vsel %vm601_vm8, %v875_v31, %v5681_v34  ;;  %v1074_v27 = vld [vmem:[%s6988_s7] sm:$0xff]  ;;  %v1075_v28 = vld [vmem:[%s6988_s7 + $0x8] sm:$0xff]  ;;  %v1194_v34 = vunpack.c.l.s4 %v5728_v32 }
 0x279   : > { %v5690_v38 = vpop.permute.xlu0 %5689  ;;  %v5546_v30 = vpack.c.bf16 %v842_v35, %v5987_v25  ;;  %v5548_v36 = vpack.c.bf16 %v841_v37, %v5985_v24 }
 0x27a   : > { %v5692_v40 = vunpack.i.h.bf16 %v5690_v38  ;;  %v5691_v33 = vunpack.i.l.bf16 %v5690_v38  ;;  %v1195_v35 = vunpack.c.0.s8 %v1194_v34 }
 0x27b   : > { %5547 = vmatprep.subr.bf16.mxu1 %v5546_v30  ;;  %v900_v57 = vpop.permute.xlu1 %899 }
 0x27c   : > { %5549 = vmatpush1.bf16.msra.mxu1 %v5548_v36  ;;  %v863_v39 = vsel %vm472_vm2, %v5691_v33, %v5692_v40  ;;  %v862_v50 = vsel %vm472_vm2, %v857_v18, %v5691_v33  ;;  %v6094_v30 = vsub.s32 %v1195_v35, %v5804_v3 }
 0x27d   : > { %v898_v42 = vpop.permute.xlu0 %897  ;;  %v5550_v43 = vpack.c.bf16 %v881_v41, %v863_v39  ;;  %v5552_v55 = vpack.c.bf16 %v880_v29, %v862_v50 }
 0x27e   : > { %v902_v24 = vsel %vm413_vm1, %v898_v42, %v900_v57 }
 0x27f   : > { %5551 = vmatprep.subr.bf16.mxu1 %v5550_v43 }
 0x280   : > { %5553 = vmatpush1.bf16.msra.mxu1 %v5552_v55 }
 0x281   : > { %v896_v25 = vpop.permute.xlu0 %895  ;;  %951 = vmatprep.subr.mxu1 %v902_v24 }
 0x282   : > { %v901_v44 = vsel %vm413_vm1, %v896_v25, %v898_v42 }
 0x284   : > { %952 = vmatpush1.msra.mxu1 %v901_v44 }
 0x285   : > { %5378 = vmatmul.mubr.msk.f32.vlgmr.msra.gmra.mrb[0].mxu1 %vm662_vm9, %v907_v46 }
 0x286   : > { %1173 = vmatprep.mubr.f32.mxu1 %v5718_v1 }
 0x28c   : > { %v930_v47 = vpop.permute.xlu1 %929 }
 0x290   : > { %v1094_v7 = vpop.permute.xlu1 %1093 }
 0x358   : > { %v1001_v49 = vpop.f32.mrb[0].mxu1 }
 0x359   : > { %v1002_v51 = vadd.f32 %v1001_v49, %v930_v47  ;;  %v1003_v52 = vpop.f32.mrb[1].mxu1 }
 0x35a   : > { %v1004_v53 = vadd.f32 %v1003_v52, %v930_v47 }
 0x35b   : > { %v1006_v56 = vmax.f32 %v1002_v51, 0.0 }
 0x35c   : > { %v1007_v58 = vmax.f32 %v1004_v53, 0.0 }
 0x35d   : > { %1008 = vst [vmem:[#allocation2 + $0x8] sm:$0xff] %v1006_v56  ;;  %1041 = vrot.lane.b32.xlu0 %v1006_v56, %s5727_s19  ;;  %v1017_v59 = vmul.f32 %v1006_v56, %v5900_v45  ;;  %v1056_v2 = vmul.f32 %v1006_v56, %v5929_v60 }
 0x35e   : > { %1009 = vst [vmem:[#allocation2 + $0x10] sm:$0xff] %v1007_v58  ;;  %v5694_v61 = vpack.i.bf16 %v5718_v1, %v1007_v58  ;;  %v1018_v63 = vmul.f32 %v1007_v58, %v5904_v48  ;;  %v1057_v4 = vmul.f32 %v1007_v58, %v5937_v62  ;;  %v1089_v1 = vpop.permute.xlu0 %1088 }
 0x35f   : > { %1023 = vrot.lane.b32.xlu1 %v1017_v59, %s5721_s14 }
 0x360   : > { %v5699_v6 = vpack.i.bf16 %v5916_v54, %v1018_v63  ;;  %v5704_v45 = vpack.i.bf16 %v5943_v0, %v1057_v4 }
 0x361   : > { %5695 = vrot.lane.b32.xlu0 %v5694_v61, %s5727_s19 }
 0x363   : > { %1062 = vrot.lane.b32.xlu1 %v1056_v2, %s5720_s22 }
 0x365   : > { %5700 = vrot.lane.b32.xlu0 %v5699_v6, %s5721_s14 }
 0x367   : > { %5705 = vrot.lane.b32.xlu1 %v5704_v45, %s5720_s22 }
 0x3cf   : > { %v1042_v8 = vpop.permute.xlu0 %1041 }
 0x3d1   : > { %v1024_v48 = vpop.permute.xlu1 %1023 }
 0x3d3   : > { %v5696_v9 = vpop.permute.xlu0 %5695 }
 0x3d4   : > { %v5698_v60 = vunpack.i.h.bf16 %v5696_v9  ;;  %v5697_v12 = vunpack.i.l.bf16 %v5696_v9 }
 0x3d5   : > { %v1063_v10 = vpop.permute.xlu1 %1062 }
 0x3d6   : > { %v1048_v17 = vsel %vm601_vm8, %v5697_v12, %v5698_v60  ;;  %v1047_v23 = vsel %vm601_vm8, %v1042_v8, %v5697_v12 }
 0x3d7   : > { %v5701_v11 = vpop.permute.xlu0 %5700 }
 0x3d8   : > { %v5703_v62 = vunpack.i.h.bf16 %v5701_v11  ;;  %v5702_v13 = vunpack.i.l.bf16 %v5701_v11 }
 0x3d9   : > { %v5706_v14 = vpop.permute.xlu1 %5705 }
 0x3da   : > { %v1029_v54 = vsel %vm503_vm3, %v1024_v48, %v5702_v13  ;;  %v5708_v21 = vunpack.i.h.bf16 %v5706_v14  ;;  %v5707_v22 = vunpack.i.l.bf16 %v5706_v14  ;;  %v1030_v0 = vsel %vm503_vm3, %v5702_v13, %v5703_v62 }
 0x3db   : > { %v5554_v15 = vpack.c.bf16 %v1030_v0, %v1007_v58  ;;  %v5556_v16 = vpack.c.bf16 %v1029_v54, %v1006_v56 }
 0x3dc   : > { %v1069_v18 = vsel %vm413_vm1, %v5707_v22, %v5708_v21  ;;  %v1068_v19 = vsel %vm413_vm1, %v1063_v10, %v5707_v22 }
 0x3dd   : > { %5555 = vmatprep.subr.bf16.mxu0 %v5554_v15  ;;  %5578 = vmatprep.subr.bf16.mxu1 %v5554_v15  ;;  %v5558_v20 = vpack.c.bf16 %v1069_v18, %v1048_v17  ;;  %v5560_v26 = vpack.c.bf16 %v1068_v19, %v1047_v23 }
 0x3de   : > { %5557 = vmatpush1.bf16.msra.mxu0 %v5556_v16  ;;  %5580 = vmatpush1.bf16.msra.mxu1 %v5556_v16 }
 0x3df   : > { %5559 = vmatprep.subr.bf16.mxu0 %v5558_v20  ;;  %5579 = vmatprep.subr.bf16.mxu1 %v5558_v20 }
 0x3e2   : > { %5561 = vmatpush1.bf16.msra.mxu0 %v5560_v26  ;;  %5581 = vmatpush1.bf16.msra.mxu1 %v5560_v26 }
 0x3e5   : > { %5379 = vmatmul.mubr.msk.f32.vlgmr.msra.gmra.mrb[2].mxu0 %vm1096_vm10, %v1074_v27  ;;  %5380 = vmatmul.mubr.msk.f32.vlgmr.msra.gmra.mrb[2].mxu1 %vm1096_vm10, %v1075_v28 }
 0x4b8   : > { %v1169_v37 = vpop.f32.mrb[2].mxu0  ;;  %v1175_v31 = vpop.f32.mrb[2].mxu1 }
 0x4b9   : > { %v1170_v38 = vadd.f32 %v1169_v37, %v1089_v1  ;;  %v1176_v36 = vadd.f32 %v1175_v31, %v1094_v7  ;;  %v1171_v40 = vpop.f32.mrb[3].mxu0  ;;  %v1177_v33 = vpop.f32.mrb[3].mxu1 }
 0x4ba   : > { %v1172_v29 = vadd.f32 %v1171_v40, %v1089_v1  ;;  %v1178_v39 = vadd.f32 %v1177_v33, %v1094_v7 }
 0x4bb   : > { %v1180_v41 = vmax.f32 %v1170_v38, 0.0  ;;  %v1182_v50 = vmax.f32 %v1176_v36, 0.0 }
 0x4bc   : > { %v1181_v42 = vmax.f32 %v1172_v29, 0.0  ;;  %v1183_v25 = vmax.f32 %v1178_v39, 0.0 }
 0x4bd   : > { %v1192_v43 = vcombine.high %v1180_v41, %v1180_v41  ;;  %v1199_v55 = vrot.slane %v1180_v41, %v6094_v30  ;;  %v1241_v57 = vcombine.high %v1182_v50, %v1182_v50  ;;  %v1248_v24 = vrot.slane %v1182_v50, %v6094_v30 }
 0x4be   : > { %v2937_v52 = vcombine.high %v1181_v42, %v1181_v42  ;;  %v2944_v53 = vrot.slane %v1181_v42, %v6094_v30  ;;  %v2986_v9 = vcombine.high %v1183_v25, %v1183_v25  ;;  %v2993_v12 = vrot.slane %v1183_v25, %v6094_v30 }
 0x4bf   : > { %v1206_v44 = vrot.slane %v1192_v43, %v6094_v30  ;;  %v1207_v3 = vcombine.high %v1199_v55, %v1199_v55  ;;  %v1215_v46 = vrot.slane %v1199_v55, %v6094_v30  ;;  %v1255_v47 = vrot.slane %v1241_v57, %v6094_v30 }
 0x4c0   : > { %v1256_v49 = vcombine.high %v1248_v24, %v1248_v24  ;;  %v1264_v51 = vrot.slane %v1248_v24, %v6094_v30  ;;  %v2951_v11 = vrot.slane %v2937_v52, %v6094_v30  ;;  %v2952_v60 = vcombine.high %v2944_v53, %v2944_v53 }
 0x4c1   : > { %v1208_v56 = vcombine.high %v1206_v44, %v1206_v44  ;;  %v6104_v58 = vrot.slane %v1206_v44, %v6094_v30  ;;  %v6107_v59 = vrot.slane %v1207_v3, %v6094_v30  ;;  %v6109_v61 = vcombine.high %v1215_v46, %v1215_v46  ;;  %1307 = vst.msk [vmem:[#allocation6] sm:$0x1] %vm1306_vm11, %v1215_v46 }
 0x4c2   : > { %v6113_v63 = vrot.slane %v1215_v46, %v5810_v5  ;;  %v1257_v2 = vcombine.high %v1255_v47, %v1255_v47  ;;  %v6116_v4 = vrot.slane %v1255_v47, %v6094_v30  ;;  %v6119_v6 = vrot.slane %v1256_v49, %v6094_v30  ;;  %1315 = vst.msk [vmem:[#allocation6 + $0x80] sm:$0x1] %vm1306_vm11, %v1264_v51 }
 0x4c3   : > { %v6123_v45 = vrot.slane %v1208_v56, %v6094_v30  ;;  %v6127_v1 = vcombine.high %v6104_v58, %v6104_v58  ;;  %v6131_v7 = vcombine.high %v6107_v59, %v6107_v59  ;;  %1308 = vst.msk [vmem:[#allocation6 + $0x10] sm:$0x1] %vm1306_vm11, %v6107_v59  ;;  %1309 = vst.msk [vmem:[#allocation6 + $0x20] sm:$0x1] %vm1306_vm11, %v6109_v61 }
 0x4c4   : > { %1311 = vst.msk [vmem:[#allocation6 + $0x40] sm:$0x1] %vm1306_vm11, %v6104_v58  ;;  %v6140_v8 = vrot.slane %v1257_v2, %v6094_v30  ;;  %v6142_v48 = vcombine.high %v1264_v51, %v1264_v51  ;;  %1316 = vst.msk [vmem:[#allocation6 + $0x90] sm:$0x1] %vm1306_vm11, %v6119_v6  ;;  %1489 = vrot.lane.b32.xlu1 %v6113_v63, %s5727_s19  ;;  %v6164_v62 = vcombine.high %v6116_v4, %v6116_v4 }
 0x4c5   : > { %1319 = vst.msk [vmem:[#allocation6 + $0xc0] sm:$0x1] %vm1306_vm11, %v6116_v4  ;;  %v6152_v10 = vcombine.high %v6123_v45, %v6123_v45  ;;  %1310 = vst.msk [vmem:[#allocation6 + $0x30] sm:$0x1] %vm1306_vm11, %v6131_v7  ;;  %v6168_v13 = vcombine.high %v6119_v6, %v6119_v6  ;;  %v1460_v54 = vrot.slane %v1264_v51, %v5810_v5 }
 0x4c6   : > { %1312 = vst.msk [vmem:[#allocation6 + $0x50] sm:$0x1] %vm1306_vm11, %v6123_v45  ;;  %1313 = vst.msk [vmem:[#allocation6 + $0x60] sm:$0x1] %vm1306_vm11, %v6127_v1  ;;  %v6172_v14 = vcombine.high %v6140_v8, %v6140_v8  ;;  %v2953_v21 = vcombine.high %v2951_v11, %v2951_v11  ;;  %v2960_v22 = vrot.slane %v2944_v53, %v6094_v30 }
 0x4c7   : > { %1317 = vst.msk [vmem:[#allocation6 + $0xa0] sm:$0x1] %vm1306_vm11, %v6142_v48  ;;  %1320 = vst.msk [vmem:[#allocation6 + $0xd0] sm:$0x1] %vm1306_vm11, %v6140_v8  ;;  %2195 = vrot.lane.b32.xlu0 %v1460_v54, %s5729_s20  ;;  %v6190_v0 = vrot.slane %v2951_v11, %v6094_v30  ;;  %v6193_v15 = vrot.slane %v2952_v60, %v6094_v30  ;;  %v3000_v16 = vrot.slane %v2986_v9, %v6094_v30 }
 0x4c8   : > { %1314 = vst.msk [vmem:[#allocation6 + $0x70] sm:$0x1] %vm1306_vm11, %v6152_v10  ;;  %1318 = vst.msk [vmem:[#allocation6 + $0xb0] sm:$0x1] %vm1306_vm11, %v6168_v13  ;;  %1505 = vrot.lane.b32.xlu1 %v1460_v54, %s5727_s19  ;;  %v3001_v17 = vcombine.high %v2993_v12, %v2993_v12  ;;  %v3009_v18 = vrot.slane %v2993_v12, %v6094_v30  ;;  %v6199_v19 = vrot.slane %v2953_v21, %v6094_v30  ;;  %v4679_v12 = vld [vmem:[%s6990_s9 + $0x10] sm:$0xff] }
 0x4c9   : > { %1321 = vst.msk [vmem:[#allocation6 + $0xe0] sm:$0x1] %vm1306_vm11, %v6164_v62  ;;  %1322 = vst.msk [vmem:[#allocation6 + $0xf0] sm:$0x1] %vm1306_vm11, %v6172_v14  ;;  %v6201_v20 = vcombine.high %v2960_v22, %v2960_v22  ;;  %v6205_v23 = vcombine.high %v6190_v0, %v6190_v0  ;;  %v6209_v26 = vcombine.high %v6193_v15, %v6193_v15 }
 0x4ca   : > { %3051 = vst.msk [vmem:[#allocation6 + $0x8] sm:$0x1] %vm1306_vm11, %v2960_v22  ;;  %3052 = vst.msk [vmem:[#allocation6 + $0x18] sm:$0x1] %vm1306_vm11, %v6193_v15  ;;  %v3002_v27 = vcombine.high %v3000_v16, %v3000_v16  ;;  %v6220_v28 = vcombine.high %v6199_v19, %v6199_v19  ;;  %v6233_v32 = vrot.slane %v3000_v16, %v6094_v30 }
 0x4cb   : > { %3055 = vst.msk [vmem:[#allocation6 + $0x48] sm:$0x1] %vm1306_vm11, %v6190_v0  ;;  %3059 = vst.msk [vmem:[#allocation6 + $0x88] sm:$0x1] %vm1306_vm11, %v3009_v18  ;;  %2655 = vrot.lane.b32.xlu0 %v1460_v54, %s5730_s23  ;;  %v6236_v34 = vrot.slane %v3001_v17, %v6094_v30  ;;  %v6243_v37 = vcombine.high %v3009_v18, %v3009_v18  ;;  %v3172_v40 = vrot.slane %v2960_v22, %v5810_v5 }
 0x4cc   : > { %3053 = vst.msk [vmem:[#allocation6 + $0x28] sm:$0x1] %vm1306_vm11, %v6201_v20  ;;  %3054 = vst.msk [vmem:[#allocation6 + $0x38] sm:$0x1] %vm1306_vm11, %v6209_v26  ;;  %1719 = vrot.lane.b32.xlu1 %v6113_v63, %s5731_s24  ;;  %v6239_v35 = vrot.slane %v3002_v27, %v6094_v30  ;;  %v6247_v31 = vcombine.high %v6233_v32, %v6233_v32  ;;  %v3204_v30 = vrot.slane %v3009_v18, %v5810_v5 }
 0x4cd   : > { %3056 = vst.msk [vmem:[#allocation6 + $0x58] sm:$0x1] %vm1306_vm11, %v6199_v19  ;;  %3057 = vst.msk [vmem:[#allocation6 + $0x68] sm:$0x1] %vm1306_vm11, %v6205_v23  ;;  %v6251_v38 = vcombine.high %v6236_v34, %v6236_v34  ;;  %v6298_v33 = vrot.slane %v6107_v59, %v5810_v5  ;;  %v1464_v29 = vrot.slane %v6119_v6, %v5810_v5 }
 0x4ce   : > { %3058 = vst.msk [vmem:[#allocation6 + $0x78] sm:$0x1] %vm1306_vm11, %v6220_v28  ;;  %v6255_v36 = vcombine.high %v6239_v35, %v6239_v35  ;;  %3060 = vst.msk [vmem:[#allocation6 + $0x98] sm:$0x1] %vm1306_vm11, %v6236_v34  ;;  %v6317_v39 = vrot.slane %v6109_v61, %v5810_v5  ;;  %v1476_v41 = vrot.slane %v6116_v4, %v5810_v5 }
 0x4cf   : > { %3063 = vst.msk [vmem:[#allocation6 + $0xc8] sm:$0x1] %vm1306_vm11, %v6233_v32  ;;  %3064 = vst.msk [vmem:[#allocation6 + $0xd8] sm:$0x1] %vm1306_vm11, %v6239_v35  ;;  %2409 = vrot.lane.b32.xlu0 %v6113_v63, %s5732_s25  ;;  %v6326_v50 = vrot.slane %v6104_v58, %v5810_v5  ;;  %v1468_v42 = vrot.slane %v6142_v48, %v5810_v5  ;;  %v6358_v43 = vrot.slane %v6233_v32, %v5810_v5 }
 0x4d0   : > { %3061 = vst.msk [vmem:[#allocation6 + $0xa8] sm:$0x1] %vm1306_vm11, %v6243_v37  ;;  %1735 = vrot.lane.b32.xlu1 %v1460_v54, %s5731_s24  ;;  %3062 = vst.msk [vmem:[#allocation6 + $0xb8] sm:$0x1] %vm1306_vm11, %v6251_v38  ;;  %v6377_v25 = vrot.slane %v6236_v34, %v5810_v5  ;;  %v6396_v52 = vrot.slane %v6243_v37, %v5810_v5  ;;  %v6423_v6 = vrot.slane %v6190_v0, %v5810_v5 }
 0x4d1   : > { %3065 = vst.msk [vmem:[#allocation6 + $0xe8] sm:$0x1] %vm1306_vm11, %v6247_v31  ;;  %3066 = vst.msk [vmem:[#allocation6 + $0xf8] sm:$0x1] %vm1306_vm11, %v6255_v36  ;;  %v6457_v18 = vrot.slane %v6131_v7, %v5810_v5  ;;  %v6467_v34 = vrot.slane %v6123_v45, %v5810_v5 }
 0x4d3   : > { %2869 = vrot.lane.b32.xlu0 %v6113_v63, %s5726_s18 }
 0x4d4   : > { %1949 = vrot.lane.b32.xlu1 %v6113_v63, %s5733_s26 }
 0x4d7   : > { %3249 = vrot.lane.b32.xlu0 %v3204_v30, %s5727_s19 }
 0x4d8   : > { %1965 = vrot.lane.b32.xlu1 %v1460_v54, %s5733_s26 }
 0x4db   : > { %3709 = vrot.lane.b32.xlu0 %v3204_v30, %s5733_s26 }
 0x4dc   : > { %2179 = vrot.lane.b32.xlu1 %v6113_v63, %s5729_s20 }
 0x4df   : > { %4169 = vrot.lane.b32.xlu0 %v3204_v30, %s5732_s25 }
 0x4e0   : > { %2425 = vrot.lane.b32.xlu1 %v1460_v54, %s5732_s25 }
 0x4e3   : > { %4629 = vrot.lane.b32.xlu0 %v3204_v30, %s5726_s18 }
 0x4e4   : > { %2885 = vrot.lane.b32.xlu1 %v1460_v54, %s5726_s18  ;;  %v4680_v54 = vld [vmem:[%s6990_s9 + $0x18] sm:$0xff] }
 0x4e5   : > { %v5562_v21 = vpack.c.bf16 %v4680_v54, %v4679_v12 }
 0x4e7   : > { %3463 = vrot.lane.b32.xlu0 %v3172_v40, %s5731_s24  ;;  %5571 = vmatprep.subr.bf16.mxu0 %v5562_v21 }
 0x4e8   : > { %2639 = vrot.lane.b32.xlu1 %v6113_v63, %s5730_s23  ;;  %5563 = vmatprep.subr.bf16.mxu1 %v5562_v21 }
 0x4e9   : > { %5573 = vmatpush3.bf16.msra.mxu0 %v5562_v21  ;;  %5565 = vmatpush3.bf16.msra.mxu1 %v5562_v21 }
 0x4eb   : > { %3923 = vrot.lane.b32.xlu0 %v3172_v40, %s5729_s20 }
 0x4ec   : > { %3479 = vrot.lane.b32.xlu1 %v3204_v30, %s5731_s24 }
 0x4ef   : > { %4383 = vrot.lane.b32.xlu0 %v3172_v40, %s5730_s23 }
 0x4f0   : > { %3939 = vrot.lane.b32.xlu1 %v3204_v30, %s5729_s20 }
 0x4f3   : > { %1491 = vrot.lane.b32.xlu0 %v6298_v33, %s5727_s19 }
 0x4f4   : > { %4399 = vrot.lane.b32.xlu1 %v3204_v30, %s5730_s23  ;;  %v6477_v30 = vrot.slane %v6168_v13, %v5810_v5 }
 0x4f7   : > { %1507 = vrot.lane.b32.xlu0 %v1464_v29, %s5727_s19 }
 0x4f8   : > { %3233 = vrot.lane.b32.xlu1 %v3172_v40, %s5727_s19 }
 0x4fb   : > { %1721 = vrot.lane.b32.xlu0 %v6298_v33, %s5731_s24 }
 0x4fc   : > { %3693 = vrot.lane.b32.xlu1 %v3172_v40, %s5733_s26 }
 0x4ff   : > { %1737 = vrot.lane.b32.xlu0 %v1464_v29, %s5731_s24 }
 0x500   : > { %4153 = vrot.lane.b32.xlu1 %v3172_v40, %s5732_s25 }
 0x503   : > { %1951 = vrot.lane.b32.xlu0 %v6298_v33, %s5733_s26 }
 0x504   : > { %4613 = vrot.lane.b32.xlu1 %v3172_v40, %s5726_s18 }
 0x507   : > { %1967 = vrot.lane.b32.xlu0 %v1464_v29, %s5733_s26 }
 0x508   : > { %1493 = vrot.lane.b32.xlu1 %v6317_v39, %s5727_s19 }
 0x50b   : > { %2203 = vrot.lane.b32.xlu0 %v1476_v41, %s5729_s20 }
 0x50c   : > { %1497 = vrot.lane.b32.xlu1 %v6326_v50, %s5727_s19 }
 0x50f   : > { %2663 = vrot.lane.b32.xlu0 %v1476_v41, %s5730_s23 }
 0x510   : > { %1509 = vrot.lane.b32.xlu1 %v1468_v42, %s5727_s19 }
 0x513   : > { %2427 = vrot.lane.b32.xlu0 %v1464_v29, %s5732_s25 }
 0x514   : > { %1513 = vrot.lane.b32.xlu1 %v1476_v41, %s5727_s19 }
 0x517   : > { %2887 = vrot.lane.b32.xlu0 %v1464_v29, %s5726_s18 }
 0x518   : > { %1723 = vrot.lane.b32.xlu1 %v6317_v39, %s5731_s24 }
 0x51b   : > { %2199 = vrot.lane.b32.xlu0 %v1468_v42, %s5729_s20 }
 0x51c   : > { %1727 = vrot.lane.b32.xlu1 %v6326_v50, %s5731_s24 }
 0x51f   : > { %2659 = vrot.lane.b32.xlu0 %v1468_v42, %s5730_s23 }
 0x520   : > { %1739 = vrot.lane.b32.xlu1 %v1468_v42, %s5731_s24 }
 0x523   : > { %2187 = vrot.lane.b32.xlu0 %v6326_v50, %s5729_s20 }
 0x524   : > { %1743 = vrot.lane.b32.xlu1 %v1476_v41, %s5731_s24 }
 0x527   : > { %2647 = vrot.lane.b32.xlu0 %v6326_v50, %s5730_s23 }
 0x528   : > { %1953 = vrot.lane.b32.xlu1 %v6317_v39, %s5733_s26 }
 0x52b   : > { %2181 = vrot.lane.b32.xlu0 %v6298_v33, %s5729_s20 }
 0x52c   : > { %1957 = vrot.lane.b32.xlu1 %v6326_v50, %s5733_s26 }
 0x52f   : > { %3257 = vrot.lane.b32.xlu0 %v6358_v43, %s5727_s19 }
 0x530   : > { %1969 = vrot.lane.b32.xlu1 %v1468_v42, %s5733_s26 }
 0x533   : > { %3717 = vrot.lane.b32.xlu0 %v6358_v43, %s5733_s26 }
 0x534   : > { %1973 = vrot.lane.b32.xlu1 %v1476_v41, %s5733_s26 }
 0x536   : > { %v1490_v55 = vpop.permute.xlu1 %1489 }
 0x537   : > { %1537 = vst.msk [vmem:[#allocation6 + $0x1] sm:$0x1] %vm1306_vm11, %v1490_v55  ;;  %4177 = vrot.lane.b32.xlu0 %v6358_v43, %s5732_s25 }
 0x538   : > { %2433 = vrot.lane.b32.xlu1 %v1476_v41, %s5732_s25 }
 0x539   : > { %v2196_v57 = vpop.permute.xlu0 %2195 }
 0x53a   : > { %2235 = vst.msk [vmem:[#allocation6 + $0x84] sm:$0x1] %vm1306_vm11, %v2196_v57  ;;  %v1506_v24 = vpop.permute.xlu1 %1505 }
 0x53b   : > { %4637 = vrot.lane.b32.xlu0 %v6358_v43, %s5726_s18  ;;  %1545 = vst.msk [vmem:[#allocation6 + $0x81] sm:$0x1] %vm1306_vm11, %v1506_v24 }
 0x53c   : > { %2893 = vrot.lane.b32.xlu1 %v1476_v41, %s5726_s18 }
 0x53d   : > { %v2656_v44 = vpop.permute.xlu0 %2655 }
 0x53e   : > { %2695 = vst.msk [vmem:[#allocation6 + $0x86] sm:$0x1] %vm1306_vm11, %v2656_v44  ;;  %v1720_v3 = vpop.permute.xlu1 %1719 }
 0x53f   : > { %3481 = vrot.lane.b32.xlu0 %v6377_v25, %s5731_s24  ;;  %1767 = vst.msk [vmem:[#allocation6 + $0x2] sm:$0x1] %vm1306_vm11, %v1720_v3 }
 0x540   : > { %2197 = vrot.lane.b32.xlu1 %v1464_v29, %s5729_s20 }
 0x541   : > { %v2410_v46 = vpop.permute.xlu0 %2409 }
 0x542   : > { %2457 = vst.msk [vmem:[#allocation6 + $0x5] sm:$0x1] %vm1306_vm11, %v2410_v46  ;;  %v1736_v47 = vpop.permute.xlu1 %1735 }
 0x543   : > { %3941 = vrot.lane.b32.xlu0 %v6377_v25, %s5729_s20  ;;  %1775 = vst.msk [vmem:[#allocation6 + $0x82] sm:$0x1] %vm1306_vm11, %v1736_v47  ;;  %v6527_v47 = vrot.slane %v6127_v1, %v5810_v5 }
 0x544   : > { %2657 = vrot.lane.b32.xlu1 %v1464_v29, %s5730_s23  ;;  %v6487_v29 = vrot.slane %v6140_v8, %v5810_v5 }
 0x545   : > { %v2870_v49 = vpop.permute.xlu0 %2869 }
 0x546   : > { %2917 = vst.msk [vmem:[#allocation6 + $0x7] sm:$0x1] %vm1306_vm11, %v2870_v49  ;;  %v1950_v51 = vpop.permute.xlu1 %1949 }
 0x547   : > { %4401 = vrot.lane.b32.xlu0 %v6377_v25, %s5730_s23  ;;  %1997 = vst.msk [vmem:[#allocation6 + $0x3] sm:$0x1] %vm1306_vm11, %v1950_v51 }
 0x548   : > { %2429 = vrot.lane.b32.xlu1 %v1468_v42, %s5732_s25 }
 0x549   : > { %v3250_v53 = vpop.permute.xlu0 %3249 }
 0x54a   : > { %3289 = vst.msk [vmem:[#allocation6 + $0x89] sm:$0x1] %vm1306_vm11, %v3250_v53  ;;  %v1966_v56 = vpop.permute.xlu1 %1965 }
 0x54b   : > { %3253 = vrot.lane.b32.xlu0 %v6396_v52, %s5727_s19  ;;  %2005 = vst.msk [vmem:[#allocation6 + $0x83] sm:$0x1] %vm1306_vm11, %v1966_v56 }
 0x54c   : > { %2889 = vrot.lane.b32.xlu1 %v1468_v42, %s5726_s18 }
 0x54d   : > { %v3710_v58 = vpop.permute.xlu0 %3709 }
 0x54e   : > { %3749 = vst.msk [vmem:[#allocation6 + $0x8b] sm:$0x1] %vm1306_vm11, %v3710_v58  ;;  %v2180_v59 = vpop.permute.xlu1 %2179 }
 0x54f   : > { %3713 = vrot.lane.b32.xlu0 %v6396_v52, %s5733_s26  ;;  %2227 = vst.msk [vmem:[#allocation6 + $0x4] sm:$0x1] %vm1306_vm11, %v2180_v59 }
 0x550   : > { %2417 = vrot.lane.b32.xlu1 %v6326_v50, %s5732_s25 }
 0x551   : > { %v4170_v61 = vpop.permute.xlu0 %4169 }
 0x552   : > { %4209 = vst.msk [vmem:[#allocation6 + $0x8d] sm:$0x1] %vm1306_vm11, %v4170_v61  ;;  %v2426_v63 = vpop.permute.xlu1 %2425 }
 0x553   : > { %4173 = vrot.lane.b32.xlu0 %v6396_v52, %s5732_s25  ;;  %2465 = vst.msk [vmem:[#allocation6 + $0x85] sm:$0x1] %vm1306_vm11, %v2426_v63 }
 0x554   : > { %2877 = vrot.lane.b32.xlu1 %v6326_v50, %s5726_s18 }
 0x555   : > { %v4630_v2 = vpop.permute.xlu0 %4629 }
 0x556   : > { %4669 = vst.msk [vmem:[#allocation6 + $0x8f] sm:$0x1] %vm1306_vm11, %v4630_v2  ;;  %v2886_v4 = vpop.permute.xlu1 %2885 }
 0x557   : > { %4633 = vrot.lane.b32.xlu0 %v6396_v52, %s5726_s18  ;;  %2925 = vst.msk [vmem:[#allocation6 + $0x87] sm:$0x1] %vm1306_vm11, %v2886_v4 }
 0x558   : > { %2411 = vrot.lane.b32.xlu1 %v6298_v33, %s5732_s25 }
 0x559   : > { %v3464_v48 = vpop.permute.xlu0 %3463 }
 0x55a   : > { %3511 = vst.msk [vmem:[#allocation6 + $0xa] sm:$0x1] %vm1306_vm11, %v3464_v48  ;;  %v2640_v9 = vpop.permute.xlu1 %2639 }
 0x55b   : > { %3241 = vrot.lane.b32.xlu0 %v6423_v6, %s5727_s19  ;;  %2687 = vst.msk [vmem:[#allocation6 + $0x6] sm:$0x1] %vm1306_vm11, %v2640_v9 }
 0x55c   : > { %3487 = vrot.lane.b32.xlu1 %v6358_v43, %s5731_s24 }
 0x55d   : > { %v3924_v11 = vpop.permute.xlu0 %3923 }
 0x55e   : > { %3971 = vst.msk [vmem:[#allocation6 + $0xc] sm:$0x1] %vm1306_vm11, %v3924_v11  ;;  %v3480_v60 = vpop.permute.xlu1 %3479 }
 0x55f   : > { %3701 = vrot.lane.b32.xlu0 %v6423_v6, %s5733_s26  ;;  %3519 = vst.msk [vmem:[#allocation6 + $0x8a] sm:$0x1] %vm1306_vm11, %v3480_v60 }
 0x560   : > { %3947 = vrot.lane.b32.xlu1 %v6358_v43, %s5729_s20 }
 0x561   : > { %v4384_v22 = vpop.permute.xlu0 %4383 }
 0x562   : > { %4431 = vst.msk [vmem:[#allocation6 + $0xe] sm:$0x1] %vm1306_vm11, %v4384_v22  ;;  %v3940_v0 = vpop.permute.xlu1 %3939 }
 0x563   : > { %4161 = vrot.lane.b32.xlu0 %v6423_v6, %s5732_s25  ;;  %3979 = vst.msk [vmem:[#allocation6 + $0x8c] sm:$0x1] %vm1306_vm11, %v3940_v0 }
 0x564   : > { %4407 = vrot.lane.b32.xlu1 %v6358_v43, %s5730_s23 }
 0x565   : > { %v1492_v16 = vpop.permute.xlu0 %1491 }
 0x566   : > { %1538 = vst.msk [vmem:[#allocation6 + $0x11] sm:$0x1] %vm1306_vm11, %v1492_v16  ;;  %v4400_v17 = vpop.permute.xlu1 %4399 }
 0x567   : > { %4621 = vrot.lane.b32.xlu0 %v6423_v6, %s5726_s18  ;;  %4439 = vst.msk [vmem:[#allocation6 + $0x8e] sm:$0x1] %vm1306_vm11, %v4400_v17 }
 0x568   : > { %3251 = vrot.lane.b32.xlu1 %v6377_v25, %s5727_s19 }
 0x569   : > { %v1508_v27 = vpop.permute.xlu0 %1507 }
 0x56a   : > { %1546 = vst.msk [vmem:[#allocation6 + $0x91] sm:$0x1] %vm1306_vm11, %v1508_v27  ;;  %v3234_v32 = vpop.permute.xlu1 %3233 }
 0x56b   : > { %1495 = vrot.lane.b32.xlu0 %v6457_v18, %s5727_s19  ;;  %3281 = vst.msk [vmem:[#allocation6 + $0x9] sm:$0x1] %vm1306_vm11, %v3234_v32 }
 0x56c   : > { %3711 = vrot.lane.b32.xlu1 %v6377_v25, %s5733_s26 }
 0x56d   : > { %v1722_v37 = vpop.permute.xlu0 %1721 }
 0x56e   : > { %1768 = vst.msk [vmem:[#allocation6 + $0x12] sm:$0x1] %vm1306_vm11, %v1722_v37  ;;  %v3694_v7 = vpop.permute.xlu1 %3693  ;;  %v3224_v37 = vrot.slane %v6239_v35, %v5810_v5 }
 0x56f   : > { %1499 = vrot.lane.b32.xlu0 %v6467_v34, %s5727_s19  ;;  %3741 = vst.msk [vmem:[#allocation6 + $0xb] sm:$0x1] %vm1306_vm11, %v3694_v7 }
 0x570   : > { %4171 = vrot.lane.b32.xlu1 %v6377_v25, %s5732_s25 }
 0x571   : > { %v1738_v40 = vpop.permute.xlu0 %1737 }
 0x572   : > { %1776 = vst.msk [vmem:[#allocation6 + $0x92] sm:$0x1] %vm1306_vm11, %v1738_v40  ;;  %v4154_v45 = vpop.permute.xlu1 %4153 }
 0x573   : > { %1511 = vrot.lane.b32.xlu0 %v6477_v30, %s5727_s19  ;;  %4201 = vst.msk [vmem:[#allocation6 + $0xd] sm:$0x1] %vm1306_vm11, %v4154_v45 }
 0x574   : > { %4631 = vrot.lane.b32.xlu1 %v6377_v25, %s5726_s18 }
 0x575   : > { %v1952_v41 = vpop.permute.xlu0 %1951 }
 0x576   : > { %1998 = vst.msk [vmem:[#allocation6 + $0x13] sm:$0x1] %vm1306_vm11, %v1952_v41  ;;  %v4614_v13 = vpop.permute.xlu1 %4613 }
 0x577   : > { %1515 = vrot.lane.b32.xlu0 %v6487_v29, %s5727_s19  ;;  %4661 = vst.msk [vmem:[#allocation6 + $0xf] sm:$0x1] %vm1306_vm11, %v4614_v13 }
 0x578   : > { %3483 = vrot.lane.b32.xlu1 %v6396_v52, %s5731_s24 }
 0x579   : > { %v1968_v50 = vpop.permute.xlu0 %1967 }
 0x57a   : > { %2006 = vst.msk [vmem:[#allocation6 + $0x93] sm:$0x1] %vm1306_vm11, %v1968_v50  ;;  %v1494_v42 = vpop.permute.xlu1 %1493 }
 0x57b   : > { %1725 = vrot.lane.b32.xlu0 %v6457_v18, %s5731_s24  ;;  %1539 = vst.msk [vmem:[#allocation6 + $0x21] sm:$0x1] %vm1306_vm11, %v1494_v42 }
 0x57c   : > { %3943 = vrot.lane.b32.xlu1 %v6396_v52, %s5729_s20 }
 0x57d   : > { %v2204_v8 = vpop.permute.xlu0 %2203 }
 0x57e   : > { %2239 = vst.msk [vmem:[#allocation6 + $0xc4] sm:$0x1] %vm1306_vm11, %v2204_v8  ;;  %v1498_v43 = vpop.permute.xlu1 %1497 }
 0x57f   : > { %1729 = vrot.lane.b32.xlu0 %v6467_v34, %s5731_s24  ;;  %1541 = vst.msk [vmem:[#allocation6 + $0x41] sm:$0x1] %vm1306_vm11, %v1498_v43 }
 0x580   : > { %4403 = vrot.lane.b32.xlu1 %v6396_v52, %s5730_s23  ;;  %v1484_v52 = vrot.slane %v6164_v62, %v5810_v5 }
 0x581   : > { %v2664_v55 = vpop.permute.xlu0 %2663 }
 0x582   : > { %2699 = vst.msk [vmem:[#allocation6 + $0xc6] sm:$0x1] %vm1306_vm11, %v2664_v55  ;;  %v1510_v57 = vpop.permute.xlu1 %1509 }
 0x583   : > { %1741 = vrot.lane.b32.xlu0 %v6477_v30, %s5731_s24  ;;  %1547 = vst.msk [vmem:[#allocation6 + $0xa1] sm:$0x1] %vm1306_vm11, %v1510_v57 }
 0x584   : > { %3471 = vrot.lane.b32.xlu1 %v6423_v6, %s5731_s24 }
 0x585   : > { %v2428_v24 = vpop.permute.xlu0 %2427 }
 0x586   : > { %2466 = vst.msk [vmem:[#allocation6 + $0x95] sm:$0x1] %vm1306_vm11, %v2428_v24  ;;  %v1514_v25 = vpop.permute.xlu1 %1513  ;;  %v3216_v24 = vrot.slane %v6251_v38, %v5810_v5 }
 0x587   : > { %1745 = vrot.lane.b32.xlu0 %v6487_v29, %s5731_s24  ;;  %1549 = vst.msk [vmem:[#allocation6 + $0xc1] sm:$0x1] %vm1306_vm11, %v1514_v25 }
 0x588   : > { %3931 = vrot.lane.b32.xlu1 %v6423_v6, %s5729_s20 }
 0x589   : > { %v2888_v44 = vpop.permute.xlu0 %2887 }
 0x58a   : > { %2926 = vst.msk [vmem:[#allocation6 + $0x97] sm:$0x1] %vm1306_vm11, %v2888_v44  ;;  %v1724_v3 = vpop.permute.xlu1 %1723 }
 0x58b   : > { %1955 = vrot.lane.b32.xlu0 %v6457_v18, %s5733_s26  ;;  %1769 = vst.msk [vmem:[#allocation6 + $0x22] sm:$0x1] %vm1306_vm11, %v1724_v3 }
 0x58c   : > { %4391 = vrot.lane.b32.xlu1 %v6423_v6, %s5730_s23 }
 0x58d   : > { %v2200_v46 = vpop.permute.xlu0 %2199 }
 0x58e   : > { %2237 = vst.msk [vmem:[#allocation6 + $0xa4] sm:$0x1] %vm1306_vm11, %v2200_v46  ;;  %v1728_v49 = vpop.permute.xlu1 %1727 }
 0x58f   : > { %1959 = vrot.lane.b32.xlu0 %v6467_v34, %s5733_s26  ;;  %1771 = vst.msk [vmem:[#allocation6 + $0x42] sm:$0x1] %vm1306_vm11, %v1728_v49 }
 0x590   : > { %1501 = vrot.lane.b32.xlu1 %v6527_v47, %s5727_s19 }
 0x591   : > { %v2660_v51 = vpop.permute.xlu0 %2659 }
 0x592   : > { %2697 = vst.msk [vmem:[#allocation6 + $0xa6] sm:$0x1] %vm1306_vm11, %v2660_v51  ;;  %v1740_v53 = vpop.permute.xlu1 %1739  ;;  %v3192_v51 = vrot.slane %v6199_v19, %v5810_v5 }
 0x593   : > { %1971 = vrot.lane.b32.xlu0 %v6477_v30, %s5733_s26  ;;  %1777 = vst.msk [vmem:[#allocation6 + $0xa2] sm:$0x1] %vm1306_vm11, %v1740_v53 }
 0x594   : > { %1517 = vrot.lane.b32.xlu1 %v1484_v52, %s5727_s19 }
 0x595   : > { %v2188_v1 = vpop.permute.xlu0 %2187 }
 0x596   : > { %2231 = vst.msk [vmem:[#allocation6 + $0x44] sm:$0x1] %vm1306_vm11, %v2188_v1  ;;  %v1744_v56 = vpop.permute.xlu1 %1743 }
 0x597   : > { %1975 = vrot.lane.b32.xlu0 %v6487_v29, %s5733_s26  ;;  %1779 = vst.msk [vmem:[#allocation6 + $0xc2] sm:$0x1] %vm1306_vm11, %v1744_v56 }
 0x598   : > { %1731 = vrot.lane.b32.xlu1 %v6527_v47, %s5731_s24 }
 0x599   : > { %v2648_v62 = vpop.permute.xlu0 %2647 }
 0x59a   : > { %2691 = vst.msk [vmem:[#allocation6 + $0x46] sm:$0x1] %vm1306_vm11, %v2648_v62  ;;  %v1954_v58 = vpop.permute.xlu1 %1953 }
 0x59b   : > { %2435 = vrot.lane.b32.xlu0 %v6487_v29, %s5732_s25  ;;  %1999 = vst.msk [vmem:[#allocation6 + $0x23] sm:$0x1] %vm1306_vm11, %v1954_v58  ;;  %v3196_v58 = vrot.slane %v6205_v23, %v5810_v5 }
 0x59c   : > { %1747 = vrot.lane.b32.xlu1 %v1484_v52, %s5731_s24 }
 0x59d   : > { %v2182_v59 = vpop.permute.xlu0 %2181 }
 0x59e   : > { %2228 = vst.msk [vmem:[#allocation6 + $0x14] sm:$0x1] %vm1306_vm11, %v2182_v59  ;;  %v1958_v61 = vpop.permute.xlu1 %1957 }
 0x59f   : > { %2895 = vrot.lane.b32.xlu0 %v6487_v29, %s5726_s18  ;;  %2001 = vst.msk [vmem:[#allocation6 + $0x43] sm:$0x1] %vm1306_vm11, %v1958_v61 }
 0x5a0   : > { %1961 = vrot.lane.b32.xlu1 %v6527_v47, %s5733_s26 }
 0x5a1   : > { %v3258_v63 = vpop.permute.xlu0 %3257 }
 0x5a2   : > { %3293 = vst.msk [vmem:[#allocation6 + $0xc9] sm:$0x1] %vm1306_vm11, %v3258_v63  ;;  %v1970_v2 = vpop.permute.xlu1 %1969 }
 0x5a3   : > { %2207 = vrot.lane.b32.xlu0 %v1484_v52, %s5729_s20  ;;  %2007 = vst.msk [vmem:[#allocation6 + $0xa3] sm:$0x1] %vm1306_vm11, %v1970_v2 }
 0x5a4   : > { %1977 = vrot.lane.b32.xlu1 %v1484_v52, %s5733_s26 }
 0x5a5   : > { %v3718_v4 = vpop.permute.xlu0 %3717 }
 0x5a6   : > { %3753 = vst.msk [vmem:[#allocation6 + $0xcb] sm:$0x1] %vm1306_vm11, %v3718_v4  ;;  %v1974_v6 = vpop.permute.xlu1 %1973 }
 0x5a7   : > { %2667 = vrot.lane.b32.xlu0 %v1484_v52, %s5730_s23  ;;  %2009 = vst.msk [vmem:[#allocation6 + $0xc3] sm:$0x1] %vm1306_vm11, %v1974_v6 }
 0x5a8   : > { %2205 = vrot.lane.b32.xlu1 %v6487_v29, %s5729_s20 }
 0x5a9   : > { %v4178_v48 = vpop.permute.xlu0 %4177 }
 0x5aa   : > { %4213 = vst.msk [vmem:[#allocation6 + $0xcd] sm:$0x1] %vm1306_vm11, %v4178_v48  ;;  %v2434_v9 = vpop.permute.xlu1 %2433 }
 0x5ab   : > { %2431 = vrot.lane.b32.xlu0 %v6477_v30, %s5732_s25  ;;  %2469 = vst.msk [vmem:[#allocation6 + $0xc5] sm:$0x1] %vm1306_vm11, %v2434_v9  ;;  %v6688_v9 = vrot.slane %v6152_v10, %v5810_v5 }
 0x5ac   : > { %2665 = vrot.lane.b32.xlu1 %v6487_v29, %s5730_s23 }
 0x5ad   : > { %v4638_v11 = vpop.permute.xlu0 %4637 }
 0x5ae   : > { %4673 = vst.msk [vmem:[#allocation6 + $0xcf] sm:$0x1] %vm1306_vm11, %v4638_v11  ;;  %v2894_v60 = vpop.permute.xlu1 %2893 }
 0x5af   : > { %2891 = vrot.lane.b32.xlu0 %v6477_v30, %s5726_s18  ;;  %2929 = vst.msk [vmem:[#allocation6 + $0xc7] sm:$0x1] %vm1306_vm11, %v2894_v60 }
 0x5b0   : > { %2437 = vrot.lane.b32.xlu1 %v1484_v52, %s5732_s25 }
 0x5b1   : > { %v3482_v12 = vpop.permute.xlu0 %3481 }
 0x5b2   : > { %3520 = vst.msk [vmem:[#allocation6 + $0x9a] sm:$0x1] %vm1306_vm11, %v3482_v12  ;;  %v2198_v54 = vpop.permute.xlu1 %2197 }
 0x5b3   : > { %2419 = vrot.lane.b32.xlu0 %v6467_v34, %s5732_s25  ;;  %2236 = vst.msk [vmem:[#allocation6 + $0x94] sm:$0x1] %vm1306_vm11, %v2198_v54  ;;  %v1488_v54 = vrot.slane %v6172_v14, %v5810_v5 }
 0x5b4   : > { %2897 = vrot.lane.b32.xlu1 %v1484_v52, %s5726_s18 }
 0x5b5   : > { %v3942_v21 = vpop.permute.xlu0 %3941 }
 0x5b6   : > { %3980 = vst.msk [vmem:[#allocation6 + $0x9c] sm:$0x1] %vm1306_vm11, %v3942_v21  ;;  %v2658_v22 = vpop.permute.xlu1 %2657  ;;  %v4966_v0 = vld [vmem:[#allocation6 + $0xc0] sm:$0xff] }
 0x5b7   : > { %2879 = vrot.lane.b32.xlu0 %v6467_v34, %s5726_s18  ;;  %2696 = vst.msk [vmem:[#allocation6 + $0x96] sm:$0x1] %vm1306_vm11, %v2658_v22  ;;  %5494 = vmatprep.mubr.msk.f32.mxu0 %vm449_vm7, %v4966_v0 }
 0x5b8   : > { %2201 = vrot.lane.b32.xlu1 %v6477_v30, %s5729_s20 }
 0x5b9   : > { %v4402_v16 = vpop.permute.xlu0 %4401 }
 0x5ba   : > { %4440 = vst.msk [vmem:[#allocation6 + $0x9e] sm:$0x1] %vm1306_vm11, %v4402_v16  ;;  %v2430_v17 = vpop.permute.xlu1 %2429 }
 0x5bb   : > { %2191 = vrot.lane.b32.xlu0 %v6527_v47, %s5729_s20  ;;  %2467 = vst.msk [vmem:[#allocation6 + $0xa5] sm:$0x1] %vm1306_vm11, %v2430_v17 }
 0x5bc   : > { %2661 = vrot.lane.b32.xlu1 %v6477_v30, %s5730_s23 }
 0x5bd   : > { %v3254_v27 = vpop.permute.xlu0 %3253 }
 0x5be   : > { %3291 = vst.msk [vmem:[#allocation6 + $0xa9] sm:$0x1] %vm1306_vm11, %v3254_v27  ;;  %v2890_v32 = vpop.permute.xlu1 %2889 }
 0x5bf   : > { %2651 = vrot.lane.b32.xlu0 %v6527_v47, %s5730_s23  ;;  %2927 = vst.msk [vmem:[#allocation6 + $0xa7] sm:$0x1] %vm1306_vm11, %v2890_v32 }
 0x5c0   : > { %2189 = vrot.lane.b32.xlu1 %v6467_v34, %s5729_s20 }
 0x5c1   : > { %v3714_v7 = vpop.permute.xlu0 %3713 }
 0x5c2   : > { %3751 = vst.msk [vmem:[#allocation6 + $0xab] sm:$0x1] %vm1306_vm11, %v3714_v7  ;;  %v2418_v40 = vpop.permute.xlu1 %2417 }
 0x5c3   : > { %3489 = vrot.lane.b32.xlu0 %v3224_v37, %s5731_s24  ;;  %2461 = vst.msk [vmem:[#allocation6 + $0x45] sm:$0x1] %vm1306_vm11, %v2418_v40 }
 0x5c4   : > { %2649 = vrot.lane.b32.xlu1 %v6467_v34, %s5730_s23  ;;  %v3228_v34 = vrot.slane %v6247_v31, %v5810_v5 }
 0x5c5   : > { %v4174_v30 = vpop.permute.xlu0 %4173 }
 0x5c6   : > { %4211 = vst.msk [vmem:[#allocation6 + $0xad] sm:$0x1] %vm1306_vm11, %v4174_v30  ;;  %v2878_v45 = vpop.permute.xlu1 %2877 }
 0x5c7   : > { %3949 = vrot.lane.b32.xlu0 %v3224_v37, %s5729_s20  ;;  %2921 = vst.msk [vmem:[#allocation6 + $0x47] sm:$0x1] %vm1306_vm11, %v2878_v45 }
 0x5c8   : > { %2421 = vrot.lane.b32.xlu1 %v6527_v47, %s5732_s25 }
 0x5c9   : > { %v4634_v35 = vpop.permute.xlu0 %4633 }
 0x5ca   : > { %4671 = vst.msk [vmem:[#allocation6 + $0xaf] sm:$0x1] %vm1306_vm11, %v4634_v35  ;;  %v2412_v29 = vpop.permute.xlu1 %2411  ;;  %v4677_v35 = vld [vmem:[%s6990_s9] sm:$0xff] }
 0x5cb   : > { %4409 = vrot.lane.b32.xlu0 %v3224_v37, %s5730_s23  ;;  %2458 = vst.msk [vmem:[#allocation6 + $0x15] sm:$0x1] %vm1306_vm11, %v2412_v29  ;;  %v4678_v29 = vld [vmem:[%s6990_s9 + $0x8] sm:$0xff] }
 0x5cc   : > { %2881 = vrot.lane.b32.xlu1 %v6527_v47, %s5726_s18 }
 0x5cd   : > { %v3242_v41 = vpop.permute.xlu0 %3241 }
 0x5ce   : > { %3285 = vst.msk [vmem:[#allocation6 + $0x49] sm:$0x1] %vm1306_vm11, %v3242_v41  ;;  %v3488_v13 = vpop.permute.xlu1 %3487  ;;  %v4690_v50 = vld [vmem:[#allocation6 + $0x40] sm:$0xff] }
 0x5cf   : > { %3261 = vrot.lane.b32.xlu0 %v3228_v34, %s5727_s19  ;;  %3523 = vst.msk [vmem:[#allocation6 + $0xca] sm:$0x1] %vm1306_vm11, %v3488_v13  ;;  %5462 = vmatprep.mubr.msk.f32.mxu1 %vm449_vm7, %v4690_v50  ;;  %v3232_v13 = vrot.slane %v6255_v36, %v5810_v5 }
 0x5d0   : > { %3259 = vrot.lane.b32.xlu1 %v3224_v37, %s5727_s19 }
 0x5d1   : > { %v3702_v42 = vpop.permute.xlu0 %3701 }
 0x5d2   : > { %3745 = vst.msk [vmem:[#allocation6 + $0x4b] sm:$0x1] %vm1306_vm11, %v3702_v42  ;;  %v3948_v8 = vpop.permute.xlu1 %3947 }
 0x5d3   : > { %3721 = vrot.lane.b32.xlu0 %v3228_v34, %s5733_s26  ;;  %3983 = vst.msk [vmem:[#allocation6 + $0xcc] sm:$0x1] %vm1306_vm11, %v3948_v8 }
 0x5d4   : > { %3719 = vrot.lane.b32.xlu1 %v3224_v37, %s5733_s26 }
 0x5d5   : > { %v4162_v31 = vpop.permute.xlu0 %4161 }
 0x5d6   : > { %4205 = vst.msk [vmem:[#allocation6 + $0x4d] sm:$0x1] %vm1306_vm11, %v4162_v31  ;;  %v4408_v43 = vpop.permute.xlu1 %4407 }
 0x5d7   : > { %4181 = vrot.lane.b32.xlu0 %v3228_v34, %s5732_s25  ;;  %4443 = vst.msk [vmem:[#allocation6 + $0xce] sm:$0x1] %vm1306_vm11, %v4408_v43 }
 0x5d8   : > { %4179 = vrot.lane.b32.xlu1 %v3224_v37, %s5732_s25 }
 0x5d9   : > { %v4622_v55 = vpop.permute.xlu0 %4621 }
 0x5da   : > { %4665 = vst.msk [vmem:[#allocation6 + $0x4f] sm:$0x1] %vm1306_vm11, %v4622_v55  ;;  %v3252_v57 = vpop.permute.xlu1 %3251 }
 0x5db   : > { %4641 = vrot.lane.b32.xlu0 %v3228_v34, %s5726_s18  ;;  %3290 = vst.msk [vmem:[#allocation6 + $0x99] sm:$0x1] %vm1306_vm11, %v3252_v57 }
 0x5dc   : > { %4639 = vrot.lane.b32.xlu1 %v3224_v37, %s5726_s18 }
 0x5dd   : > { %v1496_v25 = vpop.permute.xlu0 %1495 }
 0x5de   : > { %1540 = vst.msk [vmem:[#allocation6 + $0x31] sm:$0x1] %vm1306_vm11, %v1496_v25  ;;  %v3712_v44 = vpop.permute.xlu1 %3711  ;;  %v4967_v3 = vld [vmem:[#allocation6 + $0xc8] sm:$0xff] }
 0x5df   : > { %3485 = vrot.lane.b32.xlu0 %v3216_v24, %s5731_s24  ;;  %3750 = vst.msk [vmem:[#allocation6 + $0x9b] sm:$0x1] %vm1306_vm11, %v3712_v44  ;;  %5495 = vmatmul.mubr.msk.f32.vlgmr.msra.gmra.mrb[4].mxu0 %vm449_vm7, %v4967_v3  ;;  %v3176_v3 = vrot.slane %v6193_v15, %v5810_v5 }
 0x5e0   : > { %3491 = vrot.lane.b32.xlu1 %v3228_v34, %s5731_s24 }
 0x5e1   : > { %v1500_v46 = vpop.permute.xlu0 %1499 }
 0x5e2   : > { %1542 = vst.msk [vmem:[#allocation6 + $0x51] sm:$0x1] %vm1306_vm11, %v1500_v46  ;;  %v4172_v47 = vpop.permute.xlu1 %4171 }
 0x5e3   : > { %3945 = vrot.lane.b32.xlu0 %v3216_v24, %s5729_s20  ;;  %4210 = vst.msk [vmem:[#allocation6 + $0x9d] sm:$0x1] %vm1306_vm11, %v4172_v47 }
 0x5e4   : > { %3951 = vrot.lane.b32.xlu1 %v3228_v34, %s5729_s20 }
 0x5e5   : > { %v1512_v38 = vpop.permute.xlu0 %1511 }
 0x5e6   : > { %1548 = vst.msk [vmem:[#allocation6 + $0xb1] sm:$0x1] %vm1306_vm11, %v1512_v38  ;;  %v4632_v49 = vpop.permute.xlu1 %4631 }
 0x5e7   : > { %4405 = vrot.lane.b32.xlu0 %v3216_v24, %s5730_s23  ;;  %4670 = vst.msk [vmem:[#allocation6 + $0x9f] sm:$0x1] %vm1306_vm11, %v4632_v49 }
 0x5e8   : > { %4411 = vrot.lane.b32.xlu1 %v3228_v34, %s5730_s23  ;;  %v5566_v34 = vpack.c.bf16 %v4678_v29, %v4677_v35 }
 0x5e9   : > { %v1516_v52 = vpop.permute.xlu0 %1515 }
 0x5ea   : > { %1550 = vst.msk [vmem:[#allocation6 + $0xd1] sm:$0x1] %vm1306_vm11, %v1516_v52  ;;  %v3484_v53 = vpop.permute.xlu1 %3483  ;;  %5575 = vmatprep.subr.bf16.mxu0 %v5566_v34  ;;  %5567 = vmatprep.subr.bf16.mxu1 %v5566_v34 }
 0x5eb   : > { %3473 = vrot.lane.b32.xlu0 %v3192_v51, %s5731_s24  ;;  %3521 = vst.msk [vmem:[#allocation6 + $0xaa] sm:$0x1] %vm1306_vm11, %v3484_v53  ;;  %5577 = vmatpush3.bf16.msra.mxu0 %v5566_v34 }
 0x5ec   : > { %3255 = vrot.lane.b32.xlu1 %v3216_v24, %s5727_s19 }
 0x5ed   : > { %v1726_v1 = vpop.permute.xlu0 %1725 }
 0x5ee   : > { %1770 = vst.msk [vmem:[#allocation6 + $0x32] sm:$0x1] %vm1306_vm11, %v1726_v1  ;;  %v3944_v56 = vpop.permute.xlu1 %3943 }
 0x5ef   : > { %3933 = vrot.lane.b32.xlu0 %v3192_v51, %s5729_s20  ;;  %3981 = vst.msk [vmem:[#allocation6 + $0xac] sm:$0x1] %vm1306_vm11, %v3944_v56 }
 0x5f0   : > { %3715 = vrot.lane.b32.xlu1 %v3216_v24, %s5733_s26 }
 0x5f1   : > { %v1730_v19 = vpop.permute.xlu0 %1729 }
 0x5f2   : > { %1772 = vst.msk [vmem:[#allocation6 + $0x52] sm:$0x1] %vm1306_vm11, %v1730_v19  ;;  %v4404_v62 = vpop.permute.xlu1 %4403  ;;  %v3180_v19 = vrot.slane %v6201_v20, %v5810_v5 }
 0x5f3   : > { %4393 = vrot.lane.b32.xlu0 %v3192_v51, %s5730_s23  ;;  %4441 = vst.msk [vmem:[#allocation6 + $0xae] sm:$0x1] %vm1306_vm11, %v4404_v62 }
 0x5f4   : > { %4175 = vrot.lane.b32.xlu1 %v3216_v24, %s5732_s25 }
 0x5f5   : > { %v1742_v59 = vpop.permute.xlu0 %1741 }
 0x5f6   : > { %1778 = vst.msk [vmem:[#allocation6 + $0xb2] sm:$0x1] %vm1306_vm11, %v1742_v59  ;;  %v3472_v61 = vpop.permute.xlu1 %3471 }
 0x5f7   : > { %3245 = vrot.lane.b32.xlu0 %v3196_v58, %s5727_s19  ;;  %3515 = vst.msk [vmem:[#allocation6 + $0x4a] sm:$0x1] %vm1306_vm11, %v3472_v61 }
 0x5f8   : > { %4635 = vrot.lane.b32.xlu1 %v3216_v24, %s5726_s18 }
 0x5f9   : > { %v1746_v63 = vpop.permute.xlu0 %1745 }
 0x5fa   : > { %1780 = vst.msk [vmem:[#allocation6 + $0xd2] sm:$0x1] %vm1306_vm11, %v1746_v63  ;;  %v3932_v2 = vpop.permute.xlu1 %3931 }
 0x5fb   : > { %3705 = vrot.lane.b32.xlu0 %v3196_v58, %s5733_s26  ;;  %3975 = vst.msk [vmem:[#allocation6 + $0x4c] sm:$0x1] %vm1306_vm11, %v3932_v2 }
 0x5fc   : > { %3243 = vrot.lane.b32.xlu1 %v3192_v51, %s5727_s19 }
 0x5fd   : > { %v1956_v23 = vpop.permute.xlu0 %1955 }
 0x5fe   : > { %2000 = vst.msk [vmem:[#allocation6 + $0x33] sm:$0x1] %vm1306_vm11, %v1956_v23  ;;  %v4392_v4 = vpop.permute.xlu1 %4391 }
 0x5ff   : > { %4165 = vrot.lane.b32.xlu0 %v3196_v58, %s5732_s25  ;;  %4435 = vst.msk [vmem:[#allocation6 + $0x4e] sm:$0x1] %vm1306_vm11, %v4392_v4 }
 0x600   : > { %3703 = vrot.lane.b32.xlu1 %v3192_v51, %s5733_s26 }
 0x601   : > { %v1960_v6 = vpop.permute.xlu0 %1959 }
 0x602   : > { %2002 = vst.msk [vmem:[#allocation6 + $0x53] sm:$0x1] %vm1306_vm11, %v1960_v6  ;;  %v1502_v48 = vpop.permute.xlu1 %1501 }
 0x603   : > { %4625 = vrot.lane.b32.xlu0 %v3196_v58, %s5726_s18  ;;  %1543 = vst.msk [vmem:[#allocation6 + $0x61] sm:$0x1] %vm1306_vm11, %v1502_v48 }
 0x604   : > { %4163 = vrot.lane.b32.xlu1 %v3192_v51, %s5732_s25 }
 0x605   : > { %v1972_v11 = vpop.permute.xlu0 %1971 }
 0x606   : > { %2008 = vst.msk [vmem:[#allocation6 + $0xb3] sm:$0x1] %vm1306_vm11, %v1972_v11  ;;  %v1518_v60 = vpop.permute.xlu1 %1517  ;;  %v4691_v12 = vld [vmem:[#allocation6 + $0x48] sm:$0xff] }
 0x607   : > { %1503 = vrot.lane.b32.xlu0 %v6688_v9, %s5727_s19  ;;  %1551 = vst.msk [vmem:[#allocation6 + $0xe1] sm:$0x1] %vm1306_vm11, %v1518_v60  ;;  %5463 = vmatmul.mubr.msk.f32.vlgmr.msra.gmra.mrb[4].mxu1 %vm449_vm7, %v4691_v12 }
 0x608   : > { %4623 = vrot.lane.b32.xlu1 %v3192_v51, %s5726_s18  ;;  %5569 = vmatpush3.bf16.msra.mxu1 %v5566_v34 }
 0x609   : > { %v1976_v21 = vpop.permute.xlu0 %1975 }
 0x60a   : > { %2010 = vst.msk [vmem:[#allocation6 + $0xd3] sm:$0x1] %vm1306_vm11, %v1976_v21  ;;  %v1732_v10 = vpop.permute.xlu1 %1731 }
 0x60b   : > { %1519 = vrot.lane.b32.xlu0 %v1488_v54, %s5727_s19  ;;  %1773 = vst.msk [vmem:[#allocation6 + $0x62] sm:$0x1] %vm1306_vm11, %v1732_v10 }
 0x60c   : > { %3475 = vrot.lane.b32.xlu1 %v3196_v58, %s5731_s24 }
 0x60d   : > { %v2436_v22 = vpop.permute.xlu0 %2435 }
 0x60e   : > { %2470 = vst.msk [vmem:[#allocation6 + $0xd5] sm:$0x1] %vm1306_vm11, %v2436_v22  ;;  %v1748_v0 = vpop.permute.xlu1 %1747 }
 0x60f   : > { %1733 = vrot.lane.b32.xlu0 %v6688_v9, %s5731_s24  ;;  %1781 = vst.msk [vmem:[#allocation6 + $0xe2] sm:$0x1] %vm1306_vm11, %v1748_v0 }
 0x610   : > { %3935 = vrot.lane.b32.xlu1 %v3196_v58, %s5729_s20 }
 0x611   : > { %v2896_v14 = vpop.permute.xlu0 %2895 }
 0x612   : > { %2930 = vst.msk [vmem:[#allocation6 + $0xd7] sm:$0x1] %vm1306_vm11, %v2896_v14  ;;  %v1962_v16 = vpop.permute.xlu1 %1961 }
 0x613   : > { %1749 = vrot.lane.b32.xlu0 %v1488_v54, %s5731_s24  ;;  %2003 = vst.msk [vmem:[#allocation6 + $0x63] sm:$0x1] %vm1306_vm11, %v1962_v16  ;;  %v3184_v16 = vrot.slane %v6209_v26, %v5810_v5 }
 0x614   : > { %4395 = vrot.lane.b32.xlu1 %v3196_v58, %s5730_s23 }
 0x615   : > { %v2208_v17 = vpop.permute.xlu0 %2207 }
 0x616   : > { %2241 = vst.msk [vmem:[#allocation6 + $0xe4] sm:$0x1] %vm1306_vm11, %v2208_v17  ;;  %v1978_v27 = vpop.permute.xlu1 %1977 }
 0x617   : > { %1963 = vrot.lane.b32.xlu0 %v6688_v9, %s5733_s26  ;;  %2011 = vst.msk [vmem:[#allocation6 + $0xe3] sm:$0x1] %vm1306_vm11, %v1978_v27 }
 0x618   : > { %2209 = vrot.lane.b32.xlu1 %v1488_v54, %s5729_s20 }
 0x619   : > { %v2668_v32 = vpop.permute.xlu0 %2667 }
 0x61a   : > { %2701 = vst.msk [vmem:[#allocation6 + $0xe6] sm:$0x1] %vm1306_vm11, %v2668_v32  ;;  %v2206_v37 = vpop.permute.xlu1 %2205 }
 0x61b   : > { %1979 = vrot.lane.b32.xlu0 %v1488_v54, %s5733_s26  ;;  %2240 = vst.msk [vmem:[#allocation6 + $0xd4] sm:$0x1] %vm1306_vm11, %v2206_v37 }
 0x61c   : > { %2669 = vrot.lane.b32.xlu1 %v1488_v54, %s5730_s23 }
 0x61d   : > { %v2432_v7 = vpop.permute.xlu0 %2431 }
 0x61e   : > { %2468 = vst.msk [vmem:[#allocation6 + $0xb5] sm:$0x1] %vm1306_vm11, %v2432_v7  ;;  %v2666_v40 = vpop.permute.xlu1 %2665 }
 0x61f   : > { %2439 = vrot.lane.b32.xlu0 %v1488_v54, %s5732_s25  ;;  %2700 = vst.msk [vmem:[#allocation6 + $0xd6] sm:$0x1] %vm1306_vm11, %v2666_v40 }
 0x620   : > { %2193 = vrot.lane.b32.xlu1 %v6688_v9, %s5729_s20 }
 0x621   : > { %v2892_v30 = vpop.permute.xlu0 %2891 }
 0x622   : > { %2928 = vst.msk [vmem:[#allocation6 + $0xb7] sm:$0x1] %vm1306_vm11, %v2892_v30  ;;  %v2438_v45 = vpop.permute.xlu1 %2437 }
 0x623   : > { %2899 = vrot.lane.b32.xlu0 %v1488_v54, %s5726_s18  ;;  %2471 = vst.msk [vmem:[#allocation6 + $0xe5] sm:$0x1] %vm1306_vm11, %v2438_v45 }
 0x624   : > { %2653 = vrot.lane.b32.xlu1 %v6688_v9, %s5730_s23 }
 0x625   : > { %v2420_v41 = vpop.permute.xlu0 %2419 }
 0x626   : > { %2462 = vst.msk [vmem:[#allocation6 + $0x55] sm:$0x1] %vm1306_vm11, %v2420_v41  ;;  %v2898_v50 = vpop.permute.xlu1 %2897  ;;  %v4968_v42 = vld [vmem:[#allocation6 + $0xd0] sm:$0xff] }
 0x627   : > { %2423 = vrot.lane.b32.xlu0 %v6688_v9, %s5732_s25  ;;  %2931 = vst.msk [vmem:[#allocation6 + $0xe7] sm:$0x1] %vm1306_vm11, %v2898_v50  ;;  %5497 = vmatprep.mubr.msk.f32.mxu0 %vm449_vm7, %v4968_v42 }
 0x628   : > { %3263 = vrot.lane.b32.xlu1 %v3232_v13, %s5727_s19 }
 0x629   : > { %v2880_v8 = vpop.permute.xlu0 %2879 }
 0x62a   : > { %2922 = vst.msk [vmem:[#allocation6 + $0x57] sm:$0x1] %vm1306_vm11, %v2880_v8  ;;  %v2202_v31 = vpop.permute.xlu1 %2201 }
 0x62b   : > { %2883 = vrot.lane.b32.xlu0 %v6688_v9, %s5726_s18  ;;  %2238 = vst.msk [vmem:[#allocation6 + $0xb4] sm:$0x1] %vm1306_vm11, %v2202_v31  ;;  %v3200_v9 = vrot.slane %v6220_v28, %v5810_v5 }
 0x62c   : > { %3723 = vrot.lane.b32.xlu1 %v3232_v13, %s5733_s26 }
 0x62d   : > { %v2192_v36 = vpop.permute.xlu0 %2191 }
 0x62e   : > { %2233 = vst.msk [vmem:[#allocation6 + $0x64] sm:$0x1] %vm1306_vm11, %v2192_v36  ;;  %v2662_v43 = vpop.permute.xlu1 %2661  ;;  %v4970_v2 = vld [vmem:[#allocation6 + $0xe0] sm:$0xff] }
 0x62f   : > { %3493 = vrot.lane.b32.xlu0 %v3232_v13, %s5731_s24  ;;  %2698 = vst.msk [vmem:[#allocation6 + $0xb6] sm:$0x1] %vm1306_vm11, %v2662_v43 }
 0x630   : > { %4183 = vrot.lane.b32.xlu1 %v3232_v13, %s5732_s25 }
 0x631   : > { %v2652_v55 = vpop.permute.xlu0 %2651 }
 0x632   : > { %2693 = vst.msk [vmem:[#allocation6 + $0x66] sm:$0x1] %vm1306_vm11, %v2652_v55  ;;  %v2190_v57 = vpop.permute.xlu1 %2189 }
 0x633   : > { %3953 = vrot.lane.b32.xlu0 %v3232_v13, %s5729_s20  ;;  %2232 = vst.msk [vmem:[#allocation6 + $0x54] sm:$0x1] %vm1306_vm11, %v2190_v57 }
 0x634   : > { %4643 = vrot.lane.b32.xlu1 %v3232_v13, %s5726_s18 }
 0x635   : > { %v3490_v24 = vpop.permute.xlu0 %3489 }
 0x636   : > { %3524 = vst.msk [vmem:[#allocation6 + $0xda] sm:$0x1] %vm1306_vm11, %v3490_v24  ;;  %v2650_v25 = vpop.permute.xlu1 %2649 }
 0x637   : > { %4413 = vrot.lane.b32.xlu0 %v3232_v13, %s5730_s23  ;;  %2692 = vst.msk [vmem:[#allocation6 + $0x56] sm:$0x1] %vm1306_vm11, %v2650_v25 }
 0x638   : > { %2871 = vrot.lane.b32.xlu1 %v6298_v33, %s5726_s18 }
 0x639   : > { %v3950_v44 = vpop.permute.xlu0 %3949 }
 0x63a   : > { %3984 = vst.msk [vmem:[#allocation6 + $0xdc] sm:$0x1] %vm1306_vm11, %v3950_v44  ;;  %v2422_v46 = vpop.permute.xlu1 %2421 }
 0x63b   : > { %2641 = vrot.lane.b32.xlu0 %v6298_v33, %s5730_s23  ;;  %2463 = vst.msk [vmem:[#allocation6 + $0x65] sm:$0x1] %vm1306_vm11, %v2422_v46 }
 0x63c   : > { %3465 = vrot.lane.b32.xlu1 %v3176_v3, %s5731_s24 }
 0x63d   : > { %v4410_v47 = vpop.permute.xlu0 %4409 }
 0x63e   : > { %4444 = vst.msk [vmem:[#allocation6 + $0xde] sm:$0x1] %vm1306_vm11, %v4410_v47  ;;  %v2882_v38 = vpop.permute.xlu1 %2881  ;;  %v4692_v49 = vld [vmem:[#allocation6 + $0x50] sm:$0xff] }
 0x63f   : > { %3235 = vrot.lane.b32.xlu0 %v3176_v3, %s5727_s19  ;;  %2923 = vst.msk [vmem:[#allocation6 + $0x67] sm:$0x1] %vm1306_vm11, %v2882_v38  ;;  %5465 = vmatprep.mubr.msk.f32.mxu1 %vm449_vm7, %v4692_v49 }
 0x640   : > { %3925 = vrot.lane.b32.xlu1 %v3176_v3, %s5729_s20 }
 0x641   : > { %v3262_v15 = vpop.permute.xlu0 %3261 }
 0x642   : > { %3295 = vst.msk [vmem:[#allocation6 + $0xe9] sm:$0x1] %vm1306_vm11, %v3262_v15  ;;  %v3260_v33 = vpop.permute.xlu1 %3259 }
 0x643   : > { %3695 = vrot.lane.b32.xlu0 %v3176_v3, %s5733_s26  ;;  %3294 = vst.msk [vmem:[#allocation6 + $0xd9] sm:$0x1] %vm1306_vm11, %v3260_v33 }
 0x644   : > { %4385 = vrot.lane.b32.xlu1 %v3176_v3, %s5730_s23 }
 0x645   : > { %v3722_v51 = vpop.permute.xlu0 %3721 }
 0x646   : > { %3755 = vst.msk [vmem:[#allocation6 + $0xeb] sm:$0x1] %vm1306_vm11, %v3722_v51  ;;  %v3720_v52 = vpop.permute.xlu1 %3719  ;;  %v4694_v30 = vld [vmem:[#allocation6 + $0x60] sm:$0xff] }
 0x647   : > { %4155 = vrot.lane.b32.xlu0 %v3176_v3, %s5732_s25  ;;  %3754 = vst.msk [vmem:[#allocation6 + $0xdb] sm:$0x1] %vm1306_vm11, %v3720_v52 }
 0x648   : > { %2183 = vrot.lane.b32.xlu1 %v6317_v39, %s5729_s20 }
 0x649   : > { %v4182_v53 = vpop.permute.xlu0 %4181 }
 0x64a   : > { %4215 = vst.msk [vmem:[#allocation6 + $0xed] sm:$0x1] %vm1306_vm11, %v4182_v53  ;;  %v4180_v1 = vpop.permute.xlu1 %4179 }
 0x64b   : > { %4615 = vrot.lane.b32.xlu0 %v3176_v3, %s5726_s18  ;;  %4214 = vst.msk [vmem:[#allocation6 + $0xdd] sm:$0x1] %vm1306_vm11, %v4180_v1  ;;  %v4957_v1 = vld [vmem:[#allocation6 + $0x80] sm:$0xff] }
 0x64c   : > { %2643 = vrot.lane.b32.xlu1 %v6317_v39, %s5730_s23 }
 0x64d   : > { %v4642_v56 = vpop.permute.xlu0 %4641 }
 0x64e   : > { %4675 = vst.msk [vmem:[#allocation6 + $0xef] sm:$0x1] %vm1306_vm11, %v4642_v56  ;;  %v4640_v62 = vpop.permute.xlu1 %4639 }
 0x64f   : > { %2413 = vrot.lane.b32.xlu0 %v6317_v39, %s5732_s25  ;;  %4674 = vst.msk [vmem:[#allocation6 + $0xdf] sm:$0x1] %vm1306_vm11, %v4640_v62  ;;  %v4958_v62 = vld [vmem:[#allocation6 + $0x88] sm:$0xff] }
 0x650   : > { %3237 = vrot.lane.b32.xlu1 %v3180_v19, %s5727_s19 }
 0x651   : > { %v3486_v58 = vpop.permute.xlu0 %3485 }
 0x652   : > { %3522 = vst.msk [vmem:[#allocation6 + $0xba] sm:$0x1] %vm1306_vm11, %v3486_v58  ;;  %v3492_v59 = vpop.permute.xlu1 %3491  ;;  %v4959_v58 = vld [vmem:[#allocation6 + $0x90] sm:$0xff] }
 0x653   : > { %2873 = vrot.lane.b32.xlu0 %v6317_v39, %s5726_s18  ;;  %3525 = vst.msk [vmem:[#allocation6 + $0xea] sm:$0x1] %vm1306_vm11, %v3492_v59 }
 0x654   : > { %3697 = vrot.lane.b32.xlu1 %v3180_v19, %s5733_s26 }
 0x655   : > { %v3946_v20 = vpop.permute.xlu0 %3945 }
 0x656   : > { %3982 = vst.msk [vmem:[#allocation6 + $0xbc] sm:$0x1] %vm1306_vm11, %v3946_v20  ;;  %v3952_v61 = vpop.permute.xlu1 %3951  ;;  %v4969_v63 = vld [vmem:[#allocation6 + $0xd8] sm:$0xff] }
 0x657   : > { %3467 = vrot.lane.b32.xlu0 %v3180_v19, %s5731_s24  ;;  %3985 = vst.msk [vmem:[#allocation6 + $0xec] sm:$0x1] %vm1306_vm11, %v3952_v61  ;;  %5498 = vmatmul.mubr.msk.f32.gmra.mrb[6].mxu0 %vm449_vm7, %v4969_v63  ;;  %v4960_v61 = vld [vmem:[#allocation6 + $0x98] sm:$0xff]  ;;  %v4961_v63 = vld [vmem:[#allocation6 + $0xa0] sm:$0xff] }
 0x658   : > { %5500 = vmatprep.mubr.msk.f32.mxu0 %vm449_vm7, %v4970_v2  ;;  %4157 = vrot.lane.b32.xlu1 %v3180_v19, %s5732_s25 }
 0x659   : > { %v4406_v39 = vpop.permute.xlu0 %4405 }
 0x65a   : > { %4442 = vst.msk [vmem:[#allocation6 + $0xbe] sm:$0x1] %vm1306_vm11, %v4406_v39  ;;  %v4412_v23 = vpop.permute.xlu1 %4411 }
 0x65b   : > { %3927 = vrot.lane.b32.xlu0 %v3180_v19, %s5729_s20  ;;  %4445 = vst.msk [vmem:[#allocation6 + $0xee] sm:$0x1] %vm1306_vm11, %v4412_v23  ;;  %v4962_v23 = vld [vmem:[#allocation6 + $0xa8] sm:$0xff] }
 0x65c   : > { %4617 = vrot.lane.b32.xlu1 %v3180_v19, %s5726_s18 }
 0x65d   : > { %v3474_v4 = vpop.permute.xlu0 %3473 }
 0x65e   : > { %3516 = vst.msk [vmem:[#allocation6 + $0x5a] sm:$0x1] %vm1306_vm11, %v3474_v4  ;;  %v3256_v6 = vpop.permute.xlu1 %3255  ;;  %v4963_v4 = vld [vmem:[#allocation6 + $0xb0] sm:$0xff] }
 0x65f   : > { %4387 = vrot.lane.b32.xlu0 %v3180_v19, %s5730_s23  ;;  %3292 = vst.msk [vmem:[#allocation6 + $0xb9] sm:$0x1] %vm1306_vm11, %v3256_v6 }
 0x660   : > { %2415 = vrot.lane.b32.xlu1 %v6457_v18, %s5732_s25 }
 0x661   : > { %v3934_v48 = vpop.permute.xlu0 %3933 }
 0x662   : > { %3976 = vst.msk [vmem:[#allocation6 + $0x5c] sm:$0x1] %vm1306_vm11, %v3934_v48  ;;  %v3716_v11 = vpop.permute.xlu1 %3715  ;;  %v4971_v60 = vld [vmem:[#allocation6 + $0xe8] sm:$0xff] }
 0x663   : > { %2185 = vrot.lane.b32.xlu0 %v6457_v18, %s5729_s20  ;;  %3752 = vst.msk [vmem:[#allocation6 + $0xbb] sm:$0x1] %vm1306_vm11, %v3716_v11  ;;  %5501 = vmatmul.mubr.msk.f32.gmra.mrb[8].mxu0 %vm449_vm7, %v4971_v60 }
 0x664   : > { %3247 = vrot.lane.b32.xlu1 %v3200_v9, %s5727_s19 }
 0x665   : > { %v4394_v12 = vpop.permute.xlu0 %4393 }
 0x666   : > { %4436 = vst.msk [vmem:[#allocation6 + $0x5e] sm:$0x1] %vm1306_vm11, %v4394_v12  ;;  %v4176_v54 = vpop.permute.xlu1 %4175 }
 0x667   : > { %2645 = vrot.lane.b32.xlu0 %v6457_v18, %s5730_s23  ;;  %4212 = vst.msk [vmem:[#allocation6 + $0xbd] sm:$0x1] %vm1306_vm11, %v4176_v54 }
 0x668   : > { %3707 = vrot.lane.b32.xlu1 %v3200_v9, %s5733_s26 }
 0x669   : > { %v3246_v28 = vpop.permute.xlu0 %3245 }
 0x66a   : > { %3287 = vst.msk [vmem:[#allocation6 + $0x69] sm:$0x1] %vm1306_vm11, %v3246_v28  ;;  %v4636_v21 = vpop.permute.xlu1 %4635 }
 0x66b   : > { %3477 = vrot.lane.b32.xlu0 %v3200_v9, %s5731_s24  ;;  %4672 = vst.msk [vmem:[#allocation6 + $0xbf] sm:$0x1] %vm1306_vm11, %v4636_v21 }
 0x66c   : > { %4167 = vrot.lane.b32.xlu1 %v3200_v9, %s5732_s25 }
 0x66d   : > { %v3706_v10 = vpop.permute.xlu0 %3705 }
 0x66e   : > { %3747 = vst.msk [vmem:[#allocation6 + $0x6b] sm:$0x1] %vm1306_vm11, %v3706_v10  ;;  %v3244_v22 = vpop.permute.xlu1 %3243 }
 0x66f   : > { %3937 = vrot.lane.b32.xlu0 %v3200_v9, %s5729_s20  ;;  %3286 = vst.msk [vmem:[#allocation6 + $0x59] sm:$0x1] %vm1306_vm11, %v3244_v22 }
 0x670   : > { %4627 = vrot.lane.b32.xlu1 %v3200_v9, %s5726_s18 }
 0x671   : > { %v4166_v0 = vpop.permute.xlu0 %4165 }
 0x672   : > { %4207 = vst.msk [vmem:[#allocation6 + $0x6d] sm:$0x1] %vm1306_vm11, %v4166_v0  ;;  %v3704_v14 = vpop.permute.xlu1 %3703 }
 0x673   : > { %4397 = vrot.lane.b32.xlu0 %v3200_v9, %s5730_s23  ;;  %3746 = vst.msk [vmem:[#allocation6 + $0x5b] sm:$0x1] %vm1306_vm11, %v3704_v14  ;;  %v4964_v9 = vld [vmem:[#allocation6 + $0xb8] sm:$0xff] }
 0x674   : > { %2875 = vrot.lane.b32.xlu1 %v6457_v18, %s5726_s18 }
 0x675   : > { %v4626_v17 = vpop.permute.xlu0 %4625 }
 0x676   : > { %4667 = vst.msk [vmem:[#allocation6 + $0x6f] sm:$0x1] %vm1306_vm11, %v4626_v17  ;;  %v4164_v27 = vpop.permute.xlu1 %4163 }
 0x677   : > { %3239 = vrot.lane.b32.xlu0 %v3184_v16, %s5727_s19  ;;  %4206 = vst.msk [vmem:[#allocation6 + $0x5d] sm:$0x1] %vm1306_vm11, %v4164_v27 }
 0x678   : > { %3469 = vrot.lane.b32.xlu1 %v3184_v16, %s5731_s24 }
 0x679   : > { %v1504_v32 = vpop.permute.xlu0 %1503 }
 0x67a   : > { %1544 = vst.msk [vmem:[#allocation6 + $0x71] sm:$0x1] %vm1306_vm11, %v1504_v32  ;;  %v4624_v37 = vpop.permute.xlu1 %4623 }
 0x67b   : > { %3699 = vrot.lane.b32.xlu0 %v3184_v16, %s5733_s26  ;;  %4666 = vst.msk [vmem:[#allocation6 + $0x5f] sm:$0x1] %vm1306_vm11, %v4624_v37 }
 0x67c   : > { %3929 = vrot.lane.b32.xlu1 %v3184_v16, %s5729_s20 }
 0x67d   : > { %v1520_v5 = vpop.permute.xlu0 %1519 }
 0x67e   : > { %1552 = vst.msk [vmem:[#allocation6 + $0xf1] sm:$0x1] %vm1306_vm11, %v1520_v5  ;;  %v3476_v26 = vpop.permute.xlu1 %3475 }
 0x67f   : > { %4159 = vrot.lane.b32.xlu0 %v3184_v16, %s5732_s25  ;;  %3517 = vst.msk [vmem:[#allocation6 + $0x6a] sm:$0x1] %vm1306_vm11, %v3476_v26 }
 0x680   : > { %4389 = vrot.lane.b32.xlu1 %v3184_v16, %s5730_s23 }
 0x681   : > { %v1734_v18 = vpop.permute.xlu0 %1733 }
 0x682   : > { %1774 = vst.msk [vmem:[#allocation6 + $0x72] sm:$0x1] %vm1306_vm11, %v1734_v18  ;;  %v3936_v7 = vpop.permute.xlu1 %3935  ;;  %v4693_v40 = vld [vmem:[#allocation6 + $0x58] sm:$0xff] }
 0x683   : > { %4619 = vrot.lane.b32.xlu0 %v3184_v16, %s5726_s18  ;;  %3977 = vst.msk [vmem:[#allocation6 + $0x6c] sm:$0x1] %vm1306_vm11, %v3936_v7  ;;  %5466 = vmatmul.mubr.msk.f32.gmra.mrb[6].mxu1 %vm449_vm7, %v4693_v40 }
 0x684   : > { %5468 = vmatprep.mubr.msk.f32.mxu1 %vm449_vm7, %v4694_v30 }
 0x685   : > { %v1750_v45 = vpop.permute.xlu0 %1749 }
 0x686   : > { %1782 = vst.msk [vmem:[#allocation6 + $0xf2] sm:$0x1] %vm1306_vm11, %v1750_v45  ;;  %v4396_v35 = vpop.permute.xlu1 %4395 }
 0x687   : > { %4437 = vst.msk [vmem:[#allocation6 + $0x6e] sm:$0x1] %vm1306_vm11, %v4396_v35 }
 0x689   : > { %v1964_v29 = vpop.permute.xlu0 %1963 }
 0x68a   : > { %2004 = vst.msk [vmem:[#allocation6 + $0x73] sm:$0x1] %vm1306_vm11, %v1964_v29  ;;  %v2210_v34 = vpop.permute.xlu1 %2209  ;;  %v4681_v29 = vld [vmem:[#allocation6] sm:$0xff] }
 0x68b   : > { %2242 = vst.msk [vmem:[#allocation6 + $0xf4] sm:$0x1] %vm1306_vm11, %v2210_v34 }
 0x68d   : > { %v1980_v41 = vpop.permute.xlu0 %1979 }
 0x68e   : > { %2012 = vst.msk [vmem:[#allocation6 + $0xf3] sm:$0x1] %vm1306_vm11, %v1980_v41  ;;  %v2670_v13 = vpop.permute.xlu1 %2669  ;;  %v4695_v50 = vld [vmem:[#allocation6 + $0x68] sm:$0xff] }
 0x68f   : > { %2702 = vst.msk [vmem:[#allocation6 + $0xf6] sm:$0x1] %vm1306_vm11, %v2670_v13  ;;  %5469 = vmatmul.mubr.msk.f32.gmra.mrb[8].mxu1 %vm449_vm7, %v4695_v50  ;;  %v4682_v13 = vld [vmem:[#allocation6 + $0x8] sm:$0xff] }
 0x691   : > { %v2440_v42 = vpop.permute.xlu0 %2439 }
 0x692   : > { %2472 = vst.msk [vmem:[#allocation6 + $0xf5] sm:$0x1] %vm1306_vm11, %v2440_v42  ;;  %v2194_v8 = vpop.permute.xlu1 %2193 }
 0x693   : > { %2234 = vst.msk [vmem:[#allocation6 + $0x74] sm:$0x1] %vm1306_vm11, %v2194_v8 }
 0x695   : > { %v2900_v31 = vpop.permute.xlu0 %2899 }
 0x696   : > { %2932 = vst.msk [vmem:[#allocation6 + $0xf7] sm:$0x1] %vm1306_vm11, %v2900_v31  ;;  %v2654_v36 = vpop.permute.xlu1 %2653 }
 0x697   : > { %2694 = vst.msk [vmem:[#allocation6 + $0x76] sm:$0x1] %vm1306_vm11, %v2654_v36 }
 0x699   : > { %v2424_v43 = vpop.permute.xlu0 %2423 }
 0x69a   : > { %2464 = vst.msk [vmem:[#allocation6 + $0x75] sm:$0x1] %vm1306_vm11, %v2424_v43  ;;  %v3264_v55 = vpop.permute.xlu1 %3263 }
 0x69b   : > { %3296 = vst.msk [vmem:[#allocation6 + $0xf9] sm:$0x1] %vm1306_vm11, %v3264_v55 }
 0x69d   : > { %v2884_v57 = vpop.permute.xlu0 %2883  ;;  %v4972_v24 = vld [vmem:[#allocation6 + $0xf0] sm:$0xff] }
 0x69e   : > { %2924 = vst.msk [vmem:[#allocation6 + $0x77] sm:$0x1] %vm1306_vm11, %v2884_v57  ;;  %5503 = vmatprep.mubr.msk.f32.mxu0 %vm449_vm7, %v4972_v24  ;;  %v3724_v25 = vpop.permute.xlu1 %3723 }
 0x69f   : > { %3756 = vst.msk [vmem:[#allocation6 + $0xfb] sm:$0x1] %vm1306_vm11, %v3724_v25 }
 0x6a1   : > { %v3494_v44 = vpop.permute.xlu0 %3493 }
 0x6a2   : > { %3526 = vst.msk [vmem:[#allocation6 + $0xfa] sm:$0x1] %vm1306_vm11, %v3494_v44  ;;  %v4184_v3 = vpop.permute.xlu1 %4183 }
 0x6a3   : > { %4216 = vst.msk [vmem:[#allocation6 + $0xfd] sm:$0x1] %vm1306_vm11, %v4184_v3 }
 0x6a5   : > { %v3954_v46 = vpop.permute.xlu0 %3953  ;;  %v4696_v47 = vld [vmem:[#allocation6 + $0x70] sm:$0xff] }
 0x6a6   : > { %3986 = vst.msk [vmem:[#allocation6 + $0xfc] sm:$0x1] %vm1306_vm11, %v3954_v46  ;;  %5471 = vmatprep.mubr.msk.f32.mxu1 %vm449_vm7, %v4696_v47  ;;  %v4644_v38 = vpop.permute.xlu1 %4643 }
 0x6a7   : > { %4676 = vst.msk [vmem:[#allocation6 + $0xff] sm:$0x1] %vm1306_vm11, %v4644_v38 }
 0x6a9   : > { %v4414_v49 = vpop.permute.xlu0 %4413 }
 0x6aa   : > { %4446 = vst.msk [vmem:[#allocation6 + $0xfe] sm:$0x1] %vm1306_vm11, %v4414_v49  ;;  %v2872_v15 = vpop.permute.xlu1 %2871 }
 0x6ab   : > { %2918 = vst.msk [vmem:[#allocation6 + $0x17] sm:$0x1] %vm1306_vm11, %v2872_v15 }
 0x6ad   : > { %v2642_v33 = vpop.permute.xlu0 %2641 }
 0x6ae   : > { %2688 = vst.msk [vmem:[#allocation6 + $0x16] sm:$0x1] %vm1306_vm11, %v2642_v33  ;;  %v3466_v51 = vpop.permute.xlu1 %3465 }
 0x6af   : > { %3512 = vst.msk [vmem:[#allocation6 + $0x1a] sm:$0x1] %vm1306_vm11, %v3466_v51 }
 0x6b1   : > { %v3236_v52 = vpop.permute.xlu0 %3235  ;;  %v4973_v53 = vld [vmem:[#allocation6 + $0xf8] sm:$0xff] }
 0x6b2   : > { %3282 = vst.msk [vmem:[#allocation6 + $0x19] sm:$0x1] %vm1306_vm11, %v3236_v52  ;;  %5504 = vmatmul.mubr.msk.f32.gmra.mrb[10].mxu0 %vm449_vm7, %v4973_v53  ;;  %v3926_v56 = vpop.permute.xlu1 %3925 }
 0x6b3   : > { %5510 = vmatprep.mubr.msk.f32.mxu0 %vm449_vm7, %v4957_v1  ;;  %3972 = vst.msk [vmem:[#allocation6 + $0x1c] sm:$0x1] %vm1306_vm11, %v3926_v56 }
 0x6b5   : > { %v3696_v19 = vpop.permute.xlu0 %3695  ;;  %v4683_v50 = vld [vmem:[#allocation6 + $0x10] sm:$0xff] }
 0x6b6   : > { %3742 = vst.msk [vmem:[#allocation6 + $0x1b] sm:$0x1] %vm1306_vm11, %v3696_v19  ;;  %5511 = vmatmul.mubr.msk.f32.vlgmr.msra.gmra.mrb[4].mxu0 %vm449_vm7, %v4958_v62  ;;  %v4386_v59 = vpop.permute.xlu1 %4385 }
 0x6b7   : > { %5513 = vmatprep.mubr.msk.f32.mxu0 %vm449_vm7, %v4959_v58  ;;  %4432 = vst.msk [vmem:[#allocation6 + $0x1e] sm:$0x1] %vm1306_vm11, %v4386_v59 }
 0x6b9   : > { %v4156_v20 = vpop.permute.xlu0 %4155 }
 0x6ba   : > { %4202 = vst.msk [vmem:[#allocation6 + $0x1d] sm:$0x1] %vm1306_vm11, %v4156_v20  ;;  %5514 = vmatmul.mubr.msk.f32.gmra.mrb[6].mxu0 %vm449_vm7, %v4960_v61  ;;  %v2184_v2 = vpop.permute.xlu1 %2183 }
 0x6bb   : > { %5516 = vmatprep.mubr.msk.f32.mxu0 %vm449_vm7, %v4961_v63  ;;  %2229 = vst.msk [vmem:[#allocation6 + $0x24] sm:$0x1] %vm1306_vm11, %v2184_v2 }
 0x6bd   : > { %v4616_v39 = vpop.permute.xlu0 %4615 }
 0x6be   : > { %4662 = vst.msk [vmem:[#allocation6 + $0x1f] sm:$0x1] %vm1306_vm11, %v4616_v39  ;;  %5517 = vmatmul.mubr.msk.f32.gmra.mrb[8].mxu0 %vm449_vm7, %v4962_v23  ;;  %v2644_v6 = vpop.permute.xlu1 %2643 }
 0x6bf   : > { %5519 = vmatprep.mubr.msk.f32.mxu0 %vm449_vm7, %v4963_v4  ;;  %2689 = vst.msk [vmem:[#allocation6 + $0x26] sm:$0x1] %vm1306_vm11, %v2644_v6 }
 0x6c1   : > { %v2414_v48 = vpop.permute.xlu0 %2413 }
 0x6c2   : > { %2459 = vst.msk [vmem:[#allocation6 + $0x25] sm:$0x1] %vm1306_vm11, %v2414_v48  ;;  %5520 = vmatmul.mubr.msk.f32.gmra.mrb[10].mxu0 %vm449_vm7, %v4964_v9  ;;  %v3238_v11 = vpop.permute.xlu1 %3237 }
 0x6c3   : > { %3283 = vst.msk [vmem:[#allocation6 + $0x29] sm:$0x1] %vm1306_vm11, %v3238_v11 }
 0x6c5   : > { %v2874_v60 = vpop.permute.xlu0 %2873  ;;  %v4684_v31 = vld [vmem:[#allocation6 + $0x18] sm:$0xff] }
 0x6c6   : > { %2919 = vst.msk [vmem:[#allocation6 + $0x27] sm:$0x1] %vm1306_vm11, %v2874_v60  ;;  %v3698_v12 = vpop.permute.xlu1 %3697 }
 0x6c7   : > { %3743 = vst.msk [vmem:[#allocation6 + $0x2b] sm:$0x1] %vm1306_vm11, %v3698_v12 }
 0x6c9   : > { %v3468_v54 = vpop.permute.xlu0 %3467 }
 0x6ca   : > { %3513 = vst.msk [vmem:[#allocation6 + $0x2a] sm:$0x1] %vm1306_vm11, %v3468_v54  ;;  %v4158_v28 = vpop.permute.xlu1 %4157 }
 0x6cb   : > { %4203 = vst.msk [vmem:[#allocation6 + $0x2d] sm:$0x1] %vm1306_vm11, %v4158_v28 }
 0x6cd   : > { %v3928_v21 = vpop.permute.xlu0 %3927  ;;  %v4685_v36 = vld [vmem:[#allocation6 + $0x20] sm:$0xff] }
 0x6ce   : > { %3973 = vst.msk [vmem:[#allocation6 + $0x2c] sm:$0x1] %vm1306_vm11, %v3928_v21  ;;  %v4618_v10 = vpop.permute.xlu1 %4617 }
 0x6cf   : > { %4663 = vst.msk [vmem:[#allocation6 + $0x2f] sm:$0x1] %vm1306_vm11, %v4618_v10 }
 0x6d1   : > { %v4388_v22 = vpop.permute.xlu0 %4387 }
 0x6d2   : > { %4433 = vst.msk [vmem:[#allocation6 + $0x2e] sm:$0x1] %vm1306_vm11, %v4388_v22  ;;  %v2416_v0 = vpop.permute.xlu1 %2415 }
 0x6d3   : > { %2460 = vst.msk [vmem:[#allocation6 + $0x35] sm:$0x1] %vm1306_vm11, %v2416_v0 }
 0x6d5   : > { %v2186_v14 = vpop.permute.xlu0 %2185 }
 0x6d6   : > { %2230 = vst.msk [vmem:[#allocation6 + $0x34] sm:$0x1] %vm1306_vm11, %v2186_v14  ;;  %v3248_v16 = vpop.permute.xlu1 %3247 }
 0x6d7   : > { %3288 = vst.msk [vmem:[#allocation6 + $0x79] sm:$0x1] %vm1306_vm11, %v3248_v16 }
 0x6d9   : > { %v2646_v17 = vpop.permute.xlu0 %2645  ;;  %v4686_v43 = vld [vmem:[#allocation6 + $0x28] sm:$0xff] }
 0x6da   : > { %2690 = vst.msk [vmem:[#allocation6 + $0x36] sm:$0x1] %vm1306_vm11, %v2646_v17  ;;  %v3708_v27 = vpop.permute.xlu1 %3707 }
 0x6db   : > { %3748 = vst.msk [vmem:[#allocation6 + $0x7b] sm:$0x1] %vm1306_vm11, %v3708_v27 }
 0x6dd   : > { %v3478_v32 = vpop.permute.xlu0 %3477 }
 0x6de   : > { %3518 = vst.msk [vmem:[#allocation6 + $0x7a] sm:$0x1] %vm1306_vm11, %v3478_v32  ;;  %v4168_v37 = vpop.permute.xlu1 %4167 }
 0x6df   : > { %4208 = vst.msk [vmem:[#allocation6 + $0x7d] sm:$0x1] %vm1306_vm11, %v4168_v37 }
 0x6e1   : > { %v3938_v5 = vpop.permute.xlu0 %3937 }
 0x6e2   : > { %3978 = vst.msk [vmem:[#allocation6 + $0x7c] sm:$0x1] %vm1306_vm11, %v3938_v5  ;;  %v4628_v26 = vpop.permute.xlu1 %4627 }
 0x6e3   : > { %4668 = vst.msk [vmem:[#allocation6 + $0x7f] sm:$0x1] %vm1306_vm11, %v4628_v26 }
 0x6e5   : > { %v4398_v18 = vpop.permute.xlu0 %4397 }
 0x6e6   : > { %4438 = vst.msk [vmem:[#allocation6 + $0x7e] sm:$0x1] %vm1306_vm11, %v4398_v18  ;;  %v2876_v7 = vpop.permute.xlu1 %2875 }
 0x6e7   : > { %2920 = vst.msk [vmem:[#allocation6 + $0x37] sm:$0x1] %vm1306_vm11, %v2876_v7 }
 0x6e9   : > { %v3240_v40 = vpop.permute.xlu0 %3239 }
 0x6ea   : > { %3284 = vst.msk [vmem:[#allocation6 + $0x39] sm:$0x1] %vm1306_vm11, %v3240_v40  ;;  %v3470_v30 = vpop.permute.xlu1 %3469 }
 0x6eb   : > { %3514 = vst.msk [vmem:[#allocation6 + $0x3a] sm:$0x1] %vm1306_vm11, %v3470_v30 }
 0x6ed   : > { %v3700_v45 = vpop.permute.xlu0 %3699  ;;  %v4697_v35 = vld [vmem:[#allocation6 + $0x78] sm:$0xff] }
 0x6ee   : > { %3744 = vst.msk [vmem:[#allocation6 + $0x3b] sm:$0x1] %vm1306_vm11, %v3700_v45  ;;  %5472 = vmatmul.mubr.msk.f32.gmra.mrb[10].mxu1 %vm449_vm7, %v4697_v35  ;;  %v3930_v34 = vpop.permute.xlu1 %3929  ;;  %v4687_v55 = vld [vmem:[#allocation6 + $0x30] sm:$0xff] }
 0x6ef   : > { %5478 = vmatprep.mubr.msk.f32.mxu1 %vm449_vm7, %v4681_v29  ;;  %3974 = vst.msk [vmem:[#allocation6 + $0x3c] sm:$0x1] %vm1306_vm11, %v3930_v34 }
 0x6f1   : > { %v4160_v41 = vpop.permute.xlu0 %4159 }
 0x6f2   : > { %4204 = vst.msk [vmem:[#allocation6 + $0x3d] sm:$0x1] %vm1306_vm11, %v4160_v41  ;;  %5479 = vmatmul.mubr.msk.f32.vlgmr.msra.gmra.mrb[4].mxu1 %vm449_vm7, %v4682_v13  ;;  %v4390_v42 = vpop.permute.xlu1 %4389 }
 0x6f3   : > { %5481 = vmatprep.mubr.msk.f32.mxu1 %vm449_vm7, %v4683_v50  ;;  %4434 = vst.msk [vmem:[#allocation6 + $0x3e] sm:$0x1] %vm1306_vm11, %v4390_v42 }
 0x6f5   : > { %v4620_v8 = vpop.permute.xlu0 %4619 }
 0x6f6   : > { %4664 = vst.msk [vmem:[#allocation6 + $0x3f] sm:$0x1] %vm1306_vm11, %v4620_v8  ;;  %5482 = vmatmul.mubr.msk.f32.gmra.mrb[6].mxu1 %vm449_vm7, %v4684_v31 }
 0x6f7   : > { %5484 = vmatprep.mubr.msk.f32.mxu1 %vm449_vm7, %v4685_v36 }
 0x6fa   : > { %5485 = vmatmul.mubr.msk.f32.gmra.mrb[8].mxu1 %vm449_vm7, %v4686_v43 }
 0x6fb   : > { %5487 = vmatprep.mubr.msk.f32.mxu1 %vm449_vm7, %v4687_v55 }
 0x6fd   : > { %v4688_v57 = vld [vmem:[#allocation6 + $0x38] sm:$0xff] }
 0x6fe   : > { %5488 = vmatmul.mubr.msk.f32.gmra.mrb[10].mxu1 %vm449_vm7, %v4688_v57 }
 0x789   : > { %v5512_v24 = vpop.f32.mrb[4].mxu0 }
 0x78a   : > { %5250 = vrot.lane.b32.xlu0 %v5512_v24, %s5730_s23  ;;  %v5193_v25 = vpop.f32.mrb[5].mxu0 }
 0x78b   : > { %5248 = vrot.lane.b32.xlu1 %v5193_v25, %s5730_s23 }
 0x78d   : > { %v5515_v44 = vpop.f32.mrb[6].mxu0 }
 0x78e   : > { %5254 = vrot.lane.b32.xlu0 %v5515_v44, %s5730_s23  ;;  %v5203_v3 = vpop.f32.mrb[7].mxu0 }
 0x78f   : > { %5252 = vrot.lane.b32.xlu1 %v5203_v3, %s5730_s23 }
 0x791   : > { %v5518_v46 = vpop.f32.mrb[8].mxu0 }
 0x792   : > { %5258 = vrot.lane.b32.xlu0 %v5518_v46, %s5730_s23  ;;  %v5213_v47 = vpop.f32.mrb[9].mxu0 }
 0x793   : > { %5256 = vrot.lane.b32.xlu1 %v5213_v47, %s5730_s23 }
 0x795   : > { %v5521_v38 = vpop.f32.mrb[10].mxu0 }
 0x796   : > { %5262 = vrot.lane.b32.xlu0 %v5521_v38, %s5730_s23  ;;  %v5223_v49 = vpop.f32.mrb[11].mxu0 }
 0x797   : > { %5260 = vrot.lane.b32.xlu1 %v5223_v49, %s5730_s23 }
 0x7c5   : > { %v5480_v15 = vpop.f32.mrb[4].mxu1 }
 0x7c6   : > { %5233 = vst.msk [vmem:[%s5826_s12 + $0x8] sm:$0xff] %vm1096_vm10, %v5480_v15  ;;  %v4917_v33 = vpop.f32.mrb[5].mxu1 }
 0x7c7   : > { %5232 = vst.msk [vmem:[%s5826_s12] sm:$0xff] %vm1096_vm10, %v4917_v33 }
 0x7c9   : > { %v5483_v51 = vpop.f32.mrb[6].mxu1 }
 0x7ca   : > { %5235 = vst.msk [vmem:[%s5826_s12 + $0x18] sm:$0xff] %vm1096_vm10, %v5483_v51  ;;  %v4927_v52 = vpop.f32.mrb[7].mxu1 }
 0x7cb   : > { %5234 = vst.msk [vmem:[%s5826_s12 + $0x10] sm:$0xff] %vm1096_vm10, %v4927_v52 }
 0x7cd   : > { %v5486_v53 = vpop.f32.mrb[8].mxu1 }
 0x7ce   : > { %5237 = vst.msk [vmem:[%s5826_s12 + $0x28] sm:$0xff] %vm1096_vm10, %v5486_v53  ;;  %v4937_v1 = vpop.f32.mrb[9].mxu1 }
 0x7cf   : > { %5236 = vst.msk [vmem:[%s5826_s12 + $0x20] sm:$0xff] %vm1096_vm10, %v4937_v1 }
 0x7d1   : > { %v5489_v56 = vpop.f32.mrb[10].mxu1 }
 0x7d2   : > { %5239 = vst.msk [vmem:[%s5826_s12 + $0x38] sm:$0xff] %vm1096_vm10, %v5489_v56  ;;  %v4947_v19 = vpop.f32.mrb[11].mxu1 }
 0x7d3   : > { %5238 = vst.msk [vmem:[%s5826_s12 + $0x30] sm:$0xff] %vm1096_vm10, %v4947_v19 }
 0x7fc   : > { %v5251_v62 = vpop.permute.xlu0 %5250 }
 0x7fd   : > { %5274 = vst.msk [vmem:[%s5826_s12 + $0x8] sm:$0xff] %vm5272_vm12, %v5251_v62  ;;  %v5249_v58 = vpop.permute.xlu1 %5248 }
 0x7fe   : > { %5273 = vst.msk [vmem:[%s5826_s12] sm:$0xff] %vm5272_vm12, %v5249_v58 }
 0x800   : > { %v5255_v59 = vpop.permute.xlu0 %5254 }
 0x801   : > { %5276 = vst.msk [vmem:[%s5826_s12 + $0x18] sm:$0xff] %vm5272_vm12, %v5255_v59  ;;  %v5253_v20 = vpop.permute.xlu1 %5252 }
 0x802   : > { %5275 = vst.msk [vmem:[%s5826_s12 + $0x10] sm:$0xff] %vm5272_vm12, %v5253_v20 }
 0x804   : > { %v5259_v61 = vpop.permute.xlu0 %5258 }
 0x805   : > { %5278 = vst.msk [vmem:[%s5826_s12 + $0x28] sm:$0xff] %vm5272_vm12, %v5259_v61  ;;  %v5257_v63 = vpop.permute.xlu1 %5256 }
 0x806   : > { %5277 = vst.msk [vmem:[%s5826_s12 + $0x20] sm:$0xff] %vm5272_vm12, %v5257_v63 }
 0x808   : > { %v5263_v2 = vpop.permute.xlu0 %5262 }
 0x809   : > { %5280 = vst.msk [vmem:[%s5826_s12 + $0x38] sm:$0xff] %vm5272_vm12, %v5263_v2  ;;  %v5261_v39 = vpop.permute.xlu1 %5260 }
 0x80a   : > { %5279 = vst.msk [vmem:[%s5826_s12 + $0x30] sm:$0xff] %vm5272_vm12, %v5261_v39 }
 0x80b PF: > { %s20_s13 = sadd.s32 1, %s5716_s13  }
 0x80c   : > { %p17_p4 = scmp.ge.s32.totalorder %s20_s13, 4  }
 0x80e   :  { %19 = sbr.rel (!%p17_p4) target bundleno = 1 (0x1), region = 97 }

</bundles_post_ra>
